<compile_context>
chip_gen: v7x
topology: tpu7x:2x2x1
jax: 0.10.0
libtpu: 0.0.40
codegen_flags: <defaults>
</compile_context>

<pallas_src>
from functools import partial

import jax
import jax.numpy as jnp
from jax.experimental import pallas as pl
from jax.experimental.pallas import tpu as pltpu


def block_kernel(xp_ref, w_ref, b_ref, g_ref, beta_ref, o_ref, *, eps):
    # xp_ref  : (N, H+2, W+2, Cin)  zero-padded NHWC input (f32)
    # w_ref   : (9*Cin, Cout)       im2col weight, rows ordered (kh, kw, ci)
    # b_ref   : (1, Cout)           conv bias
    # g_ref   : (1, Cout)           BN gamma
    # beta_ref: (1, Cout)           BN beta
    # o_ref   : (N, Cout, H*W)      output, lane-dense (H*W on the lane axis)
    N = xp_ref.shape[0]
    H = xp_ref.shape[1] - 2
    W = xp_ref.shape[2] - 2
    Cin = xp_ref.shape[3]
    HW = H * W

    xp = xp_ref[...]                                   # (N, H+2, W+2, Cin)

    # --- im2col: 9 shifted patches -> one (N*H*W, 9*Cin) matrix --------------
    cols = []
    for kh in range(3):
        for kw in range(3):
            cols.append(xp[:, kh:kh + H, kw:kw + W, :].reshape(N * HW, Cin))
    pat = jnp.concatenate(cols, axis=1)                # (N*HW, 9*Cin)

    # --- single MXU matmul + bias --------------------------------------------
    y = jnp.dot(pat, w_ref[...], preferred_element_type=jnp.float32)
    y = y + b_ref[...]                                 # (N*HW, Cout)

    # --- training-mode BatchNorm statistics over (N, H, W) -------------------
    inv_count = 1.0 / float(N * HW)
    mean = jnp.sum(y, axis=0, keepdims=True) * inv_count          # (1, Cout)
    d = y - mean
    var = jnp.sum(d * d, axis=0, keepdims=True) * inv_count       # biased var
    scale = g_ref[...] * jax.lax.rsqrt(var + eps)                  # (1, Cout)

    # --- normalize + affine + ReLU -------------------------------------------
    out = jnp.maximum(d * scale + beta_ref[...], 0.0)              # (N*HW, Cout)

    # --- lane-dense NCHW-flat writeback ---------------------------------------
    out_t = jnp.transpose(out)                                     # (Cout, N*HW)
    for n in range(N):
        # 128-aligned lane slice (HW = 256), full (Cout, HW) store per image.
        o_ref[n] = out_t[:, n * HW:(n + 1) * HW]


def block_forward(x_nchw, weight_oihw, bias, gamma, beta, eps=1e-5):
    """Forward pass of `Block` (conv3x3 + BN(train) + ReLU). NCHW in / NCHW out."""
    N, Cin, H, W = x_nchw.shape
    Cout = weight_oihw.shape[0]
    HW = H * W

    # Tiny glue (fused by XLA into one op): NCHW -> NHWC + zero pad (pad=1).
    x_nhwc = jnp.transpose(x_nchw, (0, 2, 3, 1)).astype(jnp.float32)
    xp = jnp.pad(x_nhwc, ((0, 0), (1, 1), (1, 1), (0, 0)))   # (N, H+2, W+2, Cin)

    # im2col weight: row index = (kh*3 + kw)*Cin + ci, matching kernel patch order.
    w2 = jnp.transpose(weight_oihw, (2, 3, 1, 0)).astype(jnp.float32)
    w2 = w2.reshape(9 * Cin, Cout)
    b2 = bias.astype(jnp.float32).reshape(1, Cout)
    g2 = gamma.astype(jnp.float32).reshape(1, Cout)
    be2 = beta.astype(jnp.float32).reshape(1, Cout)

    vmem = pl.BlockSpec(memory_space=pltpu.MemorySpace.VMEM)
    out_flat = pl.pallas_call(
        partial(block_kernel, eps=eps),
        out_shape=jax.ShapeDtypeStruct((N, Cout, HW), jnp.float32),
        in_specs=[vmem, vmem, vmem, vmem, vmem],
        out_specs=vmem,
    )(xp, w2, b2, g2, be2)

    # Free reshape back to NCHW (no data movement: (N, Cout, H*W) is contiguous).
    return out_flat.reshape(N, Cout, H, W)


def block_reference(x_nchw, weight_oihw, bias, gamma, beta, eps=1e-5):
    """Pure-JAX reference for correctness checking."""
    y = jax.lax.conv_general_dilated(
        x_nchw.astype(jnp.float32), weight_oihw.astype(jnp.float32),
        window_strides=(1, 1), padding=((1, 1), (1, 1)),
        dimension_numbers=("NCHW", "OIHW", "NCHW"))
    y = y + bias.reshape(1, -1, 1, 1)
    mean = jnp.mean(y, axis=(0, 2, 3), keepdims=True)
    var = jnp.mean((y - mean) ** 2, axis=(0, 2, 3), keepdims=True)
    y = (y - mean) * jax.lax.rsqrt(var + eps)
    y = y * gamma.reshape(1, -1, 1, 1) + beta.reshape(1, -1, 1, 1)
    return jnp.maximum(y, 0.0)


if __name__ == "__main__":
    # Small shapes consistent with the module: N=2, Cin=4, H=W=16, Cout=8.
    key = jax.random.PRNGKey(0)
    kx, kw, kb, kg, kbeta = jax.random.split(key, 5)

    N, Cin, H, W, Cout = 2, 4, 16, 16, 8
    x = jax.random.normal(kx, (N, Cin, H, W), dtype=jnp.float32)

    # Deterministic parameter init (synthetic; not a checkpoint load).
    fan_in = Cin * 3 * 3
    bound = 1.0 / (fan_in ** 0.5)
    weight = jax.random.uniform(kw, (Cout, Cin, 3, 3), minval=-bound, maxval=bound,
                                dtype=jnp.float32)
    bias = jax.random.uniform(kb, (Cout,), minval=-bound, maxval=bound,
                              dtype=jnp.float32)
    gamma = 1.0 + 0.1 * jax.random.normal(kg, (Cout,), dtype=jnp.float32)
    beta = 0.1 * jax.random.normal(kbeta, (Cout,), dtype=jnp.float32)

    out = block_forward(x, weight, bias, gamma, beta)
    out = jax.block_until_ready(out)

    assert out.shape == (N, Cout, H, W)
    assert bool(jnp.all(jnp.isfinite(out)))
    assert bool(jnp.all(out >= 0.0))  # ReLU output

    ref = block_reference(x, weight, bias, gamma, beta)
    assert bool(jnp.allclose(out, ref, atol=2e-2, rtol=2e-2))

    print("KERNEL_OK")
</pallas_src>

<mosaic_0001>
module attributes {stable_mosaic.version = 11 : i64} {
  func.func @block_kernel(%arg0: memref<2x18x18x4xf32, #tpu.memory_space<vmem>>, %arg1: memref<36x8xf32, #tpu.memory_space<vmem>>, %arg2: memref<1x8xf32, #tpu.memory_space<vmem>>, %arg3: memref<1x8xf32, #tpu.memory_space<vmem>>, %arg4: memref<1x8xf32, #tpu.memory_space<vmem>>, %arg5: memref<2x8x256xf32, #tpu.memory_space<vmem>>) attributes {dimension_semantics = [], scalar_prefetch = 0 : i64, scratch_operands = 0 : i64, tpu.core_type = #tpu.core_type<tc>} {
    %c0 = arith.constant 0 : index
    %c0_0 = arith.constant 0 : index
    %c0_1 = arith.constant 0 : index
    %c0_2 = arith.constant 0 : index
    %0 = vector.load %arg0[%c0, %c0_0, %c0_1, %c0_2] : memref<2x18x18x4xf32, #tpu.memory_space<vmem>>, vector<2x18x18x4xf32>
    %1 = vector.extract_strided_slice %0 {offsets = [0, 0, 0, 0], sizes = [2, 16, 16, 4], strides = [1, 1, 1, 1]} : vector<2x18x18x4xf32> to vector<2x16x16x4xf32>
    %2 = vector.shape_cast %1 : vector<2x16x16x4xf32> to vector<512x4xf32>
    %3 = vector.extract_strided_slice %0 {offsets = [0, 0, 1, 0], sizes = [2, 16, 16, 4], strides = [1, 1, 1, 1]} : vector<2x18x18x4xf32> to vector<2x16x16x4xf32>
    %4 = vector.shape_cast %3 : vector<2x16x16x4xf32> to vector<512x4xf32>
    %5 = vector.extract_strided_slice %0 {offsets = [0, 0, 2, 0], sizes = [2, 16, 16, 4], strides = [1, 1, 1, 1]} : vector<2x18x18x4xf32> to vector<2x16x16x4xf32>
    %6 = vector.shape_cast %5 : vector<2x16x16x4xf32> to vector<512x4xf32>
    %7 = vector.extract_strided_slice %0 {offsets = [0, 1, 0, 0], sizes = [2, 16, 16, 4], strides = [1, 1, 1, 1]} : vector<2x18x18x4xf32> to vector<2x16x16x4xf32>
    %8 = vector.shape_cast %7 : vector<2x16x16x4xf32> to vector<512x4xf32>
    %9 = vector.extract_strided_slice %0 {offsets = [0, 1, 1, 0], sizes = [2, 16, 16, 4], strides = [1, 1, 1, 1]} : vector<2x18x18x4xf32> to vector<2x16x16x4xf32>
    %10 = vector.shape_cast %9 : vector<2x16x16x4xf32> to vector<512x4xf32>
    %11 = vector.extract_strided_slice %0 {offsets = [0, 1, 2, 0], sizes = [2, 16, 16, 4], strides = [1, 1, 1, 1]} : vector<2x18x18x4xf32> to vector<2x16x16x4xf32>
    %12 = vector.shape_cast %11 : vector<2x16x16x4xf32> to vector<512x4xf32>
    %13 = vector.extract_strided_slice %0 {offsets = [0, 2, 0, 0], sizes = [2, 16, 16, 4], strides = [1, 1, 1, 1]} : vector<2x18x18x4xf32> to vector<2x16x16x4xf32>
    %14 = vector.shape_cast %13 : vector<2x16x16x4xf32> to vector<512x4xf32>
    %15 = vector.extract_strided_slice %0 {offsets = [0, 2, 1, 0], sizes = [2, 16, 16, 4], strides = [1, 1, 1, 1]} : vector<2x18x18x4xf32> to vector<2x16x16x4xf32>
    %16 = vector.shape_cast %15 : vector<2x16x16x4xf32> to vector<512x4xf32>
    %17 = vector.extract_strided_slice %0 {offsets = [0, 2, 2, 0], sizes = [2, 16, 16, 4], strides = [1, 1, 1, 1]} : vector<2x18x18x4xf32> to vector<2x16x16x4xf32>
    %18 = vector.shape_cast %17 : vector<2x16x16x4xf32> to vector<512x4xf32>
    %19 = tpu.concatenate %2, %4, %6, %8, %10, %12, %14, %16, %18 in 1 : vector<512x4xf32>, vector<512x4xf32>, vector<512x4xf32>, vector<512x4xf32>, vector<512x4xf32>, vector<512x4xf32>, vector<512x4xf32>, vector<512x4xf32>, vector<512x4xf32> -> vector<512x36xf32>
    %c0_3 = arith.constant 0 : index
    %c0_4 = arith.constant 0 : index
    %20 = vector.load %arg1[%c0_3, %c0_4] : memref<36x8xf32, #tpu.memory_space<vmem>>, vector<36x8xf32>
    %cst = arith.constant dense<0.000000e+00> : vector<512x8xf32>
    %21 = tpu.matmul %19, %20, %cst {dimension_numbers = #tpu.dot_dimension_numbers<[1], [0], [0], [1], [0, 0, 1, 1], [], []>} : vector<512x36xf32>, vector<36x8xf32>, vector<512x8xf32> -> vector<512x8xf32>
    %c0_5 = arith.constant 0 : index
    %c0_6 = arith.constant 0 : index
    %22 = vector.load %arg2[%c0_5, %c0_6] : memref<1x8xf32, #tpu.memory_space<vmem>>, vector<1x8xf32>
    %23 = vector.broadcast %22 : vector<1x8xf32> to vector<512x8xf32>
    %24 = arith.addf %21, %23 : vector<512x8xf32>
    %cst_7 = arith.constant dense<0.000000e+00> : vector<8xf32>
    %25 = vector.multi_reduction <add>, %24, %cst_7 [0] : vector<512x8xf32> to vector<8xf32>
    %26 = vector.shape_cast %25 : vector<8xf32> to vector<1x8xf32>
    %cst_8 = arith.constant 0.001953125 : f32
    %27 = vector.broadcast %cst_8 : f32 to vector<1x8xf32>
    %28 = arith.mulf %26, %27 : vector<1x8xf32>
    %29 = vector.broadcast %28 : vector<1x8xf32> to vector<512x8xf32>
    %30 = arith.subf %24, %29 : vector<512x8xf32>
    %31 = arith.mulf %30, %30 : vector<512x8xf32>
    %cst_9 = arith.constant dense<0.000000e+00> : vector<8xf32>
    %32 = vector.multi_reduction <add>, %31, %cst_9 [0] : vector<512x8xf32> to vector<8xf32>
    %33 = vector.shape_cast %32 : vector<8xf32> to vector<1x8xf32>
    %cst_10 = arith.constant 0.001953125 : f32
    %34 = vector.broadcast %cst_10 : f32 to vector<1x8xf32>
    %35 = arith.mulf %33, %34 : vector<1x8xf32>
    %c0_11 = arith.constant 0 : index
    %c0_12 = arith.constant 0 : index
    %36 = vector.load %arg3[%c0_11, %c0_12] : memref<1x8xf32, #tpu.memory_space<vmem>>, vector<1x8xf32>
    %cst_13 = arith.constant 9.99999974E-6 : f32
    %37 = vector.broadcast %cst_13 : f32 to vector<1x8xf32>
    %38 = arith.addf %35, %37 : vector<1x8xf32>
    %39 = math.rsqrt %38 : vector<1x8xf32>
    %40 = arith.mulf %36, %39 : vector<1x8xf32>
    %41 = vector.broadcast %40 : vector<1x8xf32> to vector<512x8xf32>
    %42 = arith.mulf %30, %41 : vector<512x8xf32>
    %c0_14 = arith.constant 0 : index
    %c0_15 = arith.constant 0 : index
    %43 = vector.load %arg4[%c0_14, %c0_15] : memref<1x8xf32, #tpu.memory_space<vmem>>, vector<1x8xf32>
    %44 = vector.broadcast %43 : vector<1x8xf32> to vector<512x8xf32>
    %45 = arith.addf %42, %44 : vector<512x8xf32>
    %cst_16 = arith.constant 0.000000e+00 : f32
    %46 = vector.broadcast %cst_16 : f32 to vector<512x8xf32>
    %47 = arith.maximumf %45, %46 : vector<512x8xf32>
    %48 = tpu.transpose %47, [1, 0] : vector<512x8xf32> -> vector<8x512xf32>
    %49 = vector.extract_strided_slice %48 {offsets = [0, 0], sizes = [8, 256], strides = [1, 1]} : vector<8x512xf32> to vector<8x256xf32>
    %c0_17 = arith.constant 0 : index
    %c0_18 = arith.constant 0 : index
    %c0_19 = arith.constant 0 : index
    %50 = vector.load %arg5[%c0_17, %c0_18, %c0_19] : memref<2x8x256xf32, #tpu.memory_space<vmem>>, vector<1x8x256xf32>
    %51 = vector.shape_cast %50 : vector<1x8x256xf32> to vector<8x256xf32>
    %52 = vector.shape_cast %49 : vector<8x256xf32> to vector<1x8x256xf32>
    tpu.vector_store %arg5[%c0_17, %c0_18, %c0_19], %52 {strides = array<i32>} : memref<2x8x256xf32, #tpu.memory_space<vmem>>, vector<1x8x256xf32>,
    %53 = vector.extract_strided_slice %48 {offsets = [0, 256], sizes = [8, 256], strides = [1, 1]} : vector<8x512xf32> to vector<8x256xf32>
    %c1 = arith.constant 1 : index
    %c0_20 = arith.constant 0 : index
    %c0_21 = arith.constant 0 : index
    %54 = vector.load %arg5[%c1, %c0_20, %c0_21] : memref<2x8x256xf32, #tpu.memory_space<vmem>>, vector<1x8x256xf32>
    %55 = vector.shape_cast %54 : vector<1x8x256xf32> to vector<8x256xf32>
    %56 = vector.shape_cast %53 : vector<8x256xf32> to vector<1x8x256xf32>
    tpu.vector_store %arg5[%c1, %c0_20, %c0_21], %56 {strides = array<i32>} : memref<2x8x256xf32, #tpu.memory_space<vmem>>, vector<1x8x256xf32>,
    return
  }
}

</mosaic_0001>

<bundles_post_ra>
// kernel: tpu_custom_call.1
= control target key start
LH: loop header
LB: loop body
LE: loop exit
PB: predicated region body
PF: predicated region fallthrough
CT: control target
= control target key end

     0   :  { %vm225_vm0 = vcmask 1046528   ;;  %s4393_s11 = smov 4   ;;  %s9603_s0 = inlined_call_operand.vmem [shape: f32[2,18,18,4], index: 0, kind: input, shape index: {}]   ;;  %s9604_s1 = inlined_call_operand.vmem [shape: f32[36,8], index: 1, kind: input, shape index: {}]   ;;  %s9605_s2 = inlined_call_operand.vmem [shape: f32[1,8], index: 2, kind: input, shape index: {}]   ;;  %s9606_s3 = inlined_call_operand.vmem [shape: f32[1,8], index: 3, kind: input, shape index: {}]   ;;  %s9607_s4 = inlined_call_operand.vmem [shape: f32[1,8], index: 4, kind: input, shape index: {}]   ;;  %s9608_s5 = inlined_call_operand.hbm [shape: f32[2,8,256], index: 5, kind: output, shape index: {}]  }
   0x1   :  { %v4436_v0 = vld [vmem:[%s9603_s0 + $0x18] sm:$0xff]  ;;  %v4441_v1 = vld [vmem:[%s9603_s0 + $0x20] sm:$0xff]  ;;  %v4453_v5 = vld [vmem:[%s9603_s0 + $0x8] sm:$0xff] }
   0x2   :  { %v4446_v2 = vld [vmem:[%s9603_s0] sm:$0xff]  ;;  %v231_v3 = vrot.slane %v4436_v0, 1  ;;  %v232_v4 = vrot.slane %v4441_v1, 1  ;;  %v4459_v7 = vld [vmem:[%s9603_s0 + $0x28] sm:$0x3]  ;;  %v227_v8 = vrot.slane %v4453_v5, 1 }
   0x3   :  { %v226_v6 = vrot.slane %v4446_v2, 1  ;;  %v234_v9 = vrot.slane %v4459_v7, 1  ;;  %v4466_v10 = vld [vmem:[%s9603_s0 + $0x10] sm:$0x3]  ;;  %v4471_v11 = vld [vmem:[%s9603_s0 + $0x38] sm:$0xff]  ;;  %v4511_v24 = vld [vmem:[%s9603_s0 + $0x48] sm:$0xff] }
   0x4   :  { %v4474_v12 = vsel %vm225_vm0, %v231_v3, %v232_v4  ;;  %v229_v13 = vrot.slane %v4466_v10, 1  ;;  %v4480_v14 = vld [vmem:[%s9603_s0 + $0x40] sm:$0x3]  ;;  %v4485_v15 = vld [vmem:[%s9603_s0 + $0x30] sm:$0xff]  ;;  %v237_v18 = vrot.slane %v4471_v11, 1  ;;  %v241_v29 = vrot.slane %v4511_v24, 1 }
   0x5   :  { %9938 = vst [vmem:[#allocation5_spill] sm:$0xff] %v4474_v12  ;;  %603 = vrot.lane.b32.xlu1 %v4474_v12, %s4393_s11  ;;  %v228_v16 = vsel %vm225_vm0, %v226_v6, %v227_v8  ;;  %v4492_v17 = vsel %vm225_vm0, %v232_v4, %v234_v9  ;;  %v239_v19 = vrot.slane %v4480_v14, 1  ;;  %v236_v21 = vrot.slane %v4485_v15, 1  ;;  %v4501_v22 = vld [vmem:[%s9603_s0 + $0x50] sm:$0xff]  ;;  %v4506_v23 = vld [vmem:[%s9603_s0 + $0x58] sm:$0x3] }
   0x6   :  { %599 = vrot.lane.b32.xlu0 %v228_v16, %s4393_s11  ;;  %9939 = vst [vmem:[#allocation6_spill] sm:$0xff] %v4492_v17  ;;  %v230_v20 = vsel %vm225_vm0, %v227_v8, %v229_v13  ;;  %v242_v26 = vrot.slane %v4501_v22, 1  ;;  %v244_v27 = vrot.slane %v4506_v23, 1  ;;  %v4528_v30 = vld [vmem:[%s9603_s0 + $0x68] sm:$0xff]  ;;  %v4533_v31 = vld [vmem:[%s9603_s0 + $0x70] sm:$0x3] }
   0x7   :  { %v4517_v25 = vsel %vm225_vm0, %v237_v18, %v239_v19  ;;  %v4522_v28 = vsel %vm225_vm0, %v236_v21, %v237_v18  ;;  %v4538_v32 = vld [vmem:[%s9603_s0 + $0x60] sm:$0xff]  ;;  %v247_v34 = vrot.slane %v4528_v30, 1  ;;  %v249_v35 = vrot.slane %v4533_v31, 1  ;;  %v4561_v39 = vld [vmem:[%s9603_s0 + $0x88] sm:$0x3]  ;;  %v4566_v40 = vld [vmem:[%s9603_s0 + $0x78] sm:$0xff] }
   0x8   :  { %9940 = vst [vmem:[#allocation7_spill] sm:$0xff] %v4517_v25  ;;  %9941 = vst [vmem:[#allocation8_spill] sm:$0xff] %v4522_v28  ;;  %v4545_v33 = vsel %vm225_vm0, %v242_v26, %v244_v27  ;;  %v4550_v36 = vsel %vm225_vm0, %v241_v29, %v242_v26  ;;  %v246_v37 = vrot.slane %v4538_v32, 1  ;;  %v4556_v38 = vld [vmem:[%s9603_s0 + $0x80] sm:$0xff]  ;;  %v254_v43 = vrot.slane %v4561_v39, 1  ;;  %v4584_v46 = vld [vmem:[%s9603_s0 + $0x98] sm:$0xff] }
   0x9   :  { %605 = vrot.lane.b32.xlu1 %v4492_v17, %s4393_s11  ;;  %9942 = vst [vmem:[#allocation9_spill] sm:$0xff] %v4545_v33  ;;  %9943 = vst [vmem:[#allocation10_spill] sm:$0xff] %v4550_v36  ;;  %v4573_v41 = vsel %vm225_vm0, %v247_v34, %v249_v35  ;;  %v252_v42 = vrot.slane %v4556_v38, 1  ;;  %v251_v45 = vrot.slane %v4566_v40, 1  ;;  %v4589_v47 = vld [vmem:[%s9603_s0 + $0xa0] sm:$0x3] }
   0xa   :  { %601 = vrot.lane.b32.xlu0 %v230_v20, %s4393_s11  ;;  %9944 = vst [vmem:[#allocation11_spill] sm:$0xff] %v4573_v41  ;;  %v4578_v44 = vsel %vm225_vm0, %v246_v37, %v247_v34  ;;  %v4594_v48 = vld [vmem:[%s9603_s0 + $0x90] sm:$0xff]  ;;  %v257_v50 = vrot.slane %v4584_v46, 1  ;;  %v259_v51 = vrot.slane %v4589_v47, 1  ;;  %v4617_v55 = vld [vmem:[%s9603_s0 + $0xb8] sm:$0x3] }
   0xb   :  { %9945 = vst [vmem:[#allocation12_spill] sm:$0xff] %v4578_v44  ;;  %v4601_v49 = vsel %vm225_vm0, %v252_v42, %v254_v43  ;;  %v4606_v52 = vsel %vm225_vm0, %v251_v45, %v252_v42  ;;  %v256_v53 = vrot.slane %v4594_v48, 1  ;;  %v4612_v54 = vld [vmem:[%s9603_s0 + $0xb0] sm:$0xff]  ;;  %v4622_v56 = vld [vmem:[%s9603_s0 + $0xa8] sm:$0xff]  ;;  %v264_v59 = vrot.slane %v4617_v55, 1  ;;  %v4650_v3 = vld [vmem:[%s9603_s0 + $0xc0] sm:$0xff] }
   0xc   :  { %9946 = vst [vmem:[#allocation13_spill] sm:$0xff] %v4601_v49  ;;  %9947 = vst [vmem:[#allocation14_spill] sm:$0xff] %v4606_v52  ;;  %v4629_v57 = vsel %vm225_vm0, %v257_v50, %v259_v51  ;;  %v262_v58 = vrot.slane %v4612_v54, 1  ;;  %v261_v61 = vrot.slane %v4622_v56, 1  ;;  %v4640_v62 = vld [vmem:[%s9603_s0 + $0xc8] sm:$0xff]  ;;  %v266_v13 = vrot.slane %v4650_v3, 1 }
   0xd   :  { %609 = vrot.lane.b32.xlu1 %v4517_v25, %s4393_s11  ;;  %9948 = vst [vmem:[#allocation15_spill] sm:$0xff] %v4629_v57  ;;  %v4634_v60 = vsel %vm225_vm0, %v256_v53, %v257_v50  ;;  %v4645_v63 = vld [vmem:[%s9603_s0 + $0xd0] sm:$0x3]  ;;  %v267_v6 = vrot.slane %v4640_v62, 1  ;;  %v4668_v16 = vld [vmem:[%s9603_s0 + $0xe0] sm:$0xff]  ;;  %v4678_v19 = vld [vmem:[%s9603_s0 + $0xd8] sm:$0xff] }
   0xe   :  { %607 = vrot.lane.b32.xlu0 %v4522_v28, %s4393_s11  ;;  %9949 = vst [vmem:[#allocation16_spill] sm:$0xff] %v4634_v60  ;;  %v4657_v4 = vsel %vm225_vm0, %v262_v58, %v264_v59  ;;  %v269_v8 = vrot.slane %v4645_v63, 1  ;;  %v4662_v9 = vsel %vm225_vm0, %v261_v61, %v262_v58  ;;  %v4673_v18 = vld [vmem:[%s9603_s0 + $0xe8] sm:$0x3]  ;;  %v272_v21 = vrot.slane %v4668_v16, 1  ;;  %v4696_v34 = vld [vmem:[%s9603_s0 + $0xf8] sm:$0xff] }
   0xf   :  { %9950 = vst [vmem:[#allocation17_spill] sm:$0xff] %v4657_v4  ;;  %9951 = vst [vmem:[#allocation18_spill] sm:$0xff] %v4662_v9  ;;  %v274_v26 = vrot.slane %v4673_v18, 1  ;;  %v4690_v27 = vsel %vm225_vm0, %v266_v13, %v267_v6  ;;  %v271_v29 = vrot.slane %v4678_v19, 1  ;;  %v4701_v35 = vld [vmem:[%s9603_s0 + $0x100] sm:$0x3] }
  0x10   :  { %v4685_v20 = vsel %vm225_vm0, %v267_v6, %v269_v8  ;;  %9953 = vst [vmem:[#allocation20_spill] sm:$0xff] %v4690_v27  ;;  %v4706_v37 = vld [vmem:[%s9603_s0 + $0xf0] sm:$0xff] }
  0x11   :  { %613 = vrot.lane.b32.xlu1 %v4545_v33, %s4393_s11  ;;  %9952 = vst [vmem:[#allocation19_spill] sm:$0xff] %v4685_v20 }
  0x12   :  { %611 = vrot.lane.b32.xlu0 %v4550_v36, %s4393_s11 }
  0x15   :  { %617 = vrot.lane.b32.xlu1 %v4573_v41, %s4393_s11 }
  0x16   :  { %615 = vrot.lane.b32.xlu0 %v4578_v44, %s4393_s11 }
  0x19   :  { %621 = vrot.lane.b32.xlu1 %v4601_v49, %s4393_s11 }
  0x1a   :  { %619 = vrot.lane.b32.xlu0 %v4606_v52, %s4393_s11 }
  0x1d   :  { %625 = vrot.lane.b32.xlu1 %v4629_v57, %s4393_s11 }
  0x1e   :  { %623 = vrot.lane.b32.xlu0 %v4634_v60, %s4393_s11 }
  0x21   :  { %629 = vrot.lane.b32.xlu1 %v4657_v4, %s4393_s11 }
  0x22   :  { %627 = vrot.lane.b32.xlu0 %v4662_v9, %s4393_s11 }
  0x25   :  { %633 = vrot.lane.b32.xlu1 %v4685_v20, %s4393_s11 }
  0x26   :  { %10 = vsyncpa [#allocation3], 0  ;;  %631 = vrot.lane.b32.xlu0 %v4690_v27, %s4393_s11  ;;  %v4713_v42 = vsel %vm225_vm0, %v272_v21, %v274_v26  ;;  %v277_v43 = vrot.slane %v4696_v34, 1  ;;  %v279_v45 = vrot.slane %v4701_v35, 1  ;;  %v4718_v50 = vsel %vm225_vm0, %v271_v29, %v272_v21  ;;  %v4724_v53 = vld [vmem:[%s9603_s0 + $0x110] sm:$0xff]  ;;  %v4734_v59 = vld [vmem:[%s9603_s0 + $0x108] sm:$0xff] }
  0x27   :  { %9954 = vst [vmem:[#allocation21_spill] sm:$0xff] %v4713_v42  ;;  %9955 = vst [vmem:[#allocation22_spill] sm:$0xff] %v4718_v50  ;;  %v276_v51 = vrot.slane %v4706_v37, 1  ;;  %v4729_v58 = vld [vmem:[%s9603_s0 + $0x118] sm:$0x3]  ;;  %v282_v6 = vrot.slane %v4724_v53, 1 }
  0x28   :  { %v4741_v61 = vsel %vm225_vm0, %v277_v43, %v279_v45  ;;  %v284_v8 = vrot.slane %v4729_v58, 1  ;;  %v281_v21 = vrot.slane %v4734_v59, 1  ;;  %v4752_v26 = vld [vmem:[%s9603_s0 + $0x128] sm:$0xff]  ;;  %v4757_v29 = vld [vmem:[%s9603_s0 + $0x130] sm:$0x3]  ;;  %v4762_v45 = vld [vmem:[%s9603_s0 + $0x120] sm:$0xff] }
  0x29   :  { %637 = vrot.lane.b32.xlu1 %v4713_v42, %s4393_s11  ;;  %9956 = vst [vmem:[#allocation23_spill] sm:$0xff] %v4741_v61  ;;  %v4746_v13 = vsel %vm225_vm0, %v276_v51, %v277_v43  ;;  %v287_v51 = vrot.slane %v4752_v26, 1  ;;  %v286_v27 = vrot.slane %v4762_v45, 1  ;;  %v4780_v20 = vld [vmem:[%s9603_s0 + $0x140] sm:$0xff]  ;;  %v4808_v60 = vld [vmem:[%s9603_s0 + $0x158] sm:$0xff]  ;;  %v4836_v49 = vld [vmem:[%s9603_s0 + $0x170] sm:$0xff] }
  0x2a   :  { %635 = vrot.lane.b32.xlu0 %v4718_v50, %s4393_s11  ;;  %9957 = vst [vmem:[#allocation24_spill] sm:$0xff] %v4746_v13  ;;  %v4769_v43 = vsel %vm225_vm0, %v282_v6, %v284_v8  ;;  %v289_v50 = vrot.slane %v4757_v29, 1  ;;  %v4774_v42 = vsel %vm225_vm0, %v281_v21, %v282_v6  ;;  %v4790_v8 = vld [vmem:[%s9603_s0 + $0x138] sm:$0xff]  ;;  %v292_v21 = vrot.slane %v4780_v20, 1  ;;  %v4892_v25 = vld [vmem:[%s9603_s0 + $0x1d0] sm:$0xff]  ;;  %s4394_s18 = smov 8  }
  0x2b   :  { %9958 = vst [vmem:[#allocation25_spill] sm:$0xff] %v4769_v43  ;;  %9959 = vst [vmem:[#allocation26_spill] sm:$0xff] %v4774_v42  ;;  %v4802_v9 = vsel %vm225_vm0, %v286_v27, %v287_v51  ;;  %v291_v4 = vrot.slane %v4790_v8, 1  ;;  %v4864_v36 = vld [vmem:[%s9603_s0 + $0x1b8] sm:$0xff]  ;;  %vm386_vm1 = vcmask 1045504   ;;  %s4395_s20 = smov 12  }
  0x2c   :  { %v4797_v6 = vsel %vm225_vm0, %v287_v51, %v289_v50  ;;  %9961 = vst [vmem:[#allocation28_spill] sm:$0xff] %v4802_v9  ;;  %v4818_v50 = vld [vmem:[%s9603_s0 + $0x150] sm:$0xff]  ;;  %v297_v51 = vrot.slane %v4808_v60, 1  ;;  %9970 = vst [vmem:[#allocation37_spill] sm:$0xff] %v4892_v25  ;;  %s4396_s23 = smov 16   ;;  %s4397_s8 = smov 20  }
  0x2d   :  { %641 = vrot.lane.b32.xlu1 %v4741_v61, %s4393_s11  ;;  %9960 = vst [vmem:[#allocation27_spill] sm:$0xff] %v4797_v6  ;;  %v4830_v57 = vsel %vm225_vm0, %v291_v4, %v292_v21  ;;  %v296_v52 = vrot.slane %v4818_v50, 1  ;;  %vm2860_vm2 = vcmask 1043456   ;;  %s4398_s12 = smov 24   ;;  %s4400_s13 = smov 32   ;;  %vm2135_vm3 = vcmask 31744  }
  0x2e   :  { %639 = vrot.lane.b32.xlu0 %v4746_v13, %s4393_s11  ;;  %v4785_v13 = vld [vmem:[%s9603_s0 + $0x148] sm:$0x3]  ;;  %9963 = vst [vmem:[#allocation30_spill] sm:$0xff] %v4830_v57  ;;  %vm2200_vm4 = vcmask 64512   ;;  %vm2265_vm5 = vcmask 97280   ;;  %vm2330_vm6 = vcmask 130048  }
  0x2f   :  { %v294_v61 = vrot.slane %v4785_v13, 1  ;;  %v4858_v44 = vsel %vm225_vm0, %v296_v52, %v297_v51  ;;  %vm2395_vm7 = vcmask 162816   ;;  %vm2460_vm8 = vcmask 195584  }
  0x30   :  { %9965 = vst [vmem:[#allocation32_spill] sm:$0xff] %v4858_v44  ;;  %vm2525_vm9 = vcmask 228352   ;;  %vm2590_vm10 = vcmask 261120   ;;  %vm2667_vm11 = vcmask 293888  }
  0x31   :  { %645 = vrot.lane.b32.xlu1 %v4769_v43, %s4393_s11  ;;  %v4825_v27 = vsel %vm225_vm0, %v292_v21, %v294_v61  ;;  %v4846_v61 = vld [vmem:[%s9603_s0 + $0x168] sm:$0xff]  ;;  %v302_v21 = vrot.slane %v4836_v49, 1 }
  0x32   :  { %643 = vrot.lane.b32.xlu0 %v4774_v42, %s4393_s11  ;;  %v4813_v42 = vld [vmem:[%s9603_s0 + $0x160] sm:$0x3]  ;;  %9962 = vst [vmem:[#allocation29_spill] sm:$0xff] %v4825_v27  ;;  %v301_v41 = vrot.slane %v4846_v61, 1 }
  0x33   :  { %v299_v43 = vrot.slane %v4813_v42, 1 }
  0x34   :  { %v4886_v33 = vsel %vm225_vm0, %v301_v41, %v302_v21 }
  0x35   :  { %649 = vrot.lane.b32.xlu1 %v4797_v6, %s4393_s11  ;;  %v4853_v4 = vsel %vm225_vm0, %v297_v51, %v299_v43  ;;  %v4874_v43 = vld [vmem:[%s9603_s0 + $0x1b0] sm:$0xff]  ;;  %v307_v51 = vrot.slane %v4864_v36, 1  ;;  %9969 = vst [vmem:[#allocation36_spill] sm:$0xff] %v4886_v33 }
  0x36   :  { %647 = vrot.lane.b32.xlu0 %v4802_v9, %s4393_s11  ;;  %v4841_v9 = vld [vmem:[%s9603_s0 + $0x178] sm:$0x3]  ;;  %9964 = vst [vmem:[#allocation31_spill] sm:$0xff] %v4853_v4  ;;  %9967 = vst [vmem:[#allocation34_spill] sm:$0xff] %v4874_v43  ;;  %v306_v28 = vrot.slane %v4874_v43, 1  ;;  %v4916_v43 = vld [vmem:[%s9603_s0 + $0x1e8] sm:$0xff] }
  0x37   :  { %v304_v6 = vrot.slane %v4841_v9, 1  ;;  %9973 = vst [vmem:[#allocation40_spill] sm:$0xff] %v4916_v43 }
  0x38   :  { %v308_v12 = vsel %vm225_vm0, %v306_v28, %v307_v51 }
  0x39   :  { %653 = vrot.lane.b32.xlu1 %v4825_v27, %s4393_s11  ;;  %v4881_v52 = vsel %vm225_vm0, %v302_v21, %v304_v6  ;;  %v4902_v6 = vld [vmem:[%s9603_s0 + $0x1c8] sm:$0xff]  ;;  %v312_v21 = vrot.slane %v4892_v25, 1  ;;  %v4942_v25 = vld [vmem:[%s9603_s0 + $0x200] sm:$0xff] }
  0x3a   :  { %651 = vrot.lane.b32.xlu0 %v4830_v57, %s4393_s11  ;;  %v4869_v57 = vld [vmem:[%s9603_s0 + $0x1c0] sm:$0x3]  ;;  %9968 = vst [vmem:[#allocation35_spill] sm:$0xff] %v4881_v52  ;;  %9972 = vst [vmem:[#allocation39_spill] sm:$0xff] %v4902_v6  ;;  %v311_v17 = vrot.slane %v4902_v6, 1 }
  0x3b   :  { %9966 = vst [vmem:[#allocation33_spill] sm:$0xff] %v4869_v57  ;;  %v309_v27 = vrot.slane %v4869_v57, 1  ;;  %9978 = vst [vmem:[#allocation45_spill] sm:$0xff] %v4942_v25 }
  0x3c   :  { %v4936_v6 = vsel %vm225_vm0, %v311_v17, %v312_v21 }
  0x3d   :  { %657 = vrot.lane.b32.xlu1 %v4853_v4, %s4393_s11  ;;  %v310_v41 = vsel %vm225_vm0, %v307_v51, %v309_v27  ;;  %v4926_v27 = vld [vmem:[%s9603_s0 + $0x1e0] sm:$0xff]  ;;  %v317_v51 = vrot.slane %v4916_v43, 1  ;;  %9977 = vst [vmem:[#allocation44_spill] sm:$0xff] %v4936_v6  ;;  %v4970_v43 = vld [vmem:[%s9603_s0 + $0x218] sm:$0xff] }
  0x3e   :  { %655 = vrot.lane.b32.xlu0 %v4858_v44, %s4393_s11  ;;  %v4897_v44 = vld [vmem:[%s9603_s0 + $0x1d8] sm:$0x3]  ;;  %9975 = vst [vmem:[#allocation42_spill] sm:$0xff] %v4926_v27  ;;  %9983 = vst [vmem:[#allocation50_spill] sm:$0xff] %v4970_v43 }
  0x3f   :  { %9971 = vst [vmem:[#allocation38_spill] sm:$0xff] %v4897_v44  ;;  %v314_v4 = vrot.slane %v4897_v44, 1  ;;  %v316_v44 = vrot.slane %v4926_v27, 1 }
  0x41   :  { %661 = vrot.lane.b32.xlu1 %v4881_v52, %s4393_s11  ;;  %v4921_v52 = vld [vmem:[%s9603_s0 + $0x1f0] sm:$0x3]  ;;  %v4931_v28 = vsel %vm225_vm0, %v312_v21, %v314_v4  ;;  %v4952_v4 = vld [vmem:[%s9603_s0 + $0x1f8] sm:$0xff]  ;;  %v4964_v27 = vsel %vm225_vm0, %v316_v44, %v317_v51 }
  0x42   :  { %659 = vrot.lane.b32.xlu0 %v4886_v33, %s4393_s11  ;;  %9974 = vst [vmem:[#allocation41_spill] sm:$0xff] %v4921_v52  ;;  %9976 = vst [vmem:[#allocation43_spill] sm:$0xff] %v4931_v28  ;;  %v319_v33 = vrot.slane %v4921_v52, 1  ;;  %v321_v52 = vrot.slane %v4952_v4, 1 }
  0x43   :  { %9980 = vst [vmem:[#allocation47_spill] sm:$0xff] %v4952_v4  ;;  %9982 = vst [vmem:[#allocation49_spill] sm:$0xff] %v4964_v27 }
  0x44   :  { %v4959_v17 = vsel %vm225_vm0, %v317_v51, %v319_v33  ;;  %v4980_v33 = vld [vmem:[%s9603_s0 + $0x210] sm:$0xff]  ;;  %v327_v51 = vrot.slane %v4970_v43, 1  ;;  %v5026_v43 = vld [vmem:[%s9603_s0 + $0x248] sm:$0xff] }
  0x45   :  { %665 = vrot.lane.b32.xlu1 %v310_v41, %s4393_s11  ;;  %9981 = vst [vmem:[#allocation48_spill] sm:$0xff] %v4959_v17  ;;  %v322_v41 = vrot.slane %v4942_v25, 1  ;;  %9985 = vst [vmem:[#allocation52_spill] sm:$0xff] %v4980_v33  ;;  %v4998_v25 = vld [vmem:[%s9603_s0 + $0x230] sm:$0xff] }
  0x46   :  { %663 = vrot.lane.b32.xlu0 %v308_v12, %s4393_s11  ;;  %v4947_v12 = vld [vmem:[%s9603_s0 + $0x208] sm:$0x3]  ;;  %9988 = vst [vmem:[#allocation55_spill] sm:$0xff] %v4998_v25  ;;  %9993 = vst [vmem:[#allocation60_spill] sm:$0xff] %v5026_v43 }
  0x47   :  { %9979 = vst [vmem:[#allocation46_spill] sm:$0xff] %v4947_v12  ;;  %v324_v21 = vrot.slane %v4947_v12, 1  ;;  %v4992_v4 = vsel %vm225_vm0, %v321_v52, %v322_v41  ;;  %v326_v12 = vrot.slane %v4980_v33, 1 }
  0x48   :  { %9987 = vst [vmem:[#allocation54_spill] sm:$0xff] %v4992_v4 }
  0x49   :  { %669 = vrot.lane.b32.xlu1 %v4931_v28, %s4393_s11  ;;  %v4987_v44 = vsel %vm225_vm0, %v322_v41, %v324_v21  ;;  %v5008_v21 = vld [vmem:[%s9603_s0 + $0x228] sm:$0xff]  ;;  %v332_v41 = vrot.slane %v4998_v25, 1  ;;  %v5020_v33 = vsel %vm225_vm0, %v326_v12, %v327_v51  ;;  %v5054_v25 = vld [vmem:[%s9603_s0 + $0x260] sm:$0xff] }
  0x4a   :  { %667 = vrot.lane.b32.xlu0 %v4936_v6, %s4393_s11  ;;  %v4975_v6 = vld [vmem:[%s9603_s0 + $0x220] sm:$0x3]  ;;  %9986 = vst [vmem:[#allocation53_spill] sm:$0xff] %v4987_v44  ;;  %9990 = vst [vmem:[#allocation57_spill] sm:$0xff] %v5008_v21 }
  0x4b   :  { %9984 = vst [vmem:[#allocation51_spill] sm:$0xff] %v4975_v6  ;;  %v329_v28 = vrot.slane %v4975_v6, 1  ;;  %9992 = vst [vmem:[#allocation59_spill] sm:$0xff] %v5020_v33  ;;  %v331_v6 = vrot.slane %v5008_v21, 1 }
  0x4c   :  { %9998 = vst [vmem:[#allocation65_spill] sm:$0xff] %v5054_v25 }
  0x4d   :  { %673 = vrot.lane.b32.xlu1 %v4959_v17, %s4393_s11  ;;  %v5015_v52 = vsel %vm225_vm0, %v327_v51, %v329_v28  ;;  %v5036_v28 = vld [vmem:[%s9603_s0 + $0x240] sm:$0xff]  ;;  %v337_v51 = vrot.slane %v5026_v43, 1  ;;  %v5048_v21 = vsel %vm225_vm0, %v331_v6, %v332_v41  ;;  %v5082_v43 = vld [vmem:[%s9603_s0 + $0x278] sm:$0xff] }
  0x4e   :  { %671 = vrot.lane.b32.xlu0 %v4964_v27, %s4393_s11  ;;  %v5003_v27 = vld [vmem:[%s9603_s0 + $0x238] sm:$0x3]  ;;  %9991 = vst [vmem:[#allocation58_spill] sm:$0xff] %v5015_v52  ;;  %9995 = vst [vmem:[#allocation62_spill] sm:$0xff] %v5036_v28 }
  0x4f   :  { %9989 = vst [vmem:[#allocation56_spill] sm:$0xff] %v5003_v27  ;;  %v334_v17 = vrot.slane %v5003_v27, 1  ;;  %9997 = vst [vmem:[#allocation64_spill] sm:$0xff] %v5048_v21  ;;  %v336_v27 = vrot.slane %v5036_v28, 1 }
  0x50   :  { %10003 = vst [vmem:[#allocation70_spill] sm:$0xff] %v5082_v43 }
  0x51   :  { %677 = vrot.lane.b32.xlu1 %v4987_v44, %s4393_s11  ;;  %v5043_v12 = vsel %vm225_vm0, %v332_v41, %v334_v17  ;;  %v5064_v17 = vld [vmem:[%s9603_s0 + $0x258] sm:$0xff]  ;;  %v342_v41 = vrot.slane %v5054_v25, 1  ;;  %v5076_v28 = vsel %vm225_vm0, %v336_v27, %v337_v51  ;;  %v5110_v25 = vld [vmem:[%s9603_s0 + $0x290] sm:$0xff] }
  0x52   :  { %675 = vrot.lane.b32.xlu0 %v4992_v4, %s4393_s11  ;;  %v5031_v4 = vld [vmem:[%s9603_s0 + $0x250] sm:$0x3]  ;;  %9996 = vst [vmem:[#allocation63_spill] sm:$0xff] %v5043_v12  ;;  %10000 = vst [vmem:[#allocation67_spill] sm:$0xff] %v5064_v17 }
  0x53   :  { %9994 = vst [vmem:[#allocation61_spill] sm:$0xff] %v5031_v4  ;;  %v339_v44 = vrot.slane %v5031_v4, 1  ;;  %10002 = vst [vmem:[#allocation69_spill] sm:$0xff] %v5076_v28  ;;  %v341_v4 = vrot.slane %v5064_v17, 1 }
  0x54   :  { %10008 = vst [vmem:[#allocation75_spill] sm:$0xff] %v5110_v25 }
  0x55   :  { %681 = vrot.lane.b32.xlu1 %v5015_v52, %s4393_s11  ;;  %v5071_v6 = vsel %vm225_vm0, %v337_v51, %v339_v44  ;;  %v5092_v44 = vld [vmem:[%s9603_s0 + $0x270] sm:$0xff]  ;;  %v347_v51 = vrot.slane %v5082_v43, 1  ;;  %v5104_v17 = vsel %vm225_vm0, %v341_v4, %v342_v41  ;;  %v5138_v43 = vld [vmem:[%s9603_s0 + $0x2a8] sm:$0xff] }
  0x56   :  { %679 = vrot.lane.b32.xlu0 %v5020_v33, %s4393_s11  ;;  %v5059_v33 = vld [vmem:[%s9603_s0 + $0x268] sm:$0x3]  ;;  %10001 = vst [vmem:[#allocation68_spill] sm:$0xff] %v5071_v6  ;;  %10005 = vst [vmem:[#allocation72_spill] sm:$0xff] %v5092_v44 }
  0x57   :  { %9999 = vst [vmem:[#allocation66_spill] sm:$0xff] %v5059_v33  ;;  %v344_v52 = vrot.slane %v5059_v33, 1  ;;  %10007 = vst [vmem:[#allocation74_spill] sm:$0xff] %v5104_v17  ;;  %v346_v33 = vrot.slane %v5092_v44, 1 }
  0x58   :  { %10013 = vst [vmem:[#allocation80_spill] sm:$0xff] %v5138_v43 }
  0x59   :  { %685 = vrot.lane.b32.xlu1 %v5043_v12, %s4393_s11  ;;  %v5099_v27 = vsel %vm225_vm0, %v342_v41, %v344_v52  ;;  %v5120_v52 = vld [vmem:[%s9603_s0 + $0x288] sm:$0xff]  ;;  %v352_v41 = vrot.slane %v5110_v25, 1  ;;  %v5132_v44 = vsel %vm225_vm0, %v346_v33, %v347_v51  ;;  %v5166_v25 = vld [vmem:[%s9603_s0 + $0x2c0] sm:$0xff] }
  0x5a   :  { %683 = vrot.lane.b32.xlu0 %v5048_v21, %s4393_s11  ;;  %v5087_v21 = vld [vmem:[%s9603_s0 + $0x280] sm:$0x3]  ;;  %10006 = vst [vmem:[#allocation73_spill] sm:$0xff] %v5099_v27  ;;  %10010 = vst [vmem:[#allocation77_spill] sm:$0xff] %v5120_v52 }
  0x5b   :  { %10004 = vst [vmem:[#allocation71_spill] sm:$0xff] %v5087_v21  ;;  %v349_v12 = vrot.slane %v5087_v21, 1  ;;  %10012 = vst [vmem:[#allocation79_spill] sm:$0xff] %v5132_v44  ;;  %v351_v21 = vrot.slane %v5120_v52, 1 }
  0x5c   :  { %10018 = vst [vmem:[#allocation85_spill] sm:$0xff] %v5166_v25 }
  0x5d   :  { %689 = vrot.lane.b32.xlu1 %v5071_v6, %s4393_s11  ;;  %v5127_v4 = vsel %vm225_vm0, %v347_v51, %v349_v12  ;;  %v5148_v12 = vld [vmem:[%s9603_s0 + $0x2a0] sm:$0xff]  ;;  %v357_v51 = vrot.slane %v5138_v43, 1  ;;  %v5160_v52 = vsel %vm225_vm0, %v351_v21, %v352_v41  ;;  %v5194_v43 = vld [vmem:[%s9603_s0 + $0x2d8] sm:$0xff] }
  0x5e   :  { %687 = vrot.lane.b32.xlu0 %v5076_v28, %s4393_s11  ;;  %v5115_v28 = vld [vmem:[%s9603_s0 + $0x298] sm:$0x3]  ;;  %10011 = vst [vmem:[#allocation78_spill] sm:$0xff] %v5127_v4  ;;  %10015 = vst [vmem:[#allocation82_spill] sm:$0xff] %v5148_v12 }
  0x5f   :  { %10009 = vst [vmem:[#allocation76_spill] sm:$0xff] %v5115_v28  ;;  %v354_v6 = vrot.slane %v5115_v28, 1  ;;  %10017 = vst [vmem:[#allocation84_spill] sm:$0xff] %v5160_v52  ;;  %v356_v28 = vrot.slane %v5148_v12, 1 }
  0x60   :  { %10023 = vst [vmem:[#allocation90_spill] sm:$0xff] %v5194_v43 }
  0x61   :  { %693 = vrot.lane.b32.xlu1 %v5099_v27, %s4393_s11  ;;  %v5155_v33 = vsel %vm225_vm0, %v352_v41, %v354_v6  ;;  %v5176_v6 = vld [vmem:[%s9603_s0 + $0x2b8] sm:$0xff]  ;;  %v362_v41 = vrot.slane %v5166_v25, 1  ;;  %v5188_v12 = vsel %vm225_vm0, %v356_v28, %v357_v51  ;;  %v5222_v25 = vld [vmem:[%s9603_s0 + $0x2f0] sm:$0xff] }
  0x62   :  { %691 = vrot.lane.b32.xlu0 %v5104_v17, %s4393_s11  ;;  %v5143_v17 = vld [vmem:[%s9603_s0 + $0x2b0] sm:$0x3]  ;;  %10016 = vst [vmem:[#allocation83_spill] sm:$0xff] %v5155_v33  ;;  %10020 = vst [vmem:[#allocation87_spill] sm:$0xff] %v5176_v6 }
  0x63   :  { %10014 = vst [vmem:[#allocation81_spill] sm:$0xff] %v5143_v17  ;;  %v359_v27 = vrot.slane %v5143_v17, 1  ;;  %10022 = vst [vmem:[#allocation89_spill] sm:$0xff] %v5188_v12  ;;  %v361_v17 = vrot.slane %v5176_v6, 1 }
  0x64   :  { %10028 = vst [vmem:[#allocation95_spill] sm:$0xff] %v5222_v25 }
  0x65   :  { %697 = vrot.lane.b32.xlu1 %v5127_v4, %s4393_s11  ;;  %v5183_v21 = vsel %vm225_vm0, %v357_v51, %v359_v27  ;;  %v5204_v27 = vld [vmem:[%s9603_s0 + $0x2d0] sm:$0xff]  ;;  %v367_v51 = vrot.slane %v5194_v43, 1  ;;  %v5216_v6 = vsel %vm225_vm0, %v361_v17, %v362_v41  ;;  %v5250_v43 = vld [vmem:[%s9603_s0 + $0x308] sm:$0xff] }
  0x66   :  { %695 = vrot.lane.b32.xlu0 %v5132_v44, %s4393_s11  ;;  %v5171_v44 = vld [vmem:[%s9603_s0 + $0x2c8] sm:$0x3]  ;;  %10021 = vst [vmem:[#allocation88_spill] sm:$0xff] %v5183_v21  ;;  %10025 = vst [vmem:[#allocation92_spill] sm:$0xff] %v5204_v27 }
  0x67   :  { %10019 = vst [vmem:[#allocation86_spill] sm:$0xff] %v5171_v44  ;;  %v364_v4 = vrot.slane %v5171_v44, 1  ;;  %10027 = vst [vmem:[#allocation94_spill] sm:$0xff] %v5216_v6  ;;  %v366_v44 = vrot.slane %v5204_v27, 1 }
  0x68   :  { %10033 = vst [vmem:[#allocation100_spill] sm:$0xff] %v5250_v43 }
  0x69   :  { %701 = vrot.lane.b32.xlu1 %v5155_v33, %s4393_s11  ;;  %v5211_v28 = vsel %vm225_vm0, %v362_v41, %v364_v4  ;;  %v5232_v4 = vld [vmem:[%s9603_s0 + $0x2e8] sm:$0xff]  ;;  %v372_v41 = vrot.slane %v5222_v25, 1  ;;  %v5244_v27 = vsel %vm225_vm0, %v366_v44, %v367_v51 }
  0x6a   :  { %699 = vrot.lane.b32.xlu0 %v5160_v52, %s4393_s11  ;;  %v5199_v52 = vld [vmem:[%s9603_s0 + $0x2e0] sm:$0x3]  ;;  %10026 = vst [vmem:[#allocation93_spill] sm:$0xff] %v5211_v28  ;;  %10030 = vst [vmem:[#allocation97_spill] sm:$0xff] %v5232_v4 }
  0x6b   :  { %10024 = vst [vmem:[#allocation91_spill] sm:$0xff] %v5199_v52  ;;  %v369_v33 = vrot.slane %v5199_v52, 1  ;;  %10032 = vst [vmem:[#allocation99_spill] sm:$0xff] %v5244_v27  ;;  %v371_v52 = vrot.slane %v5232_v4, 1 }
  0x6d   :  { %705 = vrot.lane.b32.xlu1 %v5183_v21, %s4393_s11  ;;  %v5239_v17 = vsel %vm225_vm0, %v367_v51, %v369_v33  ;;  %v5260_v33 = vld [vmem:[%s9603_s0 + $0x300] sm:$0xff]  ;;  %v377_v51 = vrot.slane %v5250_v43, 1 }
  0x6e   :  { %703 = vrot.lane.b32.xlu0 %v5188_v12, %s4393_s11  ;;  %v5227_v12 = vld [vmem:[%s9603_s0 + $0x2f8] sm:$0x3]  ;;  %10031 = vst [vmem:[#allocation98_spill] sm:$0xff] %v5239_v17  ;;  %10035 = vst [vmem:[#allocation102_spill] sm:$0xff] %v5260_v33  ;;  %v376_v25 = vrot.slane %v5260_v33, 1 }
  0x6f   :  { %10029 = vst [vmem:[#allocation96_spill] sm:$0xff] %v5227_v12  ;;  %v374_v21 = vrot.slane %v5227_v12, 1  ;;  %v5274_v12 = vsel %vm225_vm0, %v371_v52, %v372_v41 }
  0x70   :  { %10038 = vst [vmem:[#allocation105_spill] sm:$0xff] %v5274_v12 }
  0x71   :  { %709 = vrot.lane.b32.xlu1 %v5211_v28, %s4393_s11  ;;  %v5267_v44 = vsel %vm225_vm0, %v372_v41, %v374_v21  ;;  %v5285_v21 = vld [vmem:[%s9603_s0 + $0x328] sm:$0x3] }
  0x72   :  { %707 = vrot.lane.b32.xlu0 %v5216_v6, %s4393_s11  ;;  %v5255_v6 = vld [vmem:[%s9603_s0 + $0x310] sm:$0x3]  ;;  %10036 = vst [vmem:[#allocation103_spill] sm:$0xff] %v5267_v44  ;;  %v384_v33 = vrot.slane %v5285_v21, 1 }
  0x73   :  { %10034 = vst [vmem:[#allocation101_spill] sm:$0xff] %v5255_v6  ;;  %v379_v28 = vrot.slane %v5255_v6, 1 }
  0x75   :  { %713 = vrot.lane.b32.xlu1 %v5239_v17, %s4393_s11  ;;  %v5280_v17 = vld [vmem:[%s9603_s0 + $0x320] sm:$0xff]  ;;  %v5299_v52 = vsel %vm225_vm0, %v377_v51, %v379_v28 }
  0x76   :  { %711 = vrot.lane.b32.xlu0 %v5244_v27, %s4393_s11  ;;  %10040 = vst [vmem:[#allocation107_spill] sm:$0xff] %v5299_v52  ;;  %v382_v41 = vrot.slane %v5280_v17, 1 }
  0x77   :  { %v5271_v4 = vpop.permute.xlu1 %603 }
  0x78   :  { %10037 = vst [vmem:[#allocation104_spill] sm:$0xff] %v5271_v4  ;;  %v5287_v27 = vpop.permute.xlu0 %599  ;;  %v5292_v4 = vld [vmem:[%s9603_s0 + $0x318] sm:$0xff]  ;;  %v5316_v28 = vsel %vm225_vm0, %v382_v41, %v384_v33  ;;  %v395_v33 = vrot.slane %v4459_v7, 2  ;;  %v400_v7 = vrot.slane %v4480_v14, 2  ;;  %v405_v14 = vrot.slane %v4506_v23, 2 }
  0x79   :  { %10039 = vst [vmem:[#allocation106_spill] sm:$0xff] %v5287_v27  ;;  %717 = vrot.lane.b32.xlu1 %v5267_v44, %s4393_s11  ;;  %v5306_v27 = vsel %vm225_vm0, %v376_v25, %v377_v51  ;;  %v381_v43 = vrot.slane %v5292_v4, 1  ;;  %10044 = vst [vmem:[#allocation111_spill] sm:$0xff] %v5316_v28  ;;  %v387_v51 = vrot.slane %v4446_v2, 2  ;;  %v392_v2 = vrot.slane %v4436_v0, 2 }
  0x7a   :  { %715 = vrot.lane.b32.xlu0 %v5274_v12, %s4393_s11  ;;  %10042 = vst [vmem:[#allocation109_spill] sm:$0xff] %v5306_v27  ;;  %v388_v12 = vrot.slane %v4453_v5, 2  ;;  %v397_v0 = vrot.slane %v4485_v15, 2  ;;  %v402_v15 = vrot.slane %v4511_v24, 2  ;;  %v410_v23 = vrot.slane %v4533_v31, 2 }
  0x7b   :  { %v5303_v6 = vpop.permute.xlu1 %605  ;;  %v5323_v25 = vsel %vm225_vm0, %v381_v43, %v382_v41  ;;  %v407_v24 = vrot.slane %v4538_v32, 2  ;;  %v415_v31 = vrot.slane %v4561_v39, 2  ;;  %v412_v32 = vrot.slane %v4566_v40, 2 }
  0x7c   :  { %10041 = vst [vmem:[#allocation108_spill] sm:$0xff] %v5303_v6  ;;  %v5309_v57 = vpop.permute.xlu0 %601  ;;  %v390_v6 = vrot.slane %v4466_v10, 2  ;;  %10046 = vst [vmem:[#allocation113_spill] sm:$0xff] %v5323_v25  ;;  %v393_v10 = vrot.slane %v4441_v1, 2  ;;  %v389_v43 = vsel %vm386_vm1, %v387_v51, %v388_v12  ;;  %v398_v1 = vrot.slane %v4471_v11, 2 }
  0x7d   :  { %10043 = vst [vmem:[#allocation110_spill] sm:$0xff] %v5309_v57  ;;  %721 = vrot.lane.b32.xlu1 %v5299_v52, %s4393_s11  ;;  %v403_v11 = vrot.slane %v4501_v22, 2  ;;  %v408_v22 = vrot.slane %v4528_v30, 2  ;;  %v413_v30 = vrot.slane %v4556_v38, 2  ;;  %v418_v38 = vrot.slane %v4584_v46, 2 }
  0x7e   :  { %719 = vrot.lane.b32.xlu0 %v5306_v27, %s4393_s11  ;;  %v391_v5 = vsel %vm386_vm1, %v388_v12, %v390_v6  ;;  %v5351_v12 = vsel %vm386_vm1, %v392_v2, %v393_v10  ;;  %v420_v39 = vrot.slane %v4589_v47, 2  ;;  %v417_v40 = vrot.slane %v4594_v48, 2 }
  0x7f   :  { %v5320_v44 = vpop.permute.xlu1 %609  ;;  %v5378_v2 = vsel %vm386_vm1, %v403_v11, %v405_v14  ;;  %v5395_v14 = vsel %vm386_vm1, %v408_v22, %v410_v23  ;;  %v5412_v23 = vsel %vm386_vm1, %v413_v30, %v415_v31  ;;  %v423_v46 = vrot.slane %v4612_v54, 2 }
  0x80   :  { %10045 = vst [vmem:[#allocation112_spill] sm:$0xff] %v5320_v44  ;;  %v5326_v57 = vpop.permute.xlu0 %607  ;;  %v5429_v31 = vsel %vm386_vm1, %v418_v38, %v420_v39  ;;  %v425_v47 = vrot.slane %v4617_v55, 2  ;;  %v422_v48 = vrot.slane %v4622_v56, 2  ;;  %v428_v54 = vrot.slane %v4640_v62, 2 }
  0x81   :  { %10047 = vst [vmem:[#allocation114_spill] sm:$0xff] %v5326_v57  ;;  %725 = vrot.lane.b32.xlu1 %v5316_v28, %s4393_s11  ;;  %v5344_v57 = vsel %vm386_vm1, %v393_v10, %v395_v33  ;;  %v5368_v10 = vsel %vm386_vm1, %v397_v0, %v398_v1  ;;  %v430_v55 = vrot.slane %v4645_v63, 2  ;;  %v427_v56 = vrot.slane %v4650_v3, 2 }
  0x82   :  { %723 = vrot.lane.b32.xlu0 %v5323_v25, %s4393_s11  ;;  %v5446_v39 = vsel %vm386_vm1, %v423_v46, %v425_v47  ;;  %v433_v62 = vrot.slane %v4668_v16, 2  ;;  %v435_v63 = vrot.slane %v4673_v18, 2  ;;  %v432_v3 = vrot.slane %v4678_v19, 2 }
  0x83   :  { %v5335_v44 = vpop.permute.xlu1 %613  ;;  %10062 = vst [vmem:[#allocation129_spill] sm:$0xff] %v5446_v39  ;;  %v5463_v47 = vsel %vm386_vm1, %v428_v54, %v430_v55  ;;  %v438_v16 = vrot.slane %v4696_v34, 2  ;;  %v440_v18 = vrot.slane %v4701_v35, 2  ;;  %v437_v19 = vrot.slane %v4706_v37, 2 }
  0x84   :  { %10048 = vst [vmem:[#allocation115_spill] sm:$0xff] %v5335_v44  ;;  %v5339_v41 = vpop.permute.xlu0 %611  ;;  %10065 = vst [vmem:[#allocation132_spill] sm:$0xff] %v5463_v47  ;;  %v5480_v55 = vsel %vm386_vm1, %v433_v62, %v435_v63  ;;  %v443_v34 = vrot.slane %v4724_v53, 2  ;;  %v445_v35 = vrot.slane %v4729_v58, 2  ;;  %v442_v37 = vrot.slane %v4734_v59, 2 }
  0x85   :  { %10049 = vst [vmem:[#allocation116_spill] sm:$0xff] %v5339_v41  ;;  %793 = vrot.lane.b32.xlu1 %v391_v5, %s4394_s18  ;;  %v5361_v5 = vsel %vm386_vm1, %v398_v1, %v400_v7  ;;  %v5385_v1 = vsel %vm386_vm1, %v402_v15, %v403_v11  ;;  %v5402_v11 = vsel %vm386_vm1, %v407_v24, %v408_v22  ;;  %10069 = vst [vmem:[#allocation136_spill] sm:$0xff] %v5480_v55 }
  0x86   :  { %791 = vrot.lane.b32.xlu0 %v389_v43, %s4394_s18  ;;  %v5419_v22 = vsel %vm386_vm1, %v412_v32, %v413_v30  ;;  %v5436_v30 = vsel %vm386_vm1, %v417_v40, %v418_v38  ;;  %v5453_v38 = vsel %vm386_vm1, %v422_v48, %v423_v46  ;;  %v5470_v46 = vsel %vm386_vm1, %v427_v56, %v428_v54 }
  0x87   :  { %v5348_v6 = vpop.permute.xlu1 %617  ;;  %10067 = vst [vmem:[#allocation134_spill] sm:$0xff] %v5470_v46  ;;  %v5487_v54 = vsel %vm386_vm1, %v432_v3, %v433_v62  ;;  %v5497_v63 = vsel %vm386_vm1, %v438_v16, %v440_v18  ;;  %v5504_v62 = vsel %vm386_vm1, %v437_v19, %v438_v16  ;;  %v5514_v18 = vsel %vm386_vm1, %v443_v34, %v445_v35 }
  0x88   :  { %10050 = vst [vmem:[#allocation117_spill] sm:$0xff] %v5348_v6  ;;  %v5354_v51 = vpop.permute.xlu0 %615  ;;  %10071 = vst [vmem:[#allocation138_spill] sm:$0xff] %v5487_v54  ;;  %v448_v53 = vrot.slane %v4752_v26, 2  ;;  %v450_v58 = vrot.slane %v4757_v29, 2  ;;  %v5521_v16 = vsel %vm386_vm1, %v442_v37, %v443_v34  ;;  %v447_v59 = vrot.slane %v4762_v45, 2 }
  0x89   :  { %10051 = vst [vmem:[#allocation118_spill] sm:$0xff] %v5354_v51  ;;  %797 = vrot.lane.b32.xlu1 %v5344_v57, %s4394_s18  ;;  %10073 = vst [vmem:[#allocation140_spill] sm:$0xff] %v5497_v63  ;;  %v453_v26 = vrot.slane %v4780_v20, 2  ;;  %v455_v29 = vrot.slane %v4785_v13, 2  ;;  %v452_v45 = vrot.slane %v4790_v8, 2  ;;  %v458_v20 = vrot.slane %v4808_v60, 2 }
  0x8a   :  { %795 = vrot.lane.b32.xlu0 %v5351_v12, %s4394_s18  ;;  %10075 = vst [vmem:[#allocation142_spill] sm:$0xff] %v5504_v62  ;;  %10077 = vst [vmem:[#allocation144_spill] sm:$0xff] %v5514_v18  ;;  %v5531_v35 = vsel %vm386_vm1, %v448_v53, %v450_v58  ;;  %v5538_v34 = vsel %vm386_vm1, %v447_v59, %v448_v53  ;;  %v460_v13 = vrot.slane %v4813_v42, 2  ;;  %v457_v8 = vrot.slane %v4818_v50, 2 }
  0x8b   :  { %v5365_v33 = vpop.permute.xlu1 %621  ;;  %10079 = vst [vmem:[#allocation146_spill] sm:$0xff] %v5521_v16  ;;  %10081 = vst [vmem:[#allocation148_spill] sm:$0xff] %v5531_v35  ;;  %v5548_v58 = vsel %vm386_vm1, %v453_v26, %v455_v29  ;;  %v5555_v53 = vsel %vm386_vm1, %v452_v45, %v453_v26  ;;  %v463_v60 = vrot.slane %v4836_v49, 2  ;;  %v465_v42 = vrot.slane %v4841_v9, 2  ;;  %v10094_v9 = vld [vmem:[#allocation33_spill] sm:$0xff] }
  0x8c   :  { %10052 = vst [vmem:[#allocation119_spill] sm:$0xff] %v5365_v33  ;;  %v5371_v43 = vpop.permute.xlu0 %619  ;;  %10083 = vst [vmem:[#allocation150_spill] sm:$0xff] %v5538_v34  ;;  %v5565_v29 = vsel %vm386_vm1, %v458_v20, %v460_v13  ;;  %v5572_v26 = vsel %vm386_vm1, %v457_v8, %v458_v20  ;;  %v462_v50 = vrot.slane %v4846_v61, 2  ;;  %v468_v49 = vrot.slane %v4864_v36, 2  ;;  %v10097_v61 = vld [vmem:[#allocation34_spill] sm:$0xff]  ;;  %v10099_v36 = vld [vmem:[#allocation37_spill] sm:$0xff] }
  0x8d   :  { %10053 = vst [vmem:[#allocation120_spill] sm:$0xff] %v5371_v43  ;;  %801 = vrot.lane.b32.xlu1 %v5361_v5, %s4394_s18  ;;  %10085 = vst [vmem:[#allocation152_spill] sm:$0xff] %v5548_v58  ;;  %v5582_v13 = vsel %vm386_vm1, %v463_v60, %v465_v42  ;;  %v467_v8 = vrot.slane %v10097_v61, 2 }
  0x8e   :  { %799 = vrot.lane.b32.xlu0 %v5368_v10, %s4394_s18  ;;  %10087 = vst [vmem:[#allocation154_spill] sm:$0xff] %v5555_v53  ;;  %10089 = vst [vmem:[#allocation156_spill] sm:$0xff] %v5565_v29  ;;  %v5589_v20 = vsel %vm386_vm1, %v462_v50, %v463_v60  ;;  %v10102_v50 = vld [vmem:[#allocation39_spill] sm:$0xff] }
  0x8f   :  { %v5382_v7 = vpop.permute.xlu1 %625  ;;  %10091 = vst [vmem:[#allocation158_spill] sm:$0xff] %v5572_v26  ;;  %10093 = vst [vmem:[#allocation160_spill] sm:$0xff] %v5582_v13  ;;  %v469_v60 = vsel %vm386_vm1, %v467_v8, %v468_v49  ;;  %v472_v61 = vrot.slane %v10102_v50, 2 }
  0x90   :  { %10054 = vst [vmem:[#allocation121_spill] sm:$0xff] %v5382_v7  ;;  %v5388_v0 = vpop.permute.xlu0 %623  ;;  %10096 = vst [vmem:[#allocation161_spill] sm:$0xff] %v5589_v20 }
  0x91   :  { %10055 = vst [vmem:[#allocation122_spill] sm:$0xff] %v5388_v0  ;;  %805 = vrot.lane.b32.xlu1 %v5378_v2, %s4394_s18 }
  0x92   :  { %803 = vrot.lane.b32.xlu0 %v5385_v1, %s4394_s18 }
  0x93   :  { %v5399_v7 = vpop.permute.xlu1 %629 }
  0x94   :  { %10056 = vst [vmem:[#allocation123_spill] sm:$0xff] %v5399_v7  ;;  %v5405_v15 = vpop.permute.xlu0 %627 }
  0x95   :  { %10057 = vst [vmem:[#allocation124_spill] sm:$0xff] %v5405_v15  ;;  %809 = vrot.lane.b32.xlu1 %v5395_v14, %s4394_s18 }
  0x96   :  { %807 = vrot.lane.b32.xlu0 %v5402_v11, %s4394_s18 }
  0x97   :  { %v5416_v7 = vpop.permute.xlu1 %633 }
  0x98   :  { %10058 = vst [vmem:[#allocation125_spill] sm:$0xff] %v5416_v7  ;;  %v5422_v24 = vpop.permute.xlu0 %631 }
  0x99   :  { %10059 = vst [vmem:[#allocation126_spill] sm:$0xff] %v5422_v24  ;;  %813 = vrot.lane.b32.xlu1 %v5412_v23, %s4394_s18 }
  0x9a   :  { %811 = vrot.lane.b32.xlu0 %v5419_v22, %s4394_s18 }
  0x9b   :  { %v5433_v7 = vpop.permute.xlu1 %637 }
  0x9c   :  { %10060 = vst [vmem:[#allocation127_spill] sm:$0xff] %v5433_v7  ;;  %v5439_v32 = vpop.permute.xlu0 %635 }
  0x9d   :  { %10061 = vst [vmem:[#allocation128_spill] sm:$0xff] %v5439_v32  ;;  %817 = vrot.lane.b32.xlu1 %v5429_v31, %s4394_s18 }
  0x9e   :  { %815 = vrot.lane.b32.xlu0 %v5436_v30, %s4394_s18 }
  0x9f   :  { %v5450_v7 = vpop.permute.xlu1 %641 }
  0xa0   :  { %10063 = vst [vmem:[#allocation130_spill] sm:$0xff] %v5450_v7  ;;  %v5456_v40 = vpop.permute.xlu0 %639 }
  0xa1   :  { %10064 = vst [vmem:[#allocation131_spill] sm:$0xff] %v5456_v40  ;;  %821 = vrot.lane.b32.xlu1 %v5446_v39, %s4394_s18  ;;  %v10120_v40 = vld [vmem:[#allocation51_spill] sm:$0xff] }
  0xa2   :  { %819 = vrot.lane.b32.xlu0 %v5453_v38, %s4394_s18 }
  0xa3   :  { %v5467_v7 = vpop.permute.xlu1 %645 }
  0xa4   :  { %10066 = vst [vmem:[#allocation133_spill] sm:$0xff] %v5467_v7  ;;  %v5473_v48 = vpop.permute.xlu0 %643 }
  0xa5   :  { %10068 = vst [vmem:[#allocation135_spill] sm:$0xff] %v5473_v48  ;;  %825 = vrot.lane.b32.xlu1 %v5463_v47, %s4394_s18 }
  0xa6   :  { %823 = vrot.lane.b32.xlu0 %v5470_v46, %s4394_s18 }
  0xa7   :  { %v5484_v7 = vpop.permute.xlu1 %649 }
  0xa8   :  { %10070 = vst [vmem:[#allocation137_spill] sm:$0xff] %v5484_v7  ;;  %v5490_v56 = vpop.permute.xlu0 %647 }
  0xa9   :  { %10072 = vst [vmem:[#allocation139_spill] sm:$0xff] %v5490_v56  ;;  %829 = vrot.lane.b32.xlu1 %v5480_v55, %s4394_s18 }
  0xaa   :  { %827 = vrot.lane.b32.xlu0 %v5487_v54, %s4394_s18 }
  0xab   :  { %v5501_v7 = vpop.permute.xlu1 %653 }
  0xac   :  { %10074 = vst [vmem:[#allocation141_spill] sm:$0xff] %v5501_v7  ;;  %v5507_v3 = vpop.permute.xlu0 %651 }
  0xad   :  { %10076 = vst [vmem:[#allocation143_spill] sm:$0xff] %v5507_v3  ;;  %833 = vrot.lane.b32.xlu1 %v5497_v63, %s4394_s18 }
  0xae   :  { %831 = vrot.lane.b32.xlu0 %v5504_v62, %s4394_s18 }
  0xaf   :  { %v5518_v7 = vpop.permute.xlu1 %657 }
  0xb0   :  { %10078 = vst [vmem:[#allocation145_spill] sm:$0xff] %v5518_v7  ;;  %v5524_v19 = vpop.permute.xlu0 %655 }
  0xb1   :  { %10080 = vst [vmem:[#allocation147_spill] sm:$0xff] %v5524_v19  ;;  %837 = vrot.lane.b32.xlu1 %v5514_v18, %s4394_s18 }
  0xb2   :  { %835 = vrot.lane.b32.xlu0 %v5521_v16, %s4394_s18 }
  0xb3   :  { %v5535_v7 = vpop.permute.xlu1 %661 }
  0xb4   :  { %10082 = vst [vmem:[#allocation149_spill] sm:$0xff] %v5535_v7  ;;  %v5541_v37 = vpop.permute.xlu0 %659 }
  0xb5   :  { %10084 = vst [vmem:[#allocation151_spill] sm:$0xff] %v5541_v37  ;;  %841 = vrot.lane.b32.xlu1 %v5531_v35, %s4394_s18  ;;  %v473_v37 = vrot.slane %v10099_v36, 2  ;;  %v10106_v36 = vld [vmem:[#allocation41_spill] sm:$0xff] }
  0xb6   :  { %839 = vrot.lane.b32.xlu0 %v5538_v34, %s4394_s18  ;;  %v480_v48 = vrot.slane %v10106_v36, 2 }
  0xb7   :  { %v5552_v7 = vpop.permute.xlu1 %665 }
  0xb8   :  { %10086 = vst [vmem:[#allocation153_spill] sm:$0xff] %v5552_v7  ;;  %v5558_v59 = vpop.permute.xlu0 %663 }
  0xb9   :  { %10088 = vst [vmem:[#allocation155_spill] sm:$0xff] %v5558_v59  ;;  %845 = vrot.lane.b32.xlu1 %v5548_v58, %s4394_s18 }
  0xba   :  { %843 = vrot.lane.b32.xlu0 %v5555_v53, %s4394_s18 }
  0xbb   :  { %v5569_v7 = vpop.permute.xlu1 %669 }
  0xbc   :  { %10090 = vst [vmem:[#allocation157_spill] sm:$0xff] %v5569_v7  ;;  %v5575_v45 = vpop.permute.xlu0 %667  ;;  %v470_v7 = vrot.slane %v10094_v9, 2  ;;  %v10100_v9 = vld [vmem:[#allocation38_spill] sm:$0xff] }
  0xbd   :  { %10092 = vst [vmem:[#allocation159_spill] sm:$0xff] %v5575_v45  ;;  %849 = vrot.lane.b32.xlu1 %v5565_v29, %s4394_s18  ;;  %v475_v19 = vrot.slane %v10100_v9, 2 }
  0xbe   :  { %847 = vrot.lane.b32.xlu0 %v5572_v26, %s4394_s18  ;;  %v471_v42 = vsel %vm386_vm1, %v468_v49, %v470_v7  ;;  %v10105_v7 = vld [vmem:[#allocation40_spill] sm:$0xff]  ;;  %v10109_v49 = vld [vmem:[#allocation42_spill] sm:$0xff] }
  0xbf   :  { %v5586_v59 = vpop.permute.xlu1 %673  ;;  %v478_v56 = vrot.slane %v10105_v7, 2  ;;  %v477_v8 = vrot.slane %v10109_v49, 2  ;;  %v10113_v7 = vld [vmem:[#allocation46_spill] sm:$0xff] }
  0xc0   :  { %10095 = vst [vmem:[#allocation33_spill] sm:$0xff] %v5586_v59  ;;  %v5592_v45 = vpop.permute.xlu0 %671  ;;  %v485_v36 = vrot.slane %v10113_v7, 2 }
  0xc1   :  { %10098 = vst [vmem:[#allocation34_spill] sm:$0xff] %v5592_v45  ;;  %853 = vrot.lane.b32.xlu1 %v5582_v13, %s4394_s18  ;;  %v5610_v45 = vsel %vm386_vm1, %v473_v37, %v475_v19  ;;  %v5627_v19 = vsel %vm386_vm1, %v478_v56, %v480_v48 }
  0xc2   :  { %851 = vrot.lane.b32.xlu0 %v5589_v20, %s4394_s18  ;;  %10104 = vst [vmem:[#allocation39_spill] sm:$0xff] %v5610_v45  ;;  %10111 = vst [vmem:[#allocation162_spill] sm:$0xff] %v5627_v19 }
  0xc3   :  { %v5601_v59 = vpop.permute.xlu1 %677 }
  0xc4   :  { %10101 = vst [vmem:[#allocation37_spill] sm:$0xff] %v5601_v59  ;;  %v5605_v3 = vpop.permute.xlu0 %675  ;;  %v5617_v59 = vsel %vm386_vm1, %v472_v61, %v473_v37  ;;  %v5634_v37 = vsel %vm386_vm1, %v477_v8, %v478_v56  ;;  %v10116_v61 = vld [vmem:[#allocation47_spill] sm:$0xff]  ;;  %v10123_v8 = vld [vmem:[#allocation52_spill] sm:$0xff] }
  0xc5   :  { %10103 = vst [vmem:[#allocation38_spill] sm:$0xff] %v5605_v3  ;;  %857 = vrot.lane.b32.xlu1 %v471_v42, %s4394_s18  ;;  %10108 = vst [vmem:[#allocation41_spill] sm:$0xff] %v5617_v59  ;;  %v10112_v42 = vld [vmem:[#allocation45_spill] sm:$0xff]  ;;  %v482_v49 = vrot.slane %v10116_v61, 2  ;;  %v10119_v3 = vld [vmem:[#allocation50_spill] sm:$0xff] }
  0xc6   :  { %855 = vrot.lane.b32.xlu0 %v469_v60, %s4394_s18  ;;  %v483_v60 = vrot.slane %v10112_v42, 2  ;;  %10115 = vst [vmem:[#allocation46_spill] sm:$0xff] %v5634_v37  ;;  %v488_v7 = vrot.slane %v10119_v3, 2 }
  0xc7   :  { %v5614_v9 = vpop.permute.xlu1 %681 }
  0xc8   :  { %10107 = vst [vmem:[#allocation40_spill] sm:$0xff] %v5614_v9  ;;  %v5620_v50 = vpop.permute.xlu0 %679  ;;  %v5644_v48 = vsel %vm386_vm1, %v483_v60, %v485_v36  ;;  %v5651_v56 = vsel %vm386_vm1, %v482_v49, %v483_v60  ;;  %v10130_v49 = vld [vmem:[#allocation57_spill] sm:$0xff] }
  0xc9   :  { %10110 = vst [vmem:[#allocation42_spill] sm:$0xff] %v5620_v50  ;;  %861 = vrot.lane.b32.xlu1 %v5610_v45, %s4394_s18  ;;  %10118 = vst [vmem:[#allocation163_spill] sm:$0xff] %v5644_v48 }
  0xca   :  { %859 = vrot.lane.b32.xlu0 %v5617_v59, %s4394_s18  ;;  %10122 = vst [vmem:[#allocation51_spill] sm:$0xff] %v5651_v56 }
  0xcb   :  { %v5631_v9 = vpop.permute.xlu1 %685 }
  0xcc   :  { %10114 = vst [vmem:[#allocation45_spill] sm:$0xff] %v5631_v9  ;;  %v5637_v50 = vpop.permute.xlu0 %683  ;;  %v490_v9 = vrot.slane %v10120_v40, 2 }
  0xcd   :  { %10117 = vst [vmem:[#allocation47_spill] sm:$0xff] %v5637_v50  ;;  %865 = vrot.lane.b32.xlu1 %v5627_v19, %s4394_s18  ;;  %v487_v50 = vrot.slane %v10123_v8, 2  ;;  %v10126_v19 = vld [vmem:[#allocation55_spill] sm:$0xff] }
  0xce   :  { %863 = vrot.lane.b32.xlu0 %v5634_v37, %s4394_s18  ;;  %v5661_v36 = vsel %vm386_vm1, %v488_v7, %v490_v9  ;;  %v493_v40 = vrot.slane %v10126_v19, 2  ;;  %v10127_v37 = vld [vmem:[#allocation56_spill] sm:$0xff] }
  0xcf   :  { %v5648_v32 = vpop.permute.xlu1 %689  ;;  %10125 = vst [vmem:[#allocation164_spill] sm:$0xff] %v5661_v36  ;;  %v5668_v60 = vsel %vm386_vm1, %v487_v50, %v488_v7  ;;  %v10137_v7 = vld [vmem:[#allocation62_spill] sm:$0xff] }
  0xd0   :  { %10121 = vst [vmem:[#allocation50_spill] sm:$0xff] %v5648_v32  ;;  %v5654_v45 = vpop.permute.xlu0 %687  ;;  %v495_v32 = vrot.slane %v10127_v37, 2  ;;  %10129 = vst [vmem:[#allocation56_spill] sm:$0xff] %v5668_v60 }
  0xd1   :  { %10124 = vst [vmem:[#allocation52_spill] sm:$0xff] %v5654_v45  ;;  %869 = vrot.lane.b32.xlu1 %v5644_v48, %s4394_s18  ;;  %v492_v45 = vrot.slane %v10130_v49, 2  ;;  %v10133_v48 = vld [vmem:[#allocation60_spill] sm:$0xff] }
  0xd2   :  { %867 = vrot.lane.b32.xlu0 %v5651_v56, %s4394_s18  ;;  %v5678_v9 = vsel %vm386_vm1, %v493_v40, %v495_v32  ;;  %v498_v37 = vrot.slane %v10133_v48, 2  ;;  %v10134_v56 = vld [vmem:[#allocation61_spill] sm:$0xff] }
  0xd3   :  { %v5665_v59 = vpop.permute.xlu1 %693  ;;  %10132 = vst [vmem:[#allocation165_spill] sm:$0xff] %v5678_v9  ;;  %v5685_v50 = vsel %vm386_vm1, %v492_v45, %v493_v40  ;;  %v10144_v40 = vld [vmem:[#allocation67_spill] sm:$0xff] }
  0xd4   :  { %10128 = vst [vmem:[#allocation55_spill] sm:$0xff] %v5665_v59  ;;  %v5671_v24 = vpop.permute.xlu0 %691  ;;  %v500_v59 = vrot.slane %v10134_v56, 2  ;;  %10136 = vst [vmem:[#allocation61_spill] sm:$0xff] %v5685_v50 }
  0xd5   :  { %10131 = vst [vmem:[#allocation57_spill] sm:$0xff] %v5671_v24  ;;  %873 = vrot.lane.b32.xlu1 %v5661_v36, %s4394_s18  ;;  %v497_v24 = vrot.slane %v10137_v7, 2  ;;  %v10140_v36 = vld [vmem:[#allocation65_spill] sm:$0xff] }
  0xd6   :  { %871 = vrot.lane.b32.xlu0 %v5668_v60, %s4394_s18  ;;  %v5695_v32 = vsel %vm386_vm1, %v498_v37, %v500_v59  ;;  %v503_v56 = vrot.slane %v10140_v36, 2  ;;  %v10141_v60 = vld [vmem:[#allocation66_spill] sm:$0xff] }
  0xd7   :  { %v5682_v15 = vpop.permute.xlu1 %697  ;;  %10139 = vst [vmem:[#allocation166_spill] sm:$0xff] %v5695_v32  ;;  %v5702_v45 = vsel %vm386_vm1, %v497_v24, %v498_v37  ;;  %v10151_v37 = vld [vmem:[#allocation72_spill] sm:$0xff] }
  0xd8   :  { %10135 = vst [vmem:[#allocation60_spill] sm:$0xff] %v5682_v15  ;;  %v5688_v13 = vpop.permute.xlu0 %695  ;;  %v505_v15 = vrot.slane %v10141_v60, 2  ;;  %10143 = vst [vmem:[#allocation66_spill] sm:$0xff] %v5702_v45 }
  0xd9   :  { %10138 = vst [vmem:[#allocation62_spill] sm:$0xff] %v5688_v13  ;;  %877 = vrot.lane.b32.xlu1 %v5678_v9, %s4394_s18  ;;  %v502_v13 = vrot.slane %v10144_v40, 2  ;;  %v10147_v9 = vld [vmem:[#allocation70_spill] sm:$0xff] }
  0xda   :  { %875 = vrot.lane.b32.xlu0 %v5685_v50, %s4394_s18  ;;  %v5712_v59 = vsel %vm386_vm1, %v503_v56, %v505_v15  ;;  %v508_v60 = vrot.slane %v10147_v9, 2  ;;  %v10148_v50 = vld [vmem:[#allocation71_spill] sm:$0xff] }
  0xdb   :  { %v5699_v20 = vpop.permute.xlu1 %701  ;;  %10146 = vst [vmem:[#allocation167_spill] sm:$0xff] %v5712_v59  ;;  %v5719_v24 = vsel %vm386_vm1, %v502_v13, %v503_v56  ;;  %v10158_v56 = vld [vmem:[#allocation77_spill] sm:$0xff] }
  0xdc   :  { %10142 = vst [vmem:[#allocation65_spill] sm:$0xff] %v5699_v20  ;;  %v5705_v0 = vpop.permute.xlu0 %699  ;;  %v510_v20 = vrot.slane %v10148_v50, 2  ;;  %10150 = vst [vmem:[#allocation71_spill] sm:$0xff] %v5719_v24 }
  0xdd   :  { %10145 = vst [vmem:[#allocation67_spill] sm:$0xff] %v5705_v0  ;;  %881 = vrot.lane.b32.xlu1 %v5695_v32, %s4394_s18  ;;  %v507_v0 = vrot.slane %v10151_v37, 2  ;;  %v10154_v32 = vld [vmem:[#allocation75_spill] sm:$0xff] }
  0xde   :  { %879 = vrot.lane.b32.xlu0 %v5702_v45, %s4394_s18  ;;  %v5729_v15 = vsel %vm386_vm1, %v508_v60, %v510_v20  ;;  %v513_v50 = vrot.slane %v10154_v32, 2  ;;  %v10155_v45 = vld [vmem:[#allocation76_spill] sm:$0xff] }
  0xdf   :  { %v5716_v29 = vpop.permute.xlu1 %705  ;;  %10153 = vst [vmem:[#allocation168_spill] sm:$0xff] %v5729_v15  ;;  %v5736_v13 = vsel %vm386_vm1, %v507_v0, %v508_v60  ;;  %v10165_v60 = vld [vmem:[#allocation82_spill] sm:$0xff] }
  0xe0   :  { %10149 = vst [vmem:[#allocation70_spill] sm:$0xff] %v5716_v29  ;;  %v5722_v26 = vpop.permute.xlu0 %703  ;;  %v515_v29 = vrot.slane %v10155_v45, 2  ;;  %10157 = vst [vmem:[#allocation76_spill] sm:$0xff] %v5736_v13 }
  0xe1   :  { %10152 = vst [vmem:[#allocation72_spill] sm:$0xff] %v5722_v26  ;;  %885 = vrot.lane.b32.xlu1 %v5712_v59, %s4394_s18  ;;  %v512_v26 = vrot.slane %v10158_v56, 2  ;;  %v10161_v59 = vld [vmem:[#allocation80_spill] sm:$0xff] }
  0xe2   :  { %883 = vrot.lane.b32.xlu0 %v5719_v24, %s4394_s18  ;;  %v5746_v20 = vsel %vm386_vm1, %v513_v50, %v515_v29  ;;  %v518_v45 = vrot.slane %v10161_v59, 2  ;;  %v10162_v24 = vld [vmem:[#allocation81_spill] sm:$0xff] }
  0xe3   :  { %v5733_v33 = vpop.permute.xlu1 %709  ;;  %10160 = vst [vmem:[#allocation169_spill] sm:$0xff] %v5746_v20  ;;  %v5753_v0 = vsel %vm386_vm1, %v512_v26, %v513_v50  ;;  %v10172_v50 = vld [vmem:[#allocation87_spill] sm:$0xff] }
  0xe4   :  { %10156 = vst [vmem:[#allocation75_spill] sm:$0xff] %v5733_v33  ;;  %v5739_v43 = vpop.permute.xlu0 %707  ;;  %v520_v33 = vrot.slane %v10162_v24, 2  ;;  %10164 = vst [vmem:[#allocation81_spill] sm:$0xff] %v5753_v0 }
  0xe5   :  { %10159 = vst [vmem:[#allocation77_spill] sm:$0xff] %v5739_v43  ;;  %889 = vrot.lane.b32.xlu1 %v5729_v15, %s4394_s18  ;;  %v517_v43 = vrot.slane %v10165_v60, 2  ;;  %v10168_v15 = vld [vmem:[#allocation85_spill] sm:$0xff] }
  0xe6   :  { %887 = vrot.lane.b32.xlu0 %v5736_v13, %s4394_s18  ;;  %v5763_v29 = vsel %vm386_vm1, %v518_v45, %v520_v33  ;;  %v523_v24 = vrot.slane %v10168_v15, 2  ;;  %v10169_v13 = vld [vmem:[#allocation86_spill] sm:$0xff] }
  0xe7   :  { %v5750_v58 = vpop.permute.xlu1 %713  ;;  %10167 = vst [vmem:[#allocation170_spill] sm:$0xff] %v5763_v29  ;;  %v5770_v26 = vsel %vm386_vm1, %v517_v43, %v518_v45  ;;  %v10179_v45 = vld [vmem:[#allocation92_spill] sm:$0xff] }
  0xe8   :  { %10163 = vst [vmem:[#allocation80_spill] sm:$0xff] %v5750_v58  ;;  %v5756_v53 = vpop.permute.xlu0 %711  ;;  %v525_v58 = vrot.slane %v10169_v13, 2  ;;  %10171 = vst [vmem:[#allocation86_spill] sm:$0xff] %v5770_v26 }
  0xe9   :  { %10166 = vst [vmem:[#allocation82_spill] sm:$0xff] %v5756_v53  ;;  %893 = vrot.lane.b32.xlu1 %v5746_v20, %s4394_s18  ;;  %v522_v53 = vrot.slane %v10172_v50, 2  ;;  %v10175_v20 = vld [vmem:[#allocation90_spill] sm:$0xff] }
  0xea   :  { %891 = vrot.lane.b32.xlu0 %v5753_v0, %s4394_s18  ;;  %v5780_v33 = vsel %vm386_vm1, %v523_v24, %v525_v58  ;;  %v528_v13 = vrot.slane %v10175_v20, 2  ;;  %v10176_v0 = vld [vmem:[#allocation91_spill] sm:$0xff] }
  0xeb   :  { %v5767_v6 = vpop.permute.xlu1 %717  ;;  %10174 = vst [vmem:[#allocation171_spill] sm:$0xff] %v5780_v33  ;;  %v5787_v43 = vsel %vm386_vm1, %v522_v53, %v523_v24  ;;  %v10186_v24 = vld [vmem:[#allocation97_spill] sm:$0xff] }
  0xec   :  { %10170 = vst [vmem:[#allocation85_spill] sm:$0xff] %v5767_v6  ;;  %v5773_v51 = vpop.permute.xlu0 %715  ;;  %v530_v6 = vrot.slane %v10176_v0, 2  ;;  %10178 = vst [vmem:[#allocation91_spill] sm:$0xff] %v5787_v43 }
  0xed   :  { %10173 = vst [vmem:[#allocation87_spill] sm:$0xff] %v5773_v51  ;;  %897 = vrot.lane.b32.xlu1 %v5763_v29, %s4394_s18  ;;  %v527_v51 = vrot.slane %v10179_v45, 2  ;;  %v10182_v29 = vld [vmem:[#allocation95_spill] sm:$0xff] }
  0xee   :  { %895 = vrot.lane.b32.xlu0 %v5770_v26, %s4394_s18  ;;  %v5797_v58 = vsel %vm386_vm1, %v528_v13, %v530_v6  ;;  %v533_v0 = vrot.slane %v10182_v29, 2  ;;  %v10183_v26 = vld [vmem:[#allocation96_spill] sm:$0xff] }
  0xef   :  { %v5784_v35 = vpop.permute.xlu1 %721  ;;  %10181 = vst [vmem:[#allocation172_spill] sm:$0xff] %v5797_v58  ;;  %v5804_v53 = vsel %vm386_vm1, %v527_v51, %v528_v13  ;;  %v10193_v13 = vld [vmem:[#allocation102_spill] sm:$0xff] }
  0xf0   :  { %10177 = vst [vmem:[#allocation90_spill] sm:$0xff] %v5784_v35  ;;  %v5790_v34 = vpop.permute.xlu0 %719  ;;  %v535_v35 = vrot.slane %v10183_v26, 2  ;;  %10185 = vst [vmem:[#allocation96_spill] sm:$0xff] %v5804_v53 }
  0xf1   :  { %10180 = vst [vmem:[#allocation92_spill] sm:$0xff] %v5790_v34  ;;  %901 = vrot.lane.b32.xlu1 %v5780_v33, %s4394_s18  ;;  %v532_v34 = vrot.slane %v10186_v24, 2  ;;  %v10189_v33 = vld [vmem:[#allocation100_spill] sm:$0xff] }
  0xf2   :  { %899 = vrot.lane.b32.xlu0 %v5787_v43, %s4394_s18  ;;  %v5814_v6 = vsel %vm386_vm1, %v533_v0, %v535_v35  ;;  %v538_v26 = vrot.slane %v10189_v33, 2  ;;  %v10190_v43 = vld [vmem:[#allocation101_spill] sm:$0xff] }
  0xf3   :  { %v5801_v44 = vpop.permute.xlu1 %725  ;;  %10188 = vst [vmem:[#allocation173_spill] sm:$0xff] %v5814_v6  ;;  %v5821_v51 = vsel %vm386_vm1, %v532_v34, %v533_v0  ;;  %v542_v0 = vrot.slane %v5292_v4, 2 }
  0xf4   :  { %10184 = vst [vmem:[#allocation95_spill] sm:$0xff] %v5801_v44  ;;  %v5807_v41 = vpop.permute.xlu0 %723  ;;  %v540_v44 = vrot.slane %v10190_v43, 2  ;;  %10192 = vst [vmem:[#allocation101_spill] sm:$0xff] %v5821_v51  ;;  %v543_v43 = vrot.slane %v5280_v17, 2 }
  0xf5   :  { %10187 = vst [vmem:[#allocation97_spill] sm:$0xff] %v5807_v41  ;;  %905 = vrot.lane.b32.xlu1 %v5797_v58, %s4394_s18  ;;  %v537_v41 = vrot.slane %v10193_v13, 2  ;;  %v545_v58 = vrot.slane %v5285_v21, 2 }
  0xf6   :  { %903 = vrot.lane.b32.xlu0 %v5804_v53, %s4394_s18  ;;  %v5831_v35 = vsel %vm386_vm1, %v538_v26, %v540_v44  ;;  %v5853_v21 = vsel %vm386_vm1, %v542_v0, %v543_v43 }
  0xf7   :  { %v5818_v18 = vpop.permute.xlu1 %793  ;;  %10195 = vst [vmem:[#allocation174_spill] sm:$0xff] %v5831_v35  ;;  %v5838_v34 = vsel %vm386_vm1, %v537_v41, %v538_v26  ;;  %v5848_v44 = vsel %vm386_vm1, %v543_v43, %v545_v58  ;;  %10201 = vst [vmem:[#allocation180_spill] sm:$0xff] %v5853_v21  ;;  %v5868_v58 = vld [vmem:[%s9603_s0 + $0x20] sm:$0xff]  ;;  %v5875_v43 = vld [vmem:[%s9603_s0 + $0x18] sm:$0xff] }
  0xf8   :  { %10191 = vst [vmem:[#allocation100_spill] sm:$0xff] %v5818_v18  ;;  %v5824_v16 = vpop.permute.xlu0 %791  ;;  %10197 = vst [vmem:[#allocation176_spill] sm:$0xff] %v5838_v34  ;;  %v6001_v18 = vld [vmem:[%s9603_s0 + $0xc0] sm:$0xff] }
  0xf9   :  { %10194 = vst [vmem:[#allocation102_spill] sm:$0xff] %v5824_v16  ;;  %909 = vrot.lane.b32.xlu1 %v5814_v6, %s4394_s18  ;;  %10199 = vst [vmem:[#allocation178_spill] sm:$0xff] %v5848_v44  ;;  %v6019_v16 = vld [vmem:[%s9603_s0 + $0xd8] sm:$0xff] }
  0xfa   :  { %907 = vrot.lane.b32.xlu0 %v5821_v51, %s4394_s18  ;;  %10205 = vst [vmem:[#allocation184_spill] sm:$0xff] %v5868_v58  ;;  %10206 = vst [vmem:[#allocation185_spill] sm:$0xff] %v5875_v43 }
  0xfb   :  { %v5835_v53 = vpop.permute.xlu1 %797  ;;  %10222 = vst [vmem:[#allocation201_spill] sm:$0xff] %v6001_v18  ;;  %10226 = vst [vmem:[#allocation205_spill] sm:$0xff] %v6019_v16 }
  0xfc   :  { %10196 = vst [vmem:[#allocation175_spill] sm:$0xff] %v5835_v53  ;;  %v5841_v63 = vpop.permute.xlu0 %795  ;;  %v5947_v53 = vld [vmem:[%s9603_s0 + $0x78] sm:$0xff] }
  0xfd   :  { %10198 = vst [vmem:[#allocation177_spill] sm:$0xff] %v5841_v63  ;;  %913 = vrot.lane.b32.xlu1 %v5831_v35, %s4394_s18 }
  0xfe   :  { %911 = vrot.lane.b32.xlu0 %v5838_v34, %s4394_s18  ;;  %v5893_v34 = vld [vmem:[%s9603_s0 + $0x30] sm:$0xff] }
  0xff   :  { %v5850_v6 = vpop.permute.xlu1 %801 }
 0x100   :  { %10200 = vst [vmem:[#allocation179_spill] sm:$0xff] %v5850_v6  ;;  %v5855_v41 = vpop.permute.xlu0 %799  ;;  %v5929_v6 = vld [vmem:[%s9603_s0 + $0x60] sm:$0xff] }
 0x101   :  { %10202 = vst [vmem:[#allocation181_spill] sm:$0xff] %v5855_v41  ;;  %917 = vrot.lane.b32.xlu1 %v5848_v44, %s4394_s18 }
 0x102   :  { %915 = vrot.lane.b32.xlu0 %v5853_v21, %s4394_s18  ;;  %v5886_v21 = vld [vmem:[%s9603_s0 + $0x38] sm:$0xff] }
 0x103   :  { %v5861_v26 = vpop.permute.xlu1 %805 }
 0x104   :  { %10203 = vst [vmem:[#allocation182_spill] sm:$0xff] %v5861_v26  ;;  %v5863_v35 = vpop.permute.xlu0 %803  ;;  %v5911_v26 = vld [vmem:[%s9603_s0 + $0x48] sm:$0xff] }
 0x105   :  { %10204 = vst [vmem:[#allocation183_spill] sm:$0xff] %v5863_v35  ;;  %985 = vrot.lane.b32.xlu1 %v5868_v58, %s4395_s20  ;;  %v5965_v58 = vld [vmem:[%s9603_s0 + $0x90] sm:$0xff] }
 0x106   :  { %983 = vrot.lane.b32.xlu0 %v5875_v43, %s4395_s20  ;;  %v5983_v43 = vld [vmem:[%s9603_s0 + $0xa8] sm:$0xff] }
 0x107   :  { %v5879_v0 = vpop.permute.xlu1 %809 }
 0x108   :  { %10207 = vst [vmem:[#allocation186_spill] sm:$0xff] %v5879_v0  ;;  %v5881_v44 = vpop.permute.xlu0 %807 }
 0x109   :  { %10208 = vst [vmem:[#allocation187_spill] sm:$0xff] %v5881_v44  ;;  %989 = vrot.lane.b32.xlu1 %v5886_v21, %s4395_s20  ;;  %v5904_v44 = vld [vmem:[%s9603_s0 + $0x50] sm:$0xff] }
 0x10a   :  { %987 = vrot.lane.b32.xlu0 %v5893_v34, %s4395_s20 }
 0x10b   :  { %v5897_v51 = vpop.permute.xlu1 %813 }
 0x10c   :  { %10209 = vst [vmem:[#allocation188_spill] sm:$0xff] %v5897_v51  ;;  %v5899_v0 = vpop.permute.xlu0 %811 }
 0x10d   :  { %10210 = vst [vmem:[#allocation189_spill] sm:$0xff] %v5899_v0  ;;  %993 = vrot.lane.b32.xlu1 %v5904_v44, %s4395_s20  ;;  %v5922_v0 = vld [vmem:[%s9603_s0 + $0x68] sm:$0xff] }
 0x10e   :  { %991 = vrot.lane.b32.xlu0 %v5911_v26, %s4395_s20 }
 0x10f   :  { %v5915_v35 = vpop.permute.xlu1 %817 }
 0x110   :  { %10211 = vst [vmem:[#allocation190_spill] sm:$0xff] %v5915_v35  ;;  %v5917_v51 = vpop.permute.xlu0 %815 }
 0x111   :  { %10212 = vst [vmem:[#allocation191_spill] sm:$0xff] %v5917_v51  ;;  %997 = vrot.lane.b32.xlu1 %v5922_v0, %s4395_s20  ;;  %v5940_v51 = vld [vmem:[%s9603_s0 + $0x80] sm:$0xff] }
 0x112   :  { %995 = vrot.lane.b32.xlu0 %v5929_v6, %s4395_s20 }
 0x113   :  { %v5933_v41 = vpop.permute.xlu1 %821 }
 0x114   :  { %10213 = vst [vmem:[#allocation192_spill] sm:$0xff] %v5933_v41  ;;  %v5935_v35 = vpop.permute.xlu0 %819 }
 0x115   :  { %10214 = vst [vmem:[#allocation193_spill] sm:$0xff] %v5935_v35  ;;  %1001 = vrot.lane.b32.xlu1 %v5940_v51, %s4395_s20  ;;  %v5958_v35 = vld [vmem:[%s9603_s0 + $0x98] sm:$0xff] }
 0x116   :  { %999 = vrot.lane.b32.xlu0 %v5947_v53, %s4395_s20 }
 0x117   :  { %v5951_v62 = vpop.permute.xlu1 %825 }
 0x118   :  { %10215 = vst [vmem:[#allocation194_spill] sm:$0xff] %v5951_v62  ;;  %v5953_v41 = vpop.permute.xlu0 %823 }
 0x119   :  { %10216 = vst [vmem:[#allocation195_spill] sm:$0xff] %v5953_v41  ;;  %1005 = vrot.lane.b32.xlu1 %v5958_v35, %s4395_s20  ;;  %v5976_v41 = vld [vmem:[%s9603_s0 + $0xb0] sm:$0xff] }
 0x11a   :  { %1003 = vrot.lane.b32.xlu0 %v5965_v58, %s4395_s20 }
 0x11b   :  { %v5969_v63 = vpop.permute.xlu1 %829 }
 0x11c   :  { %10217 = vst [vmem:[#allocation196_spill] sm:$0xff] %v5969_v63  ;;  %v5971_v62 = vpop.permute.xlu0 %827 }
 0x11d   :  { %10218 = vst [vmem:[#allocation197_spill] sm:$0xff] %v5971_v62  ;;  %1009 = vrot.lane.b32.xlu1 %v5976_v41, %s4395_s20  ;;  %v5994_v62 = vld [vmem:[%s9603_s0 + $0xc8] sm:$0xff] }
 0x11e   :  { %1007 = vrot.lane.b32.xlu0 %v5983_v43, %s4395_s20  ;;  %10221 = vst [vmem:[#allocation200_spill] sm:$0xff] %v5994_v62 }
 0x11f   :  { %v5987_v55 = vpop.permute.xlu1 %833 }
 0x120   :  { %10219 = vst [vmem:[#allocation198_spill] sm:$0xff] %v5987_v55  ;;  %v5989_v63 = vpop.permute.xlu0 %831 }
 0x121   :  { %10220 = vst [vmem:[#allocation199_spill] sm:$0xff] %v5989_v63  ;;  %1013 = vrot.lane.b32.xlu1 %v5994_v62, %s4395_s20  ;;  %v6012_v63 = vld [vmem:[%s9603_s0 + $0xe0] sm:$0xff] }
 0x122   :  { %1011 = vrot.lane.b32.xlu0 %v6001_v18, %s4395_s20  ;;  %10225 = vst [vmem:[#allocation204_spill] sm:$0xff] %v6012_v63 }
 0x123   :  { %v6005_v54 = vpop.permute.xlu1 %837 }
 0x124   :  { %10223 = vst [vmem:[#allocation202_spill] sm:$0xff] %v6005_v54  ;;  %v6007_v55 = vpop.permute.xlu0 %835 }
 0x125   :  { %10224 = vst [vmem:[#allocation203_spill] sm:$0xff] %v6007_v55  ;;  %1017 = vrot.lane.b32.xlu1 %v6012_v63, %s4395_s20  ;;  %v6030_v55 = vld [vmem:[%s9603_s0 + $0xf8] sm:$0xff]  ;;  %v6037_v63 = vld [vmem:[%s9603_s0 + $0xf0] sm:$0xff] }
 0x126   :  { %1015 = vrot.lane.b32.xlu0 %v6019_v16, %s4395_s20  ;;  %10229 = vst [vmem:[#allocation208_spill] sm:$0xff] %v6030_v55  ;;  %10230 = vst [vmem:[#allocation209_spill] sm:$0xff] %v6037_v63 }
 0x127   :  { %v6023_v47 = vpop.permute.xlu1 %841 }
 0x128   :  { %10227 = vst [vmem:[#allocation206_spill] sm:$0xff] %v6023_v47  ;;  %v6025_v54 = vpop.permute.xlu0 %839 }
 0x129   :  { %10228 = vst [vmem:[#allocation207_spill] sm:$0xff] %v6025_v54  ;;  %1021 = vrot.lane.b32.xlu1 %v6030_v55, %s4395_s20  ;;  %v6048_v54 = vld [vmem:[%s9603_s0 + $0x110] sm:$0xff]  ;;  %v6055_v55 = vld [vmem:[%s9603_s0 + $0x108] sm:$0xff] }
 0x12a   :  { %1019 = vrot.lane.b32.xlu0 %v6037_v63, %s4395_s20  ;;  %10233 = vst [vmem:[#allocation212_spill] sm:$0xff] %v6048_v54  ;;  %10234 = vst [vmem:[#allocation213_spill] sm:$0xff] %v6055_v55 }
 0x12b   :  { %v6041_v16 = vpop.permute.xlu1 %845 }
 0x12c   :  { %10231 = vst [vmem:[#allocation210_spill] sm:$0xff] %v6041_v16  ;;  %v6043_v47 = vpop.permute.xlu0 %843 }
 0x12d   :  { %10232 = vst [vmem:[#allocation211_spill] sm:$0xff] %v6043_v47  ;;  %1025 = vrot.lane.b32.xlu1 %v6048_v54, %s4395_s20  ;;  %v6066_v47 = vld [vmem:[%s9603_s0 + $0x128] sm:$0xff]  ;;  %v6073_v54 = vld [vmem:[%s9603_s0 + $0x120] sm:$0xff] }
 0x12e   :  { %1023 = vrot.lane.b32.xlu0 %v6055_v55, %s4395_s20  ;;  %10237 = vst [vmem:[#allocation216_spill] sm:$0xff] %v6066_v47  ;;  %10238 = vst [vmem:[#allocation217_spill] sm:$0xff] %v6073_v54 }
 0x12f   :  { %v6059_v63 = vpop.permute.xlu1 %849 }
 0x130   :  { %10235 = vst [vmem:[#allocation214_spill] sm:$0xff] %v6059_v63  ;;  %v6061_v16 = vpop.permute.xlu0 %847 }
 0x131   :  { %10236 = vst [vmem:[#allocation215_spill] sm:$0xff] %v6061_v16  ;;  %1029 = vrot.lane.b32.xlu1 %v6066_v47, %s4395_s20  ;;  %v6084_v16 = vld [vmem:[%s9603_s0 + $0x140] sm:$0xff]  ;;  %v6091_v47 = vld [vmem:[%s9603_s0 + $0x138] sm:$0xff] }
 0x132   :  { %1027 = vrot.lane.b32.xlu0 %v6073_v54, %s4395_s20  ;;  %10241 = vst [vmem:[#allocation220_spill] sm:$0xff] %v6084_v16  ;;  %10242 = vst [vmem:[#allocation221_spill] sm:$0xff] %v6091_v47 }
 0x133   :  { %v6077_v55 = vpop.permute.xlu1 %853 }
 0x134   :  { %10239 = vst [vmem:[#allocation218_spill] sm:$0xff] %v6077_v55  ;;  %v6079_v63 = vpop.permute.xlu0 %851 }
 0x135   :  { %10240 = vst [vmem:[#allocation219_spill] sm:$0xff] %v6079_v63  ;;  %1033 = vrot.lane.b32.xlu1 %v6084_v16, %s4395_s20  ;;  %v4297_v63 = vld [vmem:[%s9603_s0 + $0x158] sm:$0xff]  ;;  %v4298_v16 = vld [vmem:[%s9603_s0 + $0x150] sm:$0xff] }
 0x136   :  { %1031 = vrot.lane.b32.xlu0 %v6091_v47, %s4395_s20 }
 0x137   :  { %v6095_v54 = vpop.permute.xlu1 %857 }
 0x138   :  { %10243 = vst [vmem:[#allocation222_spill] sm:$0xff] %v6095_v54  ;;  %v6097_v55 = vpop.permute.xlu0 %855  ;;  %v4299_v54 = vld [vmem:[%s9603_s0 + $0x170] sm:$0xff] }
 0x139   :  { %10244 = vst [vmem:[#allocation223_spill] sm:$0xff] %v6097_v55  ;;  %1037 = vrot.lane.b32.xlu1 %v4297_v63, %s4395_s20  ;;  %v4300_v63 = vld [vmem:[%s9603_s0 + $0x168] sm:$0xff] }
 0x13a   :  { %1035 = vrot.lane.b32.xlu0 %v4298_v16, %s4395_s20  ;;  %v6122_v16 = vld [vmem:[%s9603_s0 + $0x188] sm:$0xff] }
 0x13b   :  { %v6107_v46 = vpop.permute.xlu1 %861 }
 0x13c   :  { %10245 = vst [vmem:[#allocation224_spill] sm:$0xff] %v6107_v46  ;;  %v6109_v62 = vpop.permute.xlu0 %859 }
 0x13d   :  { %10246 = vst [vmem:[#allocation225_spill] sm:$0xff] %v6109_v62  ;;  %1041 = vrot.lane.b32.xlu1 %v4299_v54, %s4395_s20  ;;  %v6129_v62 = vld [vmem:[%s9603_s0 + $0x180] sm:$0xff] }
 0x13e   :  { %1039 = vrot.lane.b32.xlu0 %v4300_v63, %s4395_s20 }
 0x13f   :  { %v6124_v46 = vpop.permute.xlu1 %865 }
 0x140   :  { %10247 = vst [vmem:[#allocation226_spill] sm:$0xff] %v6124_v46  ;;  %v6131_v55 = vpop.permute.xlu0 %863  ;;  %v4301_v46 = vld [vmem:[%s9603_s0 + $0x1d0] sm:$0xff] }
 0x141   :  { %10248 = vst [vmem:[#allocation227_spill] sm:$0xff] %v6131_v55  ;;  %1045 = vrot.lane.b32.xlu1 %v6122_v16, %s4395_s20  ;;  %v4302_v55 = vld [vmem:[%s9603_s0 + $0x1c8] sm:$0xff] }
 0x142   :  { %1043 = vrot.lane.b32.xlu0 %v6129_v62, %s4395_s20 }
 0x143   :  { %v6137_v54 = vpop.permute.xlu1 %869 }
 0x144   :  { %10249 = vst [vmem:[#allocation228_spill] sm:$0xff] %v6137_v54  ;;  %v6139_v63 = vpop.permute.xlu0 %867  ;;  %v4303_v54 = vld [vmem:[%s9603_s0 + $0x1e8] sm:$0xff] }
 0x145   :  { %10250 = vst [vmem:[#allocation229_spill] sm:$0xff] %v6139_v63  ;;  %1049 = vrot.lane.b32.xlu1 %v4301_v46, %s4395_s20  ;;  %v4304_v46 = vld [vmem:[%s9603_s0 + $0x1e0] sm:$0xff] }
 0x146   :  { %1047 = vrot.lane.b32.xlu0 %v4302_v55, %s4395_s20 }
 0x147   :  { %v6149_v47 = vpop.permute.xlu1 %873 }
 0x148   :  { %10251 = vst [vmem:[#allocation230_spill] sm:$0xff] %v6149_v47  ;;  %v6151_v18 = vpop.permute.xlu0 %871 }
 0x149   :  { %10252 = vst [vmem:[#allocation231_spill] sm:$0xff] %v6151_v18  ;;  %1053 = vrot.lane.b32.xlu1 %v4303_v54, %s4395_s20  ;;  %v10305_v18 = vld [vmem:[#allocation17_spill] sm:$0xff] }
 0x14a   :  { %1051 = vrot.lane.b32.xlu0 %v4304_v46, %s4395_s20 }
 0x14b   :  { %v6161_v63 = vpop.permute.xlu1 %877 }
 0x14c   :  { %10253 = vst [vmem:[#allocation232_spill] sm:$0xff] %v6161_v63  ;;  %v6163_v39 = vpop.permute.xlu0 %875 }
 0x14d   :  { %10254 = vst [vmem:[#allocation233_spill] sm:$0xff] %v6163_v39  ;;  %1057 = vrot.lane.b32.xlu1 %v10112_v42, %s4395_s20 }
 0x14e   :  { %1055 = vrot.lane.b32.xlu0 %v10116_v61, %s4395_s20 }
 0x14f   :  { %v6169_v55 = vpop.permute.xlu1 %881 }
 0x150   :  { %10255 = vst [vmem:[#allocation234_spill] sm:$0xff] %v6169_v55  ;;  %v6171_v47 = vpop.permute.xlu0 %879  ;;  %v10301_v55 = vld [vmem:[#allocation15_spill] sm:$0xff] }
 0x151   :  { %10256 = vst [vmem:[#allocation235_spill] sm:$0xff] %v6171_v47  ;;  %1061 = vrot.lane.b32.xlu1 %v10119_v3, %s4395_s20  ;;  %v10302_v47 = vld [vmem:[#allocation16_spill] sm:$0xff] }
 0x152   :  { %1059 = vrot.lane.b32.xlu0 %v10123_v8, %s4395_s20 }
 0x153   :  { %v6177_v54 = vpop.permute.xlu1 %885 }
 0x154   :  { %10257 = vst [vmem:[#allocation236_spill] sm:$0xff] %v6177_v54  ;;  %v6179_v46 = vpop.permute.xlu0 %883 }
 0x155   :  { %10258 = vst [vmem:[#allocation237_spill] sm:$0xff] %v6179_v46  ;;  %1065 = vrot.lane.b32.xlu1 %v10126_v19, %s4395_s20 }
 0x156   :  { %1063 = vrot.lane.b32.xlu0 %v10130_v49, %s4395_s20 }
 0x157   :  { %v6185_v42 = vpop.permute.xlu1 %889 }
 0x158   :  { %10259 = vst [vmem:[#allocation238_spill] sm:$0xff] %v6185_v42  ;;  %v6187_v61 = vpop.permute.xlu0 %887  ;;  %v10297_v42 = vld [vmem:[#allocation13_spill] sm:$0xff] }
 0x159   :  { %10260 = vst [vmem:[#allocation239_spill] sm:$0xff] %v6187_v61  ;;  %1069 = vrot.lane.b32.xlu1 %v10133_v48, %s4395_s20  ;;  %v10298_v61 = vld [vmem:[#allocation14_spill] sm:$0xff] }
 0x15a   :  { %1067 = vrot.lane.b32.xlu0 %v10137_v7, %s4395_s20 }
 0x15b   :  { %v6193_v3 = vpop.permute.xlu1 %893 }
 0x15c   :  { %10261 = vst [vmem:[#allocation240_spill] sm:$0xff] %v6193_v3  ;;  %v6195_v8 = vpop.permute.xlu0 %891 }
 0x15d   :  { %10262 = vst [vmem:[#allocation241_spill] sm:$0xff] %v6195_v8  ;;  %1073 = vrot.lane.b32.xlu1 %v10140_v36, %s4395_s20 }
 0x15e   :  { %1071 = vrot.lane.b32.xlu0 %v10144_v40, %s4395_s20 }
 0x15f   :  { %v6201_v19 = vpop.permute.xlu1 %897 }
 0x160   :  { %10263 = vst [vmem:[#allocation242_spill] sm:$0xff] %v6201_v19  ;;  %v6203_v49 = vpop.permute.xlu0 %895  ;;  %v10293_v19 = vld [vmem:[#allocation11_spill] sm:$0xff] }
 0x161   :  { %10264 = vst [vmem:[#allocation243_spill] sm:$0xff] %v6203_v49  ;;  %1077 = vrot.lane.b32.xlu1 %v10147_v9, %s4395_s20  ;;  %v10294_v49 = vld [vmem:[#allocation12_spill] sm:$0xff] }
 0x162   :  { %1075 = vrot.lane.b32.xlu0 %v10151_v37, %s4395_s20 }
 0x163   :  { %v6209_v48 = vpop.permute.xlu1 %901 }
 0x164   :  { %10265 = vst [vmem:[#allocation244_spill] sm:$0xff] %v6209_v48  ;;  %v6211_v7 = vpop.permute.xlu0 %899  ;;  %v10289_v48 = vld [vmem:[#allocation9_spill] sm:$0xff] }
 0x165   :  { %10266 = vst [vmem:[#allocation245_spill] sm:$0xff] %v6211_v7  ;;  %1081 = vrot.lane.b32.xlu1 %v10154_v32, %s4395_s20 }
 0x166   :  { %1079 = vrot.lane.b32.xlu0 %v10158_v56, %s4395_s20 }
 0x167   :  { %v6217_v36 = vpop.permute.xlu1 %905 }
 0x168   :  { %10267 = vst [vmem:[#allocation246_spill] sm:$0xff] %v6217_v36  ;;  %v6219_v40 = vpop.permute.xlu0 %903 }
 0x169   :  { %10268 = vst [vmem:[#allocation247_spill] sm:$0xff] %v6219_v40  ;;  %1085 = vrot.lane.b32.xlu1 %v10161_v59, %s4395_s20 }
 0x16a   :  { %1083 = vrot.lane.b32.xlu0 %v10165_v60, %s4395_s20 }
 0x16b   :  { %v6225_v9 = vpop.permute.xlu1 %909 }
 0x16c   :  { %10269 = vst [vmem:[#allocation248_spill] sm:$0xff] %v6225_v9  ;;  %v6227_v37 = vpop.permute.xlu0 %907  ;;  %v10285_v9 = vld [vmem:[#allocation7_spill] sm:$0xff] }
 0x16d   :  { %10270 = vst [vmem:[#allocation249_spill] sm:$0xff] %v6227_v37  ;;  %1089 = vrot.lane.b32.xlu1 %v10168_v15, %s4395_s20  ;;  %v10286_v37 = vld [vmem:[#allocation8_spill] sm:$0xff] }
 0x16e   :  { %1087 = vrot.lane.b32.xlu0 %v10172_v50, %s4395_s20 }
 0x16f   :  { %v6233_v32 = vpop.permute.xlu1 %913 }
 0x170   :  { %10271 = vst [vmem:[#allocation250_spill] sm:$0xff] %v6233_v32  ;;  %v6235_v56 = vpop.permute.xlu0 %911 }
 0x171   :  { %10272 = vst [vmem:[#allocation251_spill] sm:$0xff] %v6235_v56  ;;  %1093 = vrot.lane.b32.xlu1 %v10175_v20, %s4395_s20 }
 0x172   :  { %1091 = vrot.lane.b32.xlu0 %v10179_v45, %s4395_s20 }
 0x173   :  { %v6241_v59 = vpop.permute.xlu1 %917 }
 0x174   :  { %10273 = vst [vmem:[#allocation252_spill] sm:$0xff] %v6241_v59  ;;  %v6243_v60 = vpop.permute.xlu0 %915  ;;  %v10282_v59 = vld [vmem:[#allocation5_spill] sm:$0xff] }
 0x175   :  { %10274 = vst [vmem:[#allocation253_spill] sm:$0xff] %v6243_v60  ;;  %1097 = vrot.lane.b32.xlu1 %v10182_v29, %s4395_s20  ;;  %v6268_v29 = vld [vmem:[%s9603_s0 + $0x338] sm:$0xff]  ;;  %v10281_v60 = vld [vmem:[#allocation6_spill] sm:$0xff] }
 0x176   :  { %1095 = vrot.lane.b32.xlu0 %v10186_v24, %s4395_s20  ;;  %10276 = vst [vmem:[#allocation255_spill] sm:$0xff] %v6268_v29 }
 0x177   :  { %v6249_v15 = vpop.permute.xlu1 %985 }
 0x178   :  { %v6251_v50 = vpop.permute.xlu0 %983 }
 0x179   :  { %1101 = vrot.lane.b32.xlu1 %v10189_v33, %s4395_s20  ;;  %v6275_v33 = vld [vmem:[%s9603_s0 + $0x330] sm:$0xff] }
 0x17a   :  { %1099 = vrot.lane.b32.xlu0 %v10193_v13, %s4395_s20 }
 0x17b   :  { %v6257_v20 = vpop.permute.xlu1 %989 }
 0x17c   :  { %10275 = vst [vmem:[#allocation254_spill] sm:$0xff] %v6257_v20  ;;  %v6259_v45 = vpop.permute.xlu0 %987  ;;  %v10338_v20 = vld [vmem:[#allocation35_spill] sm:$0xff] }
 0x17d   :  { %1105 = vrot.lane.b32.xlu1 %v5280_v17, %s4395_s20 }
 0x17e   :  { %1103 = vrot.lane.b32.xlu0 %v5292_v4, %s4395_s20 }
 0x17f   :  { %v6270_v24 = vpop.permute.xlu1 %993 }
 0x180   :  { %10277 = vst [vmem:[#allocation256_spill] sm:$0xff] %v6270_v24  ;;  %v6277_v13 = vpop.permute.xlu0 %991  ;;  %v10326_v24 = vld [vmem:[#allocation28_spill] sm:$0xff] }
 0x181   :  { %10278 = vst [vmem:[#allocation257_spill] sm:$0xff] %v6277_v13  ;;  %1109 = vrot.lane.b32.xlu1 %v6268_v29, %s4395_s20 }
 0x182   :  { %1107 = vrot.lane.b32.xlu0 %v6275_v33, %s4395_s20 }
 0x183   :  { %v6283_v4 = vpop.permute.xlu1 %997 }
 0x184   :  { %10279 = vst [vmem:[#allocation258_spill] sm:$0xff] %v6283_v4  ;;  %v6285_v17 = vpop.permute.xlu0 %995  ;;  %v10322_v4 = vld [vmem:[#allocation26_spill] sm:$0xff] }
 0x185   :  { %10280 = vst [vmem:[#allocation259_spill] sm:$0xff] %v6285_v17  ;;  %1177 = vrot.lane.b32.xlu1 %v10281_v60, %s4396_s23  ;;  %v10290_v60 = vld [vmem:[#allocation10_spill] sm:$0xff] }
 0x186   :  { %1175 = vrot.lane.b32.xlu0 %v10282_v59, %s4396_s23 }
 0x187   :  { %v6291_v32 = vpop.permute.xlu1 %1001 }
 0x188   :  { %10283 = vst [vmem:[#allocation6_spill] sm:$0xff] %v6291_v32  ;;  %v6293_v56 = vpop.permute.xlu0 %999  ;;  %v10318_v32 = vld [vmem:[#allocation24_spill] sm:$0xff] }
 0x189   :  { %10284 = vst [vmem:[#allocation5_spill] sm:$0xff] %v6293_v56  ;;  %1181 = vrot.lane.b32.xlu1 %v10285_v9, %s4396_s23 }
 0x18a   :  { %1179 = vrot.lane.b32.xlu0 %v10286_v37, %s4396_s23 }
 0x18b   :  { %v6299_v36 = vpop.permute.xlu1 %1005 }
 0x18c   :  { %10287 = vst [vmem:[#allocation7_spill] sm:$0xff] %v6299_v36  ;;  %v6301_v40 = vpop.permute.xlu0 %1003  ;;  %v10314_v36 = vld [vmem:[#allocation22_spill] sm:$0xff] }
 0x18d   :  { %10288 = vst [vmem:[#allocation8_spill] sm:$0xff] %v6301_v40  ;;  %1185 = vrot.lane.b32.xlu1 %v10289_v48, %s4396_s23 }
 0x18e   :  { %1183 = vrot.lane.b32.xlu0 %v10290_v60, %s4396_s23 }
 0x18f   :  { %v6307_v59 = vpop.permute.xlu1 %1009 }
 0x190   :  { %10291 = vst [vmem:[#allocation9_spill] sm:$0xff] %v6307_v59  ;;  %v6309_v7 = vpop.permute.xlu0 %1007  ;;  %v10310_v59 = vld [vmem:[#allocation20_spill] sm:$0xff] }
 0x191   :  { %10292 = vst [vmem:[#allocation10_spill] sm:$0xff] %v6309_v7  ;;  %1189 = vrot.lane.b32.xlu1 %v10293_v19, %s4396_s23 }
 0x192   :  { %1187 = vrot.lane.b32.xlu0 %v10294_v49, %s4396_s23 }
 0x193   :  { %v6315_v3 = vpop.permute.xlu1 %1013 }
 0x194   :  { %10295 = vst [vmem:[#allocation11_spill] sm:$0xff] %v6315_v3  ;;  %v6317_v8 = vpop.permute.xlu0 %1011  ;;  %v10306_v3 = vld [vmem:[#allocation18_spill] sm:$0xff] }
 0x195   :  { %10296 = vst [vmem:[#allocation12_spill] sm:$0xff] %v6317_v8  ;;  %1193 = vrot.lane.b32.xlu1 %v10297_v42, %s4396_s23 }
 0x196   :  { %1191 = vrot.lane.b32.xlu0 %v10298_v61, %s4396_s23 }
 0x197   :  { %v6323_v54 = vpop.permute.xlu1 %1017 }
 0x198   :  { %10299 = vst [vmem:[#allocation13_spill] sm:$0xff] %v6323_v54  ;;  %v6325_v46 = vpop.permute.xlu0 %1015 }
 0x199   :  { %10300 = vst [vmem:[#allocation14_spill] sm:$0xff] %v6325_v46  ;;  %1197 = vrot.lane.b32.xlu1 %v10301_v55, %s4396_s23  ;;  %v10309_v46 = vld [vmem:[#allocation19_spill] sm:$0xff] }
 0x19a   :  { %1195 = vrot.lane.b32.xlu0 %v10302_v47, %s4396_s23 }
 0x19b   :  { %v6331_v63 = vpop.permute.xlu1 %1021 }
 0x19c   :  { %10303 = vst [vmem:[#allocation15_spill] sm:$0xff] %v6331_v63  ;;  %v6333_v39 = vpop.permute.xlu0 %1019 }
 0x19d   :  { %10304 = vst [vmem:[#allocation16_spill] sm:$0xff] %v6333_v39  ;;  %1201 = vrot.lane.b32.xlu1 %v10305_v18, %s4396_s23  ;;  %v10313_v39 = vld [vmem:[#allocation21_spill] sm:$0xff] }
 0x19e   :  { %1199 = vrot.lane.b32.xlu0 %v10306_v3, %s4396_s23 }
 0x19f   :  { %v6339_v8 = vpop.permute.xlu1 %1025 }
 0x1a0   :  { %10307 = vst [vmem:[#allocation17_spill] sm:$0xff] %v6339_v8  ;;  %v6341_v54 = vpop.permute.xlu0 %1023 }
 0x1a1   :  { %10308 = vst [vmem:[#allocation18_spill] sm:$0xff] %v6341_v54  ;;  %1205 = vrot.lane.b32.xlu1 %v10309_v46, %s4396_s23  ;;  %v10317_v54 = vld [vmem:[#allocation23_spill] sm:$0xff] }
 0x1a2   :  { %1203 = vrot.lane.b32.xlu0 %v10310_v59, %s4396_s23 }
 0x1a3   :  { %v6347_v7 = vpop.permute.xlu1 %1029 }
 0x1a4   :  { %10311 = vst [vmem:[#allocation19_spill] sm:$0xff] %v6347_v7  ;;  %v6349_v63 = vpop.permute.xlu0 %1027 }
 0x1a5   :  { %10312 = vst [vmem:[#allocation20_spill] sm:$0xff] %v6349_v63  ;;  %1209 = vrot.lane.b32.xlu1 %v10313_v39, %s4396_s23  ;;  %v10321_v63 = vld [vmem:[#allocation25_spill] sm:$0xff] }
 0x1a6   :  { %1207 = vrot.lane.b32.xlu0 %v10314_v36, %s4396_s23 }
 0x1a7   :  { %v6355_v40 = vpop.permute.xlu1 %1033 }
 0x1a8   :  { %10315 = vst [vmem:[#allocation21_spill] sm:$0xff] %v6355_v40  ;;  %v6357_v8 = vpop.permute.xlu0 %1031 }
 0x1a9   :  { %10316 = vst [vmem:[#allocation22_spill] sm:$0xff] %v6357_v8  ;;  %1213 = vrot.lane.b32.xlu1 %v10317_v54, %s4396_s23  ;;  %v10325_v8 = vld [vmem:[#allocation27_spill] sm:$0xff] }
 0x1aa   :  { %1211 = vrot.lane.b32.xlu0 %v10318_v32, %s4396_s23 }
 0x1ab   :  { %v6363_v56 = vpop.permute.xlu1 %1037 }
 0x1ac   :  { %10319 = vst [vmem:[#allocation23_spill] sm:$0xff] %v6363_v56  ;;  %v6365_v7 = vpop.permute.xlu0 %1035 }
 0x1ad   :  { %10320 = vst [vmem:[#allocation24_spill] sm:$0xff] %v6365_v7  ;;  %1217 = vrot.lane.b32.xlu1 %v10321_v63, %s4396_s23  ;;  %v10329_v7 = vld [vmem:[#allocation29_spill] sm:$0xff]  ;;  %v10330_v63 = vld [vmem:[#allocation30_spill] sm:$0xff] }
 0x1ae   :  { %1215 = vrot.lane.b32.xlu0 %v10322_v4, %s4396_s23 }
 0x1af   :  { %v6371_v17 = vpop.permute.xlu1 %1041 }
 0x1b0   :  { %10323 = vst [vmem:[#allocation260_spill] sm:$0xff] %v6371_v17  ;;  %v6373_v40 = vpop.permute.xlu0 %1039  ;;  %v6392_v17 = vld [vmem:[%s9603_s0 + $0x190] sm:$0x3] }
 0x1b1   :  { %10324 = vst [vmem:[#allocation261_spill] sm:$0xff] %v6373_v40  ;;  %1221 = vrot.lane.b32.xlu1 %v10325_v8, %s4396_s23  ;;  %10332 = vst [vmem:[#allocation265_spill] sm:$0xff] %v6392_v17  ;;  %v10334_v8 = vld [vmem:[#allocation31_spill] sm:$0xff] }
 0x1b2   :  { %1219 = vrot.lane.b32.xlu0 %v10326_v24, %s4396_s23 }
 0x1b3   :  { %v6379_v13 = vpop.permute.xlu1 %1045 }
 0x1b4   :  { %10327 = vst [vmem:[#allocation262_spill] sm:$0xff] %v6379_v13  ;;  %v6381_v56 = vpop.permute.xlu0 %1043  ;;  %v554_v13 = vrot.slane %v6122_v16, 1 }
 0x1b5   :  { %10328 = vst [vmem:[#allocation263_spill] sm:$0xff] %v6381_v56  ;;  %1225 = vrot.lane.b32.xlu1 %v10329_v7, %s4396_s23  ;;  %v10335_v56 = vld [vmem:[#allocation32_spill] sm:$0xff]  ;;  %v556_v7 = vrot.slane %v6392_v17, 1 }
 0x1b6   :  { %1223 = vrot.lane.b32.xlu0 %v10330_v63, %s4396_s23  ;;  %v553_v63 = vrot.slane %v6129_v62, 1 }
 0x1b7   :  { %v6387_v4 = vpop.permute.xlu1 %1049 }
 0x1b8   :  { %10331 = vst [vmem:[#allocation264_spill] sm:$0xff] %v6387_v4  ;;  %v6394_v40 = vpop.permute.xlu0 %1047 }
 0x1b9   :  { %10333 = vst [vmem:[#allocation266_spill] sm:$0xff] %v6394_v40  ;;  %1229 = vrot.lane.b32.xlu1 %v10334_v8, %s4396_s23  ;;  %v10339_v40 = vld [vmem:[#allocation36_spill] sm:$0xff]  ;;  %v6412_v8 = vsel %vm225_vm0, %v554_v13, %v556_v7  ;;  %v10345_v7 = vld [vmem:[#allocation43_spill] sm:$0xff] }
 0x1ba   :  { %1227 = vrot.lane.b32.xlu0 %v10335_v56, %s4396_s23  ;;  %10340 = vst [vmem:[#allocation35_spill] sm:$0xff] %v6412_v8  ;;  %v6417_v56 = vsel %vm225_vm0, %v553_v63, %v554_v13 }
 0x1bb   :  { %v6403_v4 = vpop.permute.xlu1 %1053 }
 0x1bc   :  { %10336 = vst [vmem:[#allocation267_spill] sm:$0xff] %v6403_v4  ;;  %v6405_v24 = vpop.permute.xlu0 %1051 }
 0x1bd   :  { %10337 = vst [vmem:[#allocation268_spill] sm:$0xff] %v6405_v24  ;;  %1233 = vrot.lane.b32.xlu1 %v10338_v20, %s4396_s23  ;;  %v10350_v24 = vld [vmem:[#allocation49_spill] sm:$0xff] }
 0x1be   :  { %1231 = vrot.lane.b32.xlu0 %v10339_v40, %s4396_s23 }
 0x1bf   :  { %v6414_v16 = vpop.permute.xlu1 %1057 }
 0x1c0   :  { %10341 = vst [vmem:[#allocation36_spill] sm:$0xff] %v6414_v16  ;;  %v6419_v17 = vpop.permute.xlu0 %1055  ;;  %v10346_v16 = vld [vmem:[#allocation44_spill] sm:$0xff] }
 0x1c1   :  { %10342 = vst [vmem:[#allocation269_spill] sm:$0xff] %v6419_v17  ;;  %1237 = vrot.lane.b32.xlu1 %v6412_v8, %s4396_s23  ;;  %v10349_v17 = vld [vmem:[#allocation48_spill] sm:$0xff] }
 0x1c2   :  { %1235 = vrot.lane.b32.xlu0 %v6417_v56, %s4396_s23 }
 0x1c3   :  { %v6425_v62 = vpop.permute.xlu1 %1061 }
 0x1c4   :  { %10343 = vst [vmem:[#allocation270_spill] sm:$0xff] %v6425_v62  ;;  %v6427_v4 = vpop.permute.xlu0 %1059 }
 0x1c5   :  { %10344 = vst [vmem:[#allocation271_spill] sm:$0xff] %v6427_v4  ;;  %1241 = vrot.lane.b32.xlu1 %v10345_v7, %s4396_s23  ;;  %v10353_v4 = vld [vmem:[#allocation53_spill] sm:$0xff]  ;;  %v10354_v7 = vld [vmem:[#allocation54_spill] sm:$0xff] }
 0x1c6   :  { %1239 = vrot.lane.b32.xlu0 %v10346_v16, %s4396_s23 }
 0x1c7   :  { %v6433_v63 = vpop.permute.xlu1 %1065 }
 0x1c8   :  { %10347 = vst [vmem:[#allocation43_spill] sm:$0xff] %v6433_v63  ;;  %v6435_v13 = vpop.permute.xlu0 %1063 }
 0x1c9   :  { %10348 = vst [vmem:[#allocation44_spill] sm:$0xff] %v6435_v13  ;;  %1245 = vrot.lane.b32.xlu1 %v10349_v17, %s4396_s23  ;;  %v10357_v13 = vld [vmem:[#allocation58_spill] sm:$0xff]  ;;  %v10358_v17 = vld [vmem:[#allocation59_spill] sm:$0xff] }
 0x1ca   :  { %1243 = vrot.lane.b32.xlu0 %v10350_v24, %s4396_s23 }
 0x1cb   :  { %v6441_v8 = vpop.permute.xlu1 %1069 }
 0x1cc   :  { %10351 = vst [vmem:[#allocation272_spill] sm:$0xff] %v6441_v8  ;;  %v6443_v62 = vpop.permute.xlu0 %1067 }
 0x1cd   :  { %10352 = vst [vmem:[#allocation273_spill] sm:$0xff] %v6443_v62  ;;  %1249 = vrot.lane.b32.xlu1 %v10353_v4, %s4396_s23  ;;  %v10361_v62 = vld [vmem:[#allocation63_spill] sm:$0xff]  ;;  %v10362_v4 = vld [vmem:[#allocation64_spill] sm:$0xff] }
 0x1ce   :  { %1247 = vrot.lane.b32.xlu0 %v10354_v7, %s4396_s23 }
 0x1cf   :  { %v6449_v16 = vpop.permute.xlu1 %1073 }
 0x1d0   :  { %10355 = vst [vmem:[#allocation274_spill] sm:$0xff] %v6449_v16  ;;  %v6451_v63 = vpop.permute.xlu0 %1071 }
 0x1d1   :  { %10356 = vst [vmem:[#allocation275_spill] sm:$0xff] %v6451_v63  ;;  %1253 = vrot.lane.b32.xlu1 %v10357_v13, %s4396_s23  ;;  %v10365_v63 = vld [vmem:[#allocation68_spill] sm:$0xff]  ;;  %v10366_v13 = vld [vmem:[#allocation69_spill] sm:$0xff] }
 0x1d2   :  { %1251 = vrot.lane.b32.xlu0 %v10358_v17, %s4396_s23 }
 0x1d3   :  { %v6457_v24 = vpop.permute.xlu1 %1077 }
 0x1d4   :  { %10359 = vst [vmem:[#allocation276_spill] sm:$0xff] %v6457_v24  ;;  %v6459_v8 = vpop.permute.xlu0 %1075 }
 0x1d5   :  { %10360 = vst [vmem:[#allocation277_spill] sm:$0xff] %v6459_v8  ;;  %1257 = vrot.lane.b32.xlu1 %v10361_v62, %s4396_s23  ;;  %v10369_v8 = vld [vmem:[#allocation73_spill] sm:$0xff]  ;;  %v10370_v62 = vld [vmem:[#allocation74_spill] sm:$0xff] }
 0x1d6   :  { %1255 = vrot.lane.b32.xlu0 %v10362_v4, %s4396_s23 }
 0x1d7   :  { %v6465_v7 = vpop.permute.xlu1 %1081 }
 0x1d8   :  { %10363 = vst [vmem:[#allocation278_spill] sm:$0xff] %v6465_v7  ;;  %v6467_v16 = vpop.permute.xlu0 %1079 }
 0x1d9   :  { %10364 = vst [vmem:[#allocation279_spill] sm:$0xff] %v6467_v16  ;;  %1261 = vrot.lane.b32.xlu1 %v10365_v63, %s4396_s23  ;;  %v10373_v16 = vld [vmem:[#allocation78_spill] sm:$0xff]  ;;  %v10374_v63 = vld [vmem:[#allocation79_spill] sm:$0xff] }
 0x1da   :  { %1259 = vrot.lane.b32.xlu0 %v10366_v13, %s4396_s23 }
 0x1db   :  { %v6473_v17 = vpop.permute.xlu1 %1085 }
 0x1dc   :  { %10367 = vst [vmem:[#allocation280_spill] sm:$0xff] %v6473_v17  ;;  %v6475_v24 = vpop.permute.xlu0 %1083 }
 0x1dd   :  { %10368 = vst [vmem:[#allocation281_spill] sm:$0xff] %v6475_v24  ;;  %1265 = vrot.lane.b32.xlu1 %v10369_v8, %s4396_s23  ;;  %v10377_v24 = vld [vmem:[#allocation83_spill] sm:$0xff]  ;;  %v10378_v8 = vld [vmem:[#allocation84_spill] sm:$0xff] }
 0x1de   :  { %1263 = vrot.lane.b32.xlu0 %v10370_v62, %s4396_s23 }
 0x1df   :  { %v6481_v4 = vpop.permute.xlu1 %1089 }
 0x1e0   :  { %10371 = vst [vmem:[#allocation282_spill] sm:$0xff] %v6481_v4  ;;  %v6483_v7 = vpop.permute.xlu0 %1087 }
 0x1e1   :  { %10372 = vst [vmem:[#allocation283_spill] sm:$0xff] %v6483_v7  ;;  %1269 = vrot.lane.b32.xlu1 %v10373_v16, %s4396_s23  ;;  %v10381_v7 = vld [vmem:[#allocation88_spill] sm:$0xff]  ;;  %v10382_v16 = vld [vmem:[#allocation89_spill] sm:$0xff] }
 0x1e2   :  { %1267 = vrot.lane.b32.xlu0 %v10374_v63, %s4396_s23 }
 0x1e3   :  { %v6489_v13 = vpop.permute.xlu1 %1093 }
 0x1e4   :  { %10375 = vst [vmem:[#allocation284_spill] sm:$0xff] %v6489_v13  ;;  %v6491_v17 = vpop.permute.xlu0 %1091 }
 0x1e5   :  { %10376 = vst [vmem:[#allocation285_spill] sm:$0xff] %v6491_v17  ;;  %1273 = vrot.lane.b32.xlu1 %v10377_v24, %s4396_s23  ;;  %v10385_v17 = vld [vmem:[#allocation93_spill] sm:$0xff]  ;;  %v10386_v24 = vld [vmem:[#allocation94_spill] sm:$0xff] }
 0x1e6   :  { %1271 = vrot.lane.b32.xlu0 %v10378_v8, %s4396_s23 }
 0x1e7   :  { %v6497_v62 = vpop.permute.xlu1 %1097 }
 0x1e8   :  { %10379 = vst [vmem:[#allocation286_spill] sm:$0xff] %v6497_v62  ;;  %v6499_v4 = vpop.permute.xlu0 %1095 }
 0x1e9   :  { %10380 = vst [vmem:[#allocation287_spill] sm:$0xff] %v6499_v4  ;;  %1277 = vrot.lane.b32.xlu1 %v10381_v7, %s4396_s23  ;;  %v10389_v4 = vld [vmem:[#allocation98_spill] sm:$0xff]  ;;  %v10390_v7 = vld [vmem:[#allocation99_spill] sm:$0xff] }
 0x1ea   :  { %1275 = vrot.lane.b32.xlu0 %v10382_v16, %s4396_s23 }
 0x1eb   :  { %v6505_v63 = vpop.permute.xlu1 %1101 }
 0x1ec   :  { %10383 = vst [vmem:[#allocation288_spill] sm:$0xff] %v6505_v63  ;;  %v6507_v13 = vpop.permute.xlu0 %1099 }
 0x1ed   :  { %10384 = vst [vmem:[#allocation289_spill] sm:$0xff] %v6507_v13  ;;  %1281 = vrot.lane.b32.xlu1 %v10385_v17, %s4396_s23  ;;  %v10393_v13 = vld [vmem:[#allocation103_spill] sm:$0xff]  ;;  %v10394_v17 = vld [vmem:[#allocation105_spill] sm:$0xff] }
 0x1ee   :  { %1279 = vrot.lane.b32.xlu0 %v10386_v24, %s4396_s23 }
 0x1ef   :  { %v6513_v8 = vpop.permute.xlu1 %1105 }
 0x1f0   :  { %10387 = vst [vmem:[#allocation290_spill] sm:$0xff] %v6513_v8  ;;  %v6515_v62 = vpop.permute.xlu0 %1103 }
 0x1f1   :  { %10388 = vst [vmem:[#allocation291_spill] sm:$0xff] %v6515_v62  ;;  %1285 = vrot.lane.b32.xlu1 %v10389_v4, %s4396_s23  ;;  %v2655_v62 = vld [vmem:[%s9604_s1] sm:$0xff] }
 0x1f2   :  { %1283 = vrot.lane.b32.xlu0 %v10390_v7, %s4396_s23 }
 0x1f3   :  { %v6521_v16 = vpop.permute.xlu1 %1109 }
 0x1f4   :  { %10391 = vst [vmem:[#allocation292_spill] sm:$0xff] %v6521_v16  ;;  %v6523_v63 = vpop.permute.xlu0 %1107 }
 0x1f5   :  { %10392 = vst [vmem:[#allocation293_spill] sm:$0xff] %v6523_v63  ;;  %1289 = vrot.lane.b32.xlu1 %v10393_v13, %s4396_s23  ;;  %v2656_v63 = vld [vmem:[%s9604_s1 + $0x8] sm:$0xff]  ;;  %v9896_v13 = vrot.slane %v6268_v29, 1 }
 0x1f6   :  { %1287 = vrot.lane.b32.xlu0 %v10394_v17, %s4396_s23  ;;  %v4245_v16 = vpack.c.bf16 %v2656_v63, %v2655_v62  ;;  %v558_v17 = vrot.slane %v6275_v33, 1  ;;  %v2658_v62 = vld [vmem:[%s9604_s1 + $0x18] sm:$0xff] }
 0x1f7   :  { %v6529_v24 = vpop.permute.xlu1 %1177 }
 0x1f8   :  { %v6531_v8 = vpop.permute.xlu0 %1175  ;;  %4246 = vmatprep.subr.bf16.mxu0 %v4245_v16  ;;  %4253 = vmatprep.subr.bf16.mxu1 %v4245_v16 }
 0x1f9   :  { %1293 = vrot.lane.b32.xlu1 %v5299_v52, %s4396_s23  ;;  %4248 = vmatpush3.bf16.msra.mxu0 %v4245_v16  ;;  %v2657_v52 = vld [vmem:[%s9604_s1 + $0x10] sm:$0xff] }
 0x1fa   :  { %1291 = vrot.lane.b32.xlu0 %v5306_v27, %s4396_s23  ;;  %v4249_v33 = vpack.c.bf16 %v2658_v62, %v2657_v52  ;;  %4256 = vmatpush3.bf16.msra.mxu1 %v4245_v16  ;;  %v2659_v52 = vld [vmem:[%s9604_s1 + $0x20] sm:$0xf]  ;;  %s4399_s1 = smov 28  }
 0x1fb   :  { %v6545_v4 = vpop.permute.xlu1 %1181 }
 0x1fc   :  { %v6547_v7 = vpop.permute.xlu0 %1179  ;;  %4250 = vmatprep.subr.bf16.mxu0 %v4249_v33  ;;  %4254 = vmatprep.subr.bf16.mxu1 %v4249_v33 }
 0x1fd   :  { %1297 = vrot.lane.b32.xlu1 %v5316_v28, %s4396_s23  ;;  %v6564_v28 = vsel %vm225_vm0, %v558_v17, %v9896_v13  ;;  %4252 = vmatpush3.bf16.msra.mxu0 %v4249_v33 }
 0x1fe   :  { %1295 = vrot.lane.b32.xlu0 %v5323_v25, %s4396_s23  ;;  %10395 = vst [vmem:[#allocation294_spill] sm:$0xff] %v6564_v28  ;;  %4257 = vmatpush3.bf16.msra.mxu1 %v4249_v33 }
 0x1ff   :  { %v6559_v63 = vpop.permute.xlu1 %1185  ;;  %4147 = vmatprep.subr.msk.mxu0 %vm2860_vm2, %v2659_v52  ;;  %4255 = vmatprep.subr.msk.mxu1 %vm2860_vm2, %v2659_v52 }
 0x200   :  { %v6566_v27 = vpop.permute.xlu0 %1183 }
 0x201   :  { %1367 = vrot.lane.b32.xlu1 %v5351_v12, %s4397_s8  ;;  %4148 = vmatpush3.msk.msra.mxu0 %vm2860_vm2, %v2659_v52 }
 0x202   :  { %1299 = vrot.lane.b32.xlu0 %v6564_v28, %s4396_s23  ;;  %4258 = vmatpush3.msk.msra.mxu1 %vm2860_vm2, %v2659_v52 }
 0x203   :  { %v6575_v17 = vpop.permute.xlu1 %1189 }
 0x204   :  { %v6577_v16 = vpop.permute.xlu0 %1187 }
 0x205   :  { %1559 = vrot.lane.b32.xlu1 %v5893_v34, %s4398_s12 }
 0x206   :  { %1369 = vrot.lane.b32.xlu0 %v5344_v57, %s4397_s8 }
 0x207   :  { %v6583_v12 = vpop.permute.xlu1 %1193 }
 0x208   :  { %v6585_v62 = vpop.permute.xlu0 %1191 }
 0x209   :  { %1751 = vrot.lane.b32.xlu1 %v10286_v37, %s4399_s1 }
 0x20a   :  { %1561 = vrot.lane.b32.xlu0 %v5886_v21, %s4398_s12 }
 0x20b   :  { %v6591_v33 = vpop.permute.xlu1 %1197 }
 0x20c   :  { %v6593_v13 = vpop.permute.xlu0 %1195 }
 0x20d   :  { %1943 = vrot.lane.b32.xlu1 %v5368_v10, %s4400_s13 }
 0x20e   :  { %1753 = vrot.lane.b32.xlu0 %v10285_v9, %s4399_s1 }
 0x20f   :  { %v6599_v57 = vpop.permute.xlu1 %1201 }
 0x210   :  { %v6601_v52 = vpop.permute.xlu0 %1199 }
 0x211   :  { %1945 = vrot.lane.b32.xlu1 %v5361_v5, %s4400_s13 }
 0x212   :  { %1371 = vrot.lane.b32.xlu0 %v5368_v10, %s4397_s8 }
 0x213   :  { %v6607_v37 = vpop.permute.xlu1 %1205 }
 0x214   :  { %v6609_v29 = vpop.permute.xlu0 %1203 }
 0x215   :  { %1563 = vrot.lane.b32.xlu1 %v5911_v26, %s4398_s12 }
 0x216   :  { %1373 = vrot.lane.b32.xlu0 %v5361_v5, %s4397_s8 }
 0x217   :  { %v6615_v9 = vpop.permute.xlu1 %1209 }
 0x218   :  { %v6617_v28 = vpop.permute.xlu0 %1207 }
 0x219   :  { %1755 = vrot.lane.b32.xlu1 %v10290_v60, %s4399_s1 }
 0x21a   :  { %1565 = vrot.lane.b32.xlu0 %v5904_v44, %s4398_s12 }
 0x21b   :  { %v6623_v10 = vpop.permute.xlu1 %1213 }
 0x21c   :  { %v6625_v25 = vpop.permute.xlu0 %1211 }
 0x21d   :  { %1947 = vrot.lane.b32.xlu1 %v5385_v1, %s4400_s13 }
 0x21e   :  { %1757 = vrot.lane.b32.xlu0 %v10289_v48, %s4399_s1 }
 0x21f   :  { %v6631_v5 = vpop.permute.xlu1 %1217 }
 0x220   :  { %10396 = vst [vmem:[#allocation295_spill] sm:$0xff] %v6631_v5  ;;  %v6633_v26 = vpop.permute.xlu0 %1215 }
 0x221   :  { %1949 = vrot.lane.b32.xlu1 %v5378_v2, %s4400_s13 }
 0x222   :  { %1375 = vrot.lane.b32.xlu0 %v5385_v1, %s4397_s8 }
 0x223   :  { %v6639_v44 = vpop.permute.xlu1 %1221 }
 0x224   :  { %10397 = vst [vmem:[#allocation296_spill] sm:$0xff] %v6639_v44  ;;  %v6641_v60 = vpop.permute.xlu0 %1219 }
 0x225   :  { %1567 = vrot.lane.b32.xlu1 %v5929_v6, %s4398_s12 }
 0x226   :  { %1377 = vrot.lane.b32.xlu0 %v5378_v2, %s4397_s8 }
 0x227   :  { %v6647_v48 = vpop.permute.xlu1 %1225 }
 0x228   :  { %v6649_v5 = vpop.permute.xlu0 %1223 }
 0x229   :  { %1759 = vrot.lane.b32.xlu1 %v10294_v49, %s4399_s1 }
 0x22a   :  { %1569 = vrot.lane.b32.xlu0 %v5922_v0, %s4398_s12 }
 0x22b   :  { %v6655_v1 = vpop.permute.xlu1 %1229 }
 0x22c   :  { %v6657_v44 = vpop.permute.xlu0 %1227 }
 0x22d   :  { %1951 = vrot.lane.b32.xlu1 %v5402_v11, %s4400_s13 }
 0x22e   :  { %1761 = vrot.lane.b32.xlu0 %v10293_v19, %s4399_s1 }
 0x22f   :  { %v6663_v2 = vpop.permute.xlu1 %1233 }
 0x230   :  { %10398 = vst [vmem:[#allocation297_spill] sm:$0xff] %v6663_v2  ;;  %v6665_v6 = vpop.permute.xlu0 %1231 }
 0x231   :  { %1953 = vrot.lane.b32.xlu1 %v5395_v14, %s4400_s13 }
 0x232   :  { %1379 = vrot.lane.b32.xlu0 %v5402_v11, %s4397_s8 }
 0x233   :  { %v6671_v0 = vpop.permute.xlu1 %1237 }
 0x234   :  { %10399 = vst [vmem:[#allocation298_spill] sm:$0xff] %v6671_v0  ;;  %v6673_v49 = vpop.permute.xlu0 %1235 }
 0x235   :  { %1571 = vrot.lane.b32.xlu1 %v5947_v53, %s4398_s12 }
 0x236   :  { %1381 = vrot.lane.b32.xlu0 %v5395_v14, %s4397_s8 }
 0x237   :  { %v6679_v19 = vpop.permute.xlu1 %1241 }
 0x238   :  { %v6681_v2 = vpop.permute.xlu0 %1239 }
 0x239   :  { %1763 = vrot.lane.b32.xlu1 %v10298_v61, %s4399_s1 }
 0x23a   :  { %1573 = vrot.lane.b32.xlu0 %v5940_v51, %s4398_s12 }
 0x23b   :  { %v6687_v11 = vpop.permute.xlu1 %1245 }
 0x23c   :  { %v6689_v0 = vpop.permute.xlu0 %1243 }
 0x23d   :  { %1955 = vrot.lane.b32.xlu1 %v5419_v22, %s4400_s13 }
 0x23e   :  { %1765 = vrot.lane.b32.xlu0 %v10297_v42, %s4399_s1 }
 0x23f   :  { %v6695_v14 = vpop.permute.xlu1 %1249 }
 0x240   :  { %10400 = vst [vmem:[#allocation299_spill] sm:$0xff] %v6695_v14  ;;  %v6697_v53 = vpop.permute.xlu0 %1247 }
 0x241   :  { %1957 = vrot.lane.b32.xlu1 %v5412_v23, %s4400_s13 }
 0x242   :  { %1383 = vrot.lane.b32.xlu0 %v5419_v22, %s4397_s8 }
 0x243   :  { %v6703_v51 = vpop.permute.xlu1 %1253 }
 0x244   :  { %10401 = vst [vmem:[#allocation300_spill] sm:$0xff] %v6703_v51  ;;  %v6705_v61 = vpop.permute.xlu0 %1251 }
 0x245   :  { %1575 = vrot.lane.b32.xlu1 %v5965_v58, %s4398_s12 }
 0x246   :  { %1385 = vrot.lane.b32.xlu0 %v5412_v23, %s4397_s8 }
 0x247   :  { %v6711_v42 = vpop.permute.xlu1 %1257 }
 0x248   :  { %v6713_v14 = vpop.permute.xlu0 %1255 }
 0x249   :  { %1767 = vrot.lane.b32.xlu1 %v10302_v47, %s4399_s1 }
 0x24a   :  { %1577 = vrot.lane.b32.xlu0 %v5958_v35, %s4398_s12 }
 0x24b   :  { %v6719_v22 = vpop.permute.xlu1 %1261 }
 0x24c   :  { %v6721_v51 = vpop.permute.xlu0 %1259 }
 0x24d   :  { %1959 = vrot.lane.b32.xlu1 %v5436_v30, %s4400_s13 }
 0x24e   :  { %1769 = vrot.lane.b32.xlu0 %v10301_v55, %s4399_s1 }
 0x24f   :  { %v6727_v23 = vpop.permute.xlu1 %1265 }
 0x250   :  { %10402 = vst [vmem:[#allocation301_spill] sm:$0xff] %v6727_v23  ;;  %v6729_v58 = vpop.permute.xlu0 %1263 }
 0x251   :  { %1961 = vrot.lane.b32.xlu1 %v5429_v31, %s4400_s13 }
 0x252   :  { %1387 = vrot.lane.b32.xlu0 %v5436_v30, %s4397_s8 }
 0x253   :  { %v6735_v47 = vpop.permute.xlu1 %1269 }
 0x254   :  { %10403 = vst [vmem:[#allocation302_spill] sm:$0xff] %v6735_v47  ;;  %v6737_v35 = vpop.permute.xlu0 %1267 }
 0x255   :  { %10404 = vst [vmem:[#allocation303_spill] sm:$0xff] %v6737_v35  ;;  %1579 = vrot.lane.b32.xlu1 %v5983_v43, %s4398_s12 }
 0x256   :  { %1389 = vrot.lane.b32.xlu0 %v5429_v31, %s4397_s8 }
 0x257   :  { %v6743_v55 = vpop.permute.xlu1 %1273 }
 0x258   :  { %10405 = vst [vmem:[#allocation304_spill] sm:$0xff] %v6743_v55  ;;  %v6745_v23 = vpop.permute.xlu0 %1271  ;;  %v10411_v55 = vld [vmem:[#allocation129_spill] sm:$0xff] }
 0x259   :  { %10406 = vst [vmem:[#allocation305_spill] sm:$0xff] %v6745_v23  ;;  %1771 = vrot.lane.b32.xlu1 %v10306_v3, %s4399_s1 }
 0x25a   :  { %1581 = vrot.lane.b32.xlu0 %v5976_v41, %s4398_s12 }
 0x25b   :  { %v6751_v30 = vpop.permute.xlu1 %1277 }
 0x25c   :  { %10407 = vst [vmem:[#allocation306_spill] sm:$0xff] %v6751_v30  ;;  %v6753_v47 = vpop.permute.xlu0 %1275  ;;  %v10414_v30 = vld [vmem:[#allocation201_spill] sm:$0xff] }
 0x25d   :  { %10408 = vst [vmem:[#allocation307_spill] sm:$0xff] %v6753_v47  ;;  %1963 = vrot.lane.b32.xlu1 %v5453_v38, %s4400_s13 }
 0x25e   :  { %1773 = vrot.lane.b32.xlu0 %v10305_v18, %s4399_s1 }
 0x25f   :  { %v6759_v31 = vpop.permute.xlu1 %1281 }
 0x260   :  { %10409 = vst [vmem:[#allocation308_spill] sm:$0xff] %v6759_v31  ;;  %v6761_v43 = vpop.permute.xlu0 %1279 }
 0x261   :  { %10410 = vst [vmem:[#allocation309_spill] sm:$0xff] %v6761_v43  ;;  %1965 = vrot.lane.b32.xlu1 %v10411_v55, %s4400_s13  ;;  %v10417_v43 = vld [vmem:[#allocation200_spill] sm:$0xff] }
 0x262   :  { %1391 = vrot.lane.b32.xlu0 %v5453_v38, %s4397_s8 }
 0x263   :  { %v6767_v41 = vpop.permute.xlu1 %1285 }
 0x264   :  { %10412 = vst [vmem:[#allocation129_spill] sm:$0xff] %v6767_v41  ;;  %v6769_v3 = vpop.permute.xlu0 %1283 }
 0x265   :  { %10413 = vst [vmem:[#allocation310_spill] sm:$0xff] %v6769_v3  ;;  %1583 = vrot.lane.b32.xlu1 %v10414_v30, %s4398_s12  ;;  %v10420_v3 = vld [vmem:[#allocation134_spill] sm:$0xff] }
 0x266   :  { %1393 = vrot.lane.b32.xlu0 %v10411_v55, %s4397_s8 }
 0x267   :  { %v6775_v18 = vpop.permute.xlu1 %1289 }
 0x268   :  { %10415 = vst [vmem:[#allocation201_spill] sm:$0xff] %v6775_v18  ;;  %v6777_v31 = vpop.permute.xlu0 %1287  ;;  %v10423_v18 = vld [vmem:[#allocation132_spill] sm:$0xff] }
 0x269   :  { %10416 = vst [vmem:[#allocation311_spill] sm:$0xff] %v6777_v31  ;;  %1775 = vrot.lane.b32.xlu1 %v10310_v59, %s4399_s1 }
 0x26a   :  { %1585 = vrot.lane.b32.xlu0 %v10417_v43, %s4398_s12 }
 0x26b   :  { %v6783_v38 = vpop.permute.xlu1 %1293 }
 0x26c   :  { %10418 = vst [vmem:[#allocation200_spill] sm:$0xff] %v6783_v38  ;;  %v6785_v41 = vpop.permute.xlu0 %1291  ;;  %v10425_v38 = vld [vmem:[#allocation205_spill] sm:$0xff] }
 0x26d   :  { %10419 = vst [vmem:[#allocation312_spill] sm:$0xff] %v6785_v41  ;;  %1967 = vrot.lane.b32.xlu1 %v10420_v3, %s4400_s13  ;;  %v10426_v41 = vld [vmem:[#allocation106_spill] sm:$0xff] }
 0x26e   :  { %1777 = vrot.lane.b32.xlu0 %v10309_v46, %s4399_s1 }
 0x26f   :  { %v6791_v55 = vpop.permute.xlu1 %1297 }
 0x270   :  { %10421 = vst [vmem:[#allocation134_spill] sm:$0xff] %v6791_v55  ;;  %v6793_v30 = vpop.permute.xlu0 %1295 }
 0x271   :  { %10422 = vst [vmem:[#allocation313_spill] sm:$0xff] %v6793_v30  ;;  %1969 = vrot.lane.b32.xlu1 %v10423_v18, %s4400_s13  ;;  %v4305_v30 = vld [vmem:[%s9603_s0] sm:$0xff] }
 0x272   :  { %1395 = vrot.lane.b32.xlu0 %v10420_v3, %s4397_s8  ;;  %v2136_v3 = vsel %vm2135_vm3, %v4305_v30, %v10426_v41  ;;  %v10429_v30 = vld [vmem:[#allocation110_spill] sm:$0xff] }
 0x273   :  { %v1368_v59 = vpop.permute.xlu1 %1367 }
 0x274   :  { %v6799_v43 = vpop.permute.xlu0 %1299 }
 0x275   :  { %10424 = vst [vmem:[#allocation132_spill] sm:$0xff] %v6799_v43  ;;  %1587 = vrot.lane.b32.xlu1 %v10425_v38, %s4398_s12  ;;  %v10427_v38 = vld [vmem:[#allocation102_spill] sm:$0xff] }
 0x276   :  { %1397 = vrot.lane.b32.xlu0 %v10423_v18, %s4397_s8  ;;  %v2201_v43 = vsel %vm2200_vm4, %v2136_v3, %v10427_v38  ;;  %v10428_v18 = vld [vmem:[#allocation204_spill] sm:$0xff] }
 0x277   :  { %v1560_v46 = vpop.permute.xlu1 %1559  ;;  %v2266_v31 = vsel %vm2265_vm5, %v2201_v43, %v6251_v50  ;;  %v10431_v50 = vld [vmem:[#allocation100_spill] sm:$0xff] }
 0x278   :  { %v1370_v55 = vpop.permute.xlu0 %1369  ;;  %v2331_v23 = vsel %vm2330_vm6, %v2266_v31, %v6531_v8 }
 0x279   :  { %1779 = vrot.lane.b32.xlu1 %v10314_v36, %s4399_s1  ;;  %v4306_v36 = vld [vmem:[%s9603_s0 + $0x8] sm:$0xff]  ;;  %v2396_v38 = vsel %vm2395_vm7, %v2331_v23, %v1368_v59 }
 0x27a   :  { %1589 = vrot.lane.b32.xlu0 %v10428_v18, %s4398_s12  ;;  %v2137_v3 = vsel %vm2135_vm3, %v4306_v36, %v10429_v30  ;;  %v10430_v18 = vld [vmem:[#allocation138_spill] sm:$0xff]  ;;  %v2461_v8 = vsel %vm2460_vm8, %v2396_v38, %v1560_v46  ;;  %v10432_v46 = vld [vmem:[#allocation136_spill] sm:$0xff] }
 0x27b   :  { %v1752_v47 = vpop.permute.xlu1 %1751  ;;  %v2202_v43 = vsel %vm2200_vm4, %v2137_v3, %v10431_v50  ;;  %v10433_v50 = vld [vmem:[#allocation209_spill] sm:$0xff] }
 0x27c   :  { %v1562_v41 = vpop.permute.xlu0 %1561  ;;  %v2267_v31 = vsel %vm2265_vm5, %v2202_v43, %v6249_v15  ;;  %v2526_v36 = vsel %vm2525_vm9, %v2461_v8, %v1752_v47  ;;  %v10435_v43 = vld [vmem:[#allocation185_spill] sm:$0xff] }
 0x27d   :  { %1971 = vrot.lane.b32.xlu1 %v10430_v18, %s4400_s13  ;;  %v2332_v23 = vsel %vm2330_vm6, %v2267_v31, %v6529_v24  ;;  %v10436_v8 = vld [vmem:[#allocation177_spill] sm:$0xff] }
 0x27e   :  { %1781 = vrot.lane.b32.xlu0 %v10313_v39, %s4399_s1  ;;  %v2397_v3 = vsel %vm2395_vm7, %v2332_v23, %v1370_v55 }
 0x27f   :  { %v1944_v30 = vpop.permute.xlu1 %1943  ;;  %v2462_v39 = vsel %vm2460_vm8, %v2397_v3, %v1562_v41  ;;  %v10434_v41 = vld [vmem:[#allocation104_spill] sm:$0xff] }
 0x280   :  { %v1754_v59 = vpop.permute.xlu0 %1753  ;;  %v2591_v35 = vsel %vm2590_vm10, %v2526_v36, %v1944_v30  ;;  %v10437_v36 = vld [vmem:[#allocation208_spill] sm:$0xff] }
 0x281   :  { %1973 = vrot.lane.b32.xlu1 %v10432_v46, %s4400_s13  ;;  %4149 = vmatprep.mubr.msk.f32.mxu0 %vm2667_vm11, %v2591_v35  ;;  %v2527_v15 = vsel %vm2525_vm9, %v2462_v39, %v1754_v59  ;;  %v10439_v39 = vld [vmem:[#allocation184_spill] sm:$0xff] }
 0x282   :  { %1399 = vrot.lane.b32.xlu0 %v10430_v18, %s4397_s8  ;;  %v2138_v18 = vsel %vm2135_vm3, %v10435_v43, %v10434_v41 }
 0x283   :  { %v1946_v47 = vpop.permute.xlu1 %1945  ;;  %v2203_v31 = vsel %vm2200_vm4, %v2138_v18, %v10436_v8 }
 0x284   :  { %v2592_v24 = vsel %vm2590_vm10, %v2527_v15, %v1946_v47  ;;  %v1372_v38 = vpop.permute.xlu0 %1371  ;;  %v2268_v30 = vsel %vm2265_vm5, %v2203_v31, %v6259_v45  ;;  %v10440_v47 = vld [vmem:[#allocation142_spill] sm:$0xff] }
 0x285   :  { %1591 = vrot.lane.b32.xlu1 %v10433_v50, %s4398_s12  ;;  %4150 = vmatmul.mubr.msk.f32.vlgmr.msra.gmra.mrb[0].mxu0 %vm2667_vm11, %v2592_v24  ;;  %v2333_v59 = vsel %vm2330_vm6, %v2268_v30, %v6547_v7  ;;  %v10441_v24 = vld [vmem:[#allocation175_spill] sm:$0xff]  ;;  %v10442_v45 = vld [vmem:[#allocation254_spill] sm:$0xff]  ;;  %v10443_v30 = vld [vmem:[#allocation140_spill] sm:$0xff] }
 0x286   :  { %1401 = vrot.lane.b32.xlu0 %v10432_v46, %s4397_s8  ;;  %v10438_v46 = vld [vmem:[#allocation108_spill] sm:$0xff] }
 0x287   :  { %v1564_v35 = vpop.permute.xlu1 %1563  ;;  %v2139_v15 = vsel %vm2135_vm3, %v10439_v39, %v10438_v46  ;;  %v10444_v46 = vld [vmem:[#allocation213_spill] sm:$0xff] }
 0x288   :  { %v1374_v55 = vpop.permute.xlu0 %1373  ;;  %v2204_v50 = vsel %vm2200_vm4, %v2139_v15, %v10441_v24 }
 0x289   :  { %1783 = vrot.lane.b32.xlu1 %v10318_v32, %s4399_s1  ;;  %v2398_v32 = vsel %vm2395_vm7, %v2333_v59, %v1372_v38  ;;  %v2269_v7 = vsel %vm2265_vm5, %v2204_v50, %v10442_v45  ;;  %v10448_v50 = vld [vmem:[#allocation212_spill] sm:$0xff] }
 0x28a   :  { %1593 = vrot.lane.b32.xlu0 %v10437_v36, %s4398_s12  ;;  %v2463_v41 = vsel %vm2460_vm8, %v2398_v32, %v1564_v35  ;;  %v2334_v38 = vsel %vm2330_vm6, %v2269_v7, %v6545_v4  ;;  %v10446_v32 = vld [vmem:[#allocation26_spill] sm:$0xff] }
 0x28b   :  { %v1756_v23 = vpop.permute.xlu1 %1755  ;;  %v2399_v36 = vsel %vm2395_vm7, %v2334_v38, %v1374_v55  ;;  %v10450_v38 = vld [vmem:[#allocation112_spill] sm:$0xff] }
 0x28c   :  { %v1566_v3 = vpop.permute.xlu0 %1565  ;;  %v2528_v43 = vsel %vm2525_vm9, %v2463_v41, %v1756_v23  ;;  %v10449_v41 = vld [vmem:[#allocation257_spill] sm:$0xff] }
 0x28d   :  { %1975 = vrot.lane.b32.xlu1 %v10440_v47, %s4400_s13 }
 0x28e   :  { %1785 = vrot.lane.b32.xlu0 %v10317_v54, %s4399_s1  ;;  %v2464_v54 = vsel %vm2460_vm8, %v2399_v36, %v1566_v3  ;;  %v10445_v3 = vld [vmem:[#allocation114_spill] sm:$0xff]  ;;  %v10452_v36 = vld [vmem:[#allocation179_spill] sm:$0xff] }
 0x28f   :  { %v1948_v18 = vpop.permute.xlu1 %1947  ;;  %v2140_v15 = vsel %vm2135_vm3, %v5893_v34, %v10445_v3  ;;  %v2141_v34 = vsel %vm2135_vm3, %v5886_v21, %v10450_v38  ;;  %v10458_v38 = vld [vmem:[#allocation28_spill] sm:$0xff] }
 0x290   :  { %v2593_v8 = vsel %vm2590_vm10, %v2528_v43, %v1948_v18  ;;  %v1758_v31 = vpop.permute.xlu0 %1757 }
 0x291   :  { %1977 = vrot.lane.b32.xlu1 %v10443_v30, %s4400_s13  ;;  %4152 = vmatprep.mubr.msk.f32.mxu0 %vm2667_vm11, %v2593_v8  ;;  %v2529_v35 = vsel %vm2525_vm9, %v2464_v54, %v1758_v31  ;;  %v10451_v31 = vld [vmem:[#allocation146_spill] sm:$0xff] }
 0x292   :  { %1403 = vrot.lane.b32.xlu0 %v10440_v47, %s4397_s8  ;;  %v10447_v47 = vld [vmem:[#allocation181_spill] sm:$0xff] }
 0x293   :  { %v1950_v23 = vpop.permute.xlu1 %1949  ;;  %v2205_v24 = vsel %vm2200_vm4, %v2140_v15, %v10447_v47 }
 0x294   :  { %v2594_v4 = vsel %vm2590_vm10, %v2529_v35, %v1950_v23  ;;  %v1376_v59 = vpop.permute.xlu0 %1375  ;;  %v2270_v45 = vsel %vm2265_vm5, %v2205_v24, %v10449_v41  ;;  %v10453_v35 = vld [vmem:[#allocation25_spill] sm:$0xff]  ;;  %v10454_v23 = vld [vmem:[#allocation256_spill] sm:$0xff] }
 0x295   :  { %1595 = vrot.lane.b32.xlu1 %v10444_v46, %s4398_s12  ;;  %4153 = vmatmul.mubr.msk.f32.gmra.mrb[2].mxu0 %vm2667_vm11, %v2594_v4  ;;  %v2335_v43 = vsel %vm2330_vm6, %v2270_v45, %v6566_v27  ;;  %v10456_v41 = vld [vmem:[#allocation217_spill] sm:$0xff] }
 0x296   :  { %1405 = vrot.lane.b32.xlu0 %v10443_v30, %s4397_s8  ;;  %v2400_v8 = vsel %vm2395_vm7, %v2335_v43, %v1376_v59  ;;  %v2206_v30 = vsel %vm2200_vm4, %v2141_v34, %v10452_v36  ;;  %v10457_v43 = vld [vmem:[#allocation116_spill] sm:$0xff]  ;;  %v10459_v34 = vld [vmem:[#allocation183_spill] sm:$0xff] }
 0x297   :  { %v1568_v55 = vpop.permute.xlu1 %1567  ;;  %v2271_v27 = vsel %vm2265_vm5, %v2206_v30, %v10454_v23  ;;  %v10461_v36 = vld [vmem:[#allocation259_spill] sm:$0xff] }
 0x298   :  { %v1378_v39 = vpop.permute.xlu0 %1377  ;;  %v2465_v54 = vsel %vm2460_vm8, %v2400_v8, %v1568_v55  ;;  %v2336_v21 = vsel %vm2330_vm6, %v2271_v27, %v6559_v63  ;;  %v4308_v27 = vld [vmem:[%s9603_s0 + $0x50] sm:$0xff] }
 0x299   :  { %1787 = vrot.lane.b32.xlu1 %v10446_v32, %s4399_s1  ;;  %v2401_v15 = vsel %vm2395_vm7, %v2336_v21, %v1378_v39  ;;  %v10455_v32 = vld [vmem:[#allocation144_spill] sm:$0xff] }
 0x29a   :  { %1597 = vrot.lane.b32.xlu0 %v10448_v50, %s4398_s12 }
 0x29b   :  { %v1760_v7 = vpop.permute.xlu1 %1759 }
 0x29c   :  { %v1570_v18 = vpop.permute.xlu0 %1569  ;;  %v2530_v4 = vsel %vm2525_vm9, %v2465_v54, %v1760_v7  ;;  %v4307_v7 = vld [vmem:[%s9603_s0 + $0x48] sm:$0xff] }
 0x29d   :  { %1979 = vrot.lane.b32.xlu1 %v10451_v31, %s4400_s13  ;;  %v2466_v55 = vsel %vm2460_vm8, %v2401_v15, %v1570_v18  ;;  %v2142_v18 = vsel %vm2135_vm3, %v4307_v7, %v10457_v43 }
 0x29e   :  { %1789 = vrot.lane.b32.xlu0 %v10453_v35, %s4399_s1  ;;  %v2207_v8 = vsel %vm2200_vm4, %v2142_v18, %v10459_v34  ;;  %v10467_v18 = vld [vmem:[#allocation148_spill] sm:$0xff] }
 0x29f   :  { %v1952_v46 = vpop.permute.xlu1 %1951  ;;  %v2272_v30 = vsel %vm2265_vm5, %v2207_v8, %v10461_v36 }
 0x2a0   :  { %v2595_v59 = vsel %vm2590_vm10, %v2530_v4, %v1952_v46  ;;  %v1762_v3 = vpop.permute.xlu0 %1761  ;;  %v2337_v35 = vsel %vm2330_vm6, %v2272_v30, %v6577_v16  ;;  %v10462_v4 = vld [vmem:[#allocation115_spill] sm:$0xff]  ;;  %v4309_v30 = vld [vmem:[%s9603_s0 + $0x60] sm:$0xff] }
 0x2a1   :  { %1981 = vrot.lane.b32.xlu1 %v10455_v32, %s4400_s13  ;;  %4155 = vmatprep.mubr.msk.f32.mxu0 %vm2667_vm11, %v2595_v59  ;;  %v2531_v47 = vsel %vm2525_vm9, %v2466_v55, %v1762_v3  ;;  %v2143_v46 = vsel %vm2135_vm3, %v4308_v27, %v10462_v4  ;;  %v10463_v59 = vld [vmem:[#allocation150_spill] sm:$0xff]  ;;  %v10465_v16 = vld [vmem:[#allocation27_spill] sm:$0xff] }
 0x2a2   :  { %1407 = vrot.lane.b32.xlu0 %v10451_v31, %s4397_s8  ;;  %v10460_v31 = vld [vmem:[#allocation216_spill] sm:$0xff]  ;;  %v10464_v3 = vld [vmem:[#allocation182_spill] sm:$0xff]  ;;  %v10471_v27 = vld [vmem:[#allocation187_spill] sm:$0xff] }
 0x2a3   :  { %v1954_v24 = vpop.permute.xlu1 %1953  ;;  %v2208_v15 = vsel %vm2200_vm4, %v2143_v46, %v10464_v3  ;;  %v10466_v55 = vld [vmem:[#allocation258_spill] sm:$0xff]  ;;  %v10472_v46 = vld [vmem:[#allocation220_spill] sm:$0xff] }
 0x2a4   :  { %v2596_v63 = vsel %vm2590_vm10, %v2531_v47, %v1954_v24  ;;  %v1380_v50 = vpop.permute.xlu0 %1379  ;;  %v2273_v47 = vsel %vm2265_vm5, %v2208_v15, %v10466_v55  ;;  %v10474_v55 = vld [vmem:[#allocation117_spill] sm:$0xff] }
 0x2a5   :  { %1599 = vrot.lane.b32.xlu1 %v10456_v41, %s4398_s12  ;;  %4156 = vmatmul.mubr.msk.f32.gmra.mrb[4].mxu0 %vm2667_vm11, %v2596_v63  ;;  %v2402_v21 = vsel %vm2395_vm7, %v2337_v35, %v1380_v50  ;;  %v2338_v50 = vsel %vm2330_vm6, %v2273_v47, %v6575_v17 }
 0x2a6   :  { %1409 = vrot.lane.b32.xlu0 %v10455_v32, %s4397_s8 }
 0x2a7   :  { %v1572_v39 = vpop.permute.xlu1 %1571 }
 0x2a8   :  { %v1382_v45 = vpop.permute.xlu0 %1381  ;;  %v2467_v32 = vsel %vm2460_vm8, %v2402_v21, %v1572_v39  ;;  %v10473_v21 = vld [vmem:[#allocation5_spill] sm:$0xff] }
 0x2a9   :  { %1791 = vrot.lane.b32.xlu1 %v10458_v38, %s4399_s1  ;;  %v2403_v43 = vsel %vm2395_vm7, %v2338_v50, %v1382_v45  ;;  %v10476_v50 = vld [vmem:[#allocation186_spill] sm:$0xff] }
 0x2aa   :  { %1601 = vrot.lane.b32.xlu0 %v10460_v31, %s4398_s12  ;;  %v10468_v31 = vld [vmem:[#allocation221_spill] sm:$0xff] }
 0x2ab   :  { %v1764_v54 = vpop.permute.xlu1 %1763 }
 0x2ac   :  { %v1574_v23 = vpop.permute.xlu0 %1573  ;;  %v2532_v24 = vsel %vm2525_vm9, %v2467_v32, %v1764_v54  ;;  %v10469_v54 = vld [vmem:[#allocation118_spill] sm:$0xff] }
 0x2ad   :  { %1983 = vrot.lane.b32.xlu1 %v10463_v59, %s4400_s13  ;;  %v2468_v39 = vsel %vm2460_vm8, %v2403_v43, %v1574_v23  ;;  %v2144_v35 = vsel %vm2135_vm3, %v4309_v30, %v10469_v54  ;;  %v10470_v23 = vld [vmem:[#allocation30_spill] sm:$0xff]  ;;  %v10479_v30 = vld [vmem:[#allocation152_spill] sm:$0xff] }
 0x2ae   :  { %1793 = vrot.lane.b32.xlu0 %v10465_v16, %s4399_s1  ;;  %v2209_v4 = vsel %vm2200_vm4, %v2144_v35, %v10471_v27  ;;  %v4310_v16 = vld [vmem:[%s9603_s0 + $0x68] sm:$0xff] }
 0x2af   :  { %v1956_v63 = vpop.permute.xlu1 %1955  ;;  %v2145_v47 = vsel %vm2135_vm3, %v4310_v16, %v10474_v55  ;;  %v10478_v43 = vld [vmem:[#allocation6_spill] sm:$0xff]  ;;  %v7054_v16 = vld [vmem:[%s9603_s0 + $0x158] sm:$0xff] }
 0x2b0   :  { %v2597_v41 = vsel %vm2590_vm10, %v2532_v24, %v1956_v63  ;;  %v1766_v7 = vpop.permute.xlu0 %1765  ;;  %v10475_v63 = vld [vmem:[#allocation154_spill] sm:$0xff]  ;;  %v10483_v55 = vld [vmem:[#allocation8_spill] sm:$0xff] }
 0x2b1   :  { %1985 = vrot.lane.b32.xlu1 %v10467_v18, %s4400_s13  ;;  %4158 = vmatprep.mubr.msk.f32.mxu0 %vm2667_vm11, %v2597_v41  ;;  %v2533_v38 = vsel %vm2525_vm9, %v2468_v39, %v1766_v7  ;;  %v2210_v41 = vsel %vm2200_vm4, %v2145_v47, %v10476_v50 }
 0x2b2   :  { %1411 = vrot.lane.b32.xlu0 %v10463_v59, %s4397_s8  ;;  %v2274_v59 = vsel %vm2265_vm5, %v2209_v4, %v10473_v21  ;;  %v10480_v21 = vld [vmem:[#allocation120_spill] sm:$0xff] }
 0x2b3   :  { %v1958_v34 = vpop.permute.xlu1 %1957  ;;  %v2339_v15 = vsel %vm2330_vm6, %v2274_v59, %v6585_v62  ;;  %v10477_v62 = vld [vmem:[#allocation29_spill] sm:$0xff] }
 0x2b4   :  { %v2598_v17 = vsel %vm2590_vm10, %v2533_v38, %v1958_v34  ;;  %v1384_v8 = vpop.permute.xlu0 %1383 }
 0x2b5   :  { %1603 = vrot.lane.b32.xlu1 %v10468_v31, %s4398_s12  ;;  %4159 = vmatmul.mubr.msk.f32.gmra.mrb[6].mxu0 %vm2667_vm11, %v2598_v17  ;;  %v2404_v24 = vsel %vm2395_vm7, %v2339_v15, %v1384_v8  ;;  %v10482_v15 = vld [vmem:[#allocation189_spill] sm:$0xff] }
 0x2b6   :  { %1413 = vrot.lane.b32.xlu0 %v10467_v18, %s4397_s8  ;;  %v2275_v18 = vsel %vm2265_vm5, %v2210_v41, %v10478_v43  ;;  %v4314_v41 = vld [vmem:[%s9603_s0 + $0x80] sm:$0xff] }
 0x2b7   :  { %v1576_v45 = vpop.permute.xlu1 %1575  ;;  %v2340_v34 = vsel %vm2330_vm6, %v2275_v18, %v6583_v12  ;;  %v10485_v18 = vld [vmem:[#allocation158_spill] sm:$0xff] }
 0x2b8   :  { %v1386_v36 = vpop.permute.xlu0 %1385  ;;  %v2469_v7 = vsel %vm2460_vm8, %v2404_v24, %v1576_v45 }
 0x2b9   :  { %1795 = vrot.lane.b32.xlu1 %v10470_v23, %s4399_s1  ;;  %v2405_v31 = vsel %vm2395_vm7, %v2340_v34, %v1386_v36  ;;  %v7035_v36 = vld [vmem:[%s9603_s0 + $0x150] sm:$0xff] }
 0x2ba   :  { %1605 = vrot.lane.b32.xlu0 %v10472_v46, %s4398_s12  ;;  %v4312_v46 = vld [vmem:[%s9603_s0 + $0x78] sm:$0xff] }
 0x2bb   :  { %v1768_v3 = vpop.permute.xlu1 %1767  ;;  %v2146_v59 = vsel %vm2135_vm3, %v4312_v46, %v10480_v21 }
 0x2bc   :  { %v1578_v32 = vpop.permute.xlu0 %1577  ;;  %v2534_v39 = vsel %vm2525_vm9, %v2469_v7, %v1768_v3  ;;  %v10481_v3 = vld [vmem:[#allocation32_spill] sm:$0xff]  ;;  %v10484_v7 = vld [vmem:[#allocation119_spill] sm:$0xff] }
 0x2bd   :  { %1987 = vrot.lane.b32.xlu1 %v10475_v63, %s4400_s13  ;;  %v2470_v45 = vsel %vm2460_vm8, %v2405_v31, %v1578_v32  ;;  %v2211_v32 = vsel %vm2200_vm4, %v2146_v59, %v10482_v15 }
 0x2be   :  { %1797 = vrot.lane.b32.xlu0 %v10477_v62, %s4399_s1  ;;  %v2276_v47 = vsel %vm2265_vm5, %v2211_v32, %v10483_v55  ;;  %v2147_v62 = vsel %vm2135_vm3, %v4314_v41, %v10484_v7  ;;  %v4316_v32 = vld [vmem:[%s9603_s0 + $0x90] sm:$0xff]  ;;  %v10490_v55 = vld [vmem:[#allocation122_spill] sm:$0xff] }
 0x2bf   :  { %v1960_v38 = vpop.permute.xlu1 %1959  ;;  %v10492_v41 = vld [vmem:[#allocation10_spill] sm:$0xff] }
 0x2c0   :  { %v2599_v17 = vsel %vm2590_vm10, %v2534_v39, %v1960_v38  ;;  %v1770_v8 = vpop.permute.xlu0 %1769  ;;  %v10486_v39 = vld [vmem:[#allocation188_spill] sm:$0xff] }
 0x2c1   :  { %1989 = vrot.lane.b32.xlu1 %v10479_v30, %s4400_s13  ;;  %4161 = vmatprep.mubr.msk.f32.mxu0 %vm2667_vm11, %v2599_v17  ;;  %v2535_v54 = vsel %vm2525_vm9, %v2470_v45, %v1770_v8  ;;  %v2212_v38 = vsel %vm2200_vm4, %v2147_v62, %v10486_v39  ;;  %v10488_v17 = vld [vmem:[#allocation7_spill] sm:$0xff]  ;;  %v10493_v39 = vld [vmem:[#allocation121_spill] sm:$0xff] }
 0x2c2   :  { %1415 = vrot.lane.b32.xlu0 %v10475_v63, %s4397_s8  ;;  %v2341_v63 = vsel %vm2330_vm6, %v2276_v47, %v6593_v13  ;;  %v10487_v13 = vld [vmem:[#allocation31_spill] sm:$0xff]  ;;  %v2277_v8 = vsel %vm2265_vm5, %v2212_v38, %v10488_v17  ;;  %v2148_v47 = vsel %vm2135_vm3, %v4316_v32, %v10490_v55  ;;  %v10495_v17 = vld [vmem:[#allocation190_spill] sm:$0xff] }
 0x2c3   :  { %v1962_v35 = vpop.permute.xlu1 %1961  ;;  %v2342_v45 = vsel %vm2330_vm6, %v2277_v8, %v6591_v33 }
 0x2c4   :  { %v2600_v12 = vsel %vm2590_vm10, %v2535_v54, %v1962_v35  ;;  %v1388_v23 = vpop.permute.xlu0 %1387 }
 0x2c5   :  { %1607 = vrot.lane.b32.xlu1 %v7035_v36, %s4398_s12  ;;  %4162 = vmatmul.mubr.msk.f32.gmra.mrb[8].mxu0 %vm2667_vm11, %v2600_v12  ;;  %v2406_v43 = vsel %vm2395_vm7, %v2341_v63, %v1388_v23  ;;  %v10489_v23 = vld [vmem:[#allocation156_spill] sm:$0xff] }
 0x2c6   :  { %1417 = vrot.lane.b32.xlu0 %v10479_v30, %s4397_s8 }
 0x2c7   :  { %v1580_v27 = vpop.permute.xlu1 %1579 }
 0x2c8   :  { %v1390_v4 = vpop.permute.xlu0 %1389  ;;  %v2471_v34 = vsel %vm2460_vm8, %v2406_v43, %v1580_v27 }
 0x2c9   :  { %1799 = vrot.lane.b32.xlu1 %v10481_v3, %s4399_s1  ;;  %v2407_v12 = vsel %vm2395_vm7, %v2342_v45, %v1390_v4  ;;  %v7093_v4 = vld [vmem:[%s9603_s0 + $0x168] sm:$0xff] }
 0x2ca   :  { %1609 = vrot.lane.b32.xlu0 %v7054_v16, %s4398_s12 }
 0x2cb   :  { %v1772_v24 = vpop.permute.xlu1 %1771 }
 0x2cc   :  { %v1582_v50 = vpop.permute.xlu0 %1581  ;;  %v2536_v31 = vsel %vm2525_vm9, %v2471_v34, %v1772_v24  ;;  %v10491_v24 = vld [vmem:[#allocation191_spill] sm:$0xff] }
 0x2cd   :  { %1991 = vrot.lane.b32.xlu1 %v10485_v18, %s4400_s13  ;;  %v2472_v27 = vsel %vm2460_vm8, %v2407_v12, %v1582_v50  ;;  %v2213_v63 = vsel %vm2200_vm4, %v2148_v47, %v10491_v24  ;;  %v7112_v50 = vld [vmem:[%s9603_s0 + $0x170] sm:$0xff] }
 0x2ce   :  { %1801 = vrot.lane.b32.xlu0 %v10487_v13, %s4399_s1  ;;  %v2278_v7 = vsel %vm2265_vm5, %v2213_v63, %v10492_v41  ;;  %v10494_v13 = vld [vmem:[#allocation161_spill] sm:$0xff]  ;;  %v4321_v63 = vld [vmem:[%s9603_s0 + $0xa8] sm:$0xff]  ;;  %v10498_v41 = vld [vmem:[#allocation124_spill] sm:$0xff] }
 0x2cf   :  { %v1964_v30 = vpop.permute.xlu1 %1963  ;;  %v2343_v43 = vsel %vm2330_vm6, %v2278_v7, %v6601_v52  ;;  %v10496_v52 = vld [vmem:[#allocation9_spill] sm:$0xff]  ;;  %v2150_v7 = vsel %vm2135_vm3, %v4321_v63, %v10498_v41 }
 0x2d0   :  { %v2601_v54 = vsel %vm2590_vm10, %v2536_v31, %v1964_v30  ;;  %v1774_v35 = vpop.permute.xlu0 %1773 }
 0x2d1   :  { %1993 = vrot.lane.b32.xlu1 %v10489_v23, %s4400_s13  ;;  %4164 = vmatprep.mubr.msk.f32.mxu0 %vm2667_vm11, %v2601_v54  ;;  %v2537_v46 = vsel %vm2525_vm9, %v2472_v27, %v1774_v35 }
 0x2d2   :  { %1419 = vrot.lane.b32.xlu0 %v10485_v18, %s4397_s8 }
 0x2d3   :  { %v1966_v21 = vpop.permute.xlu1 %1965 }
 0x2d4   :  { %v2602_v33 = vsel %vm2590_vm10, %v2537_v46, %v1966_v21  ;;  %v1392_v59 = vpop.permute.xlu0 %1391  ;;  %v10497_v46 = vld [vmem:[#allocation160_spill] sm:$0xff] }
 0x2d5   :  { %1611 = vrot.lane.b32.xlu1 %v7093_v4, %s4398_s12  ;;  %4165 = vmatmul.mubr.msk.f32.gmra.mrb[10].mxu0 %vm2667_vm11, %v2602_v33  ;;  %v2408_v34 = vsel %vm2395_vm7, %v2343_v43, %v1392_v59 }
 0x2d6   :  { %1421 = vrot.lane.b32.xlu0 %v10489_v23, %s4397_s8 }
 0x2d7   :  { %v1584_v3 = vpop.permute.xlu1 %1583 }
 0x2d8   :  { %v1394_v15 = vpop.permute.xlu0 %1393  ;;  %v2473_v31 = vsel %vm2460_vm8, %v2408_v34, %v1584_v3  ;;  %v4319_v3 = vld [vmem:[%s9603_s0 + $0x180] sm:$0xff] }
 0x2d9   :  { %1803 = vrot.lane.b32.xlu1 %v10339_v40, %s4399_s1  ;;  %v4318_v40 = vld [vmem:[%s9603_s0 + $0x98] sm:$0xff]  ;;  %v563_v55 = vrot.slane %v4319_v3, 2 }
 0x2da   :  { %1613 = vrot.lane.b32.xlu0 %v7112_v50, %s4398_s12  ;;  %v2149_v38 = vsel %vm2135_vm3, %v4318_v40, %v10493_v39  ;;  %v10500_v40 = vld [vmem:[#allocation265_spill] sm:$0xff] }
 0x2db   :  { %v1776_v62 = vpop.permute.xlu1 %1775  ;;  %v2214_v8 = vsel %vm2200_vm4, %v2149_v38, %v10495_v17  ;;  %v566_v39 = vrot.slane %v10500_v40, 2  ;;  %v10501_v38 = vld [vmem:[#allocation12_spill] sm:$0xff] }
 0x2dc   :  { %v1586_v18 = vpop.permute.xlu0 %1585  ;;  %v2279_v30 = vsel %vm2265_vm5, %v2214_v8, %v10496_v52  ;;  %v2538_v45 = vsel %vm2525_vm9, %v2473_v31, %v1776_v62  ;;  %v10499_v62 = vld [vmem:[#allocation193_spill] sm:$0xff]  ;;  %v10502_v31 = vld [vmem:[#allocation123_spill] sm:$0xff] }
 0x2dd   :  { %1995 = vrot.lane.b32.xlu1 %v10494_v13, %s4400_s13  ;;  %v2344_v35 = vsel %vm2330_vm6, %v2279_v30, %v6599_v57  ;;  %v2215_v43 = vsel %vm2200_vm4, %v2150_v7, %v10499_v62 }
 0x2de   :  { %1805 = vrot.lane.b32.xlu0 %v10338_v20, %s4399_s1  ;;  %v2409_v27 = vsel %vm2395_vm7, %v2344_v35, %v1394_v15  ;;  %v4320_v15 = vld [vmem:[%s9603_s0 + $0x188] sm:$0xff]  ;;  %v2280_v34 = vsel %vm2265_vm5, %v2215_v43, %v10501_v38 }
 0x2df   :  { %v1968_v54 = vpop.permute.xlu1 %1967  ;;  %v2474_v20 = vsel %vm2460_vm8, %v2409_v27, %v1586_v18  ;;  %v564_v32 = vrot.slane %v4320_v15, 2  ;;  %v2345_v17 = vsel %vm2330_vm6, %v2280_v34, %v6609_v29  ;;  %v4323_v34 = vld [vmem:[%s9603_s0 + $0xc0] sm:$0xff] }
 0x2e0   :  { %v2603_v12 = vsel %vm2590_vm10, %v2538_v45, %v1968_v54  ;;  %v1778_v23 = vpop.permute.xlu0 %1777  ;;  %v10503_v45 = vld [vmem:[#allocation192_spill] sm:$0xff] }
 0x2e1   :  { %1997 = vrot.lane.b32.xlu1 %v10497_v46, %s4400_s13  ;;  %4167 = vmatprep.mubr.msk.f32.mxu0 %vm2667_vm11, %v2603_v12  ;;  %v2539_v21 = vsel %vm2525_vm9, %v2474_v20, %v1778_v23  ;;  %v565_v18 = vsel %vm386_vm1, %v563_v55, %v564_v32  ;;  %v10504_v12 = vld [vmem:[#allocation35_spill] sm:$0xff]  ;;  %v567_v29 = vsel %vm386_vm1, %v564_v32, %v566_v39 }
 0x2e2   :  { %1423 = vrot.lane.b32.xlu0 %v10494_v13, %s4397_s8  ;;  %v10505_v23 = vld [vmem:[#allocation11_spill] sm:$0xff] }
 0x2e3   :  { %v1970_v33 = vpop.permute.xlu1 %1969 }
 0x2e4   :  { %v2604_v57 = vsel %vm2590_vm10, %v2539_v21, %v1970_v33  ;;  %v1396_v59 = vpop.permute.xlu0 %1395  ;;  %v72_v21 = vld [vmem:[%s9603_s0 + $0x198] sm:$0xff]  ;;  %v73_v33 = vld [vmem:[%s9603_s0 + $0x1a0] sm:$0xff] }
 0x2e5   :  { %1615 = vrot.lane.b32.xlu1 %v4319_v3, %s4398_s12  ;;  %4168 = vmatmul.mubr.msk.f32.gmra.mrb[12].mxu0 %vm2667_vm11, %v2604_v57  ;;  %v2410_v30 = vsel %vm2395_vm7, %v2345_v17, %v1396_v59  ;;  %v579_v55 = vrot.slane %v72_v21, 1  ;;  %v589_v62 = vrot.slane %v72_v21, 2 }
 0x2e6   :  { %1425 = vrot.lane.b32.xlu0 %v10497_v46, %s4397_s8 }
 0x2e7   :  { %v1588_v47 = vpop.permute.xlu1 %1587 }
 0x2e8   :  { %v1398_v24 = vpop.permute.xlu0 %1397  ;;  %v2475_v35 = vsel %vm2460_vm8, %v2410_v30, %v1588_v47  ;;  %v580_v47 = vrot.slane %v73_v33, 1  ;;  %v10508_v30 = vld [vmem:[#allocation14_spill] sm:$0xff] }
 0x2e9   :  { %1807 = vrot.lane.b32.xlu1 %v6417_v56, %s4399_s1  ;;  %v4322_v56 = vld [vmem:[%s9603_s0 + $0xb0] sm:$0xff] }
 0x2ea   :  { %1617 = vrot.lane.b32.xlu0 %v4320_v15, %s4398_s12  ;;  %v2151_v52 = vsel %vm2135_vm3, %v4322_v56, %v10502_v31  ;;  %v581_v43 = vsel %vm225_vm0, %v579_v55, %v580_v47 }
 0x2eb   :  { %v1780_v13 = vpop.permute.xlu1 %1779  ;;  %v2216_v54 = vsel %vm2200_vm4, %v2151_v52, %v10503_v45 }
 0x2ec   :  { %v1590_v8 = vpop.permute.xlu0 %1589  ;;  %v2281_v27 = vsel %vm2265_vm5, %v2216_v54, %v10505_v23  ;;  %v2540_v46 = vsel %vm2525_vm9, %v2475_v35, %v1780_v13  ;;  %v10506_v13 = vld [vmem:[#allocation126_spill] sm:$0xff] }
 0x2ed   :  { %1999 = vrot.lane.b32.xlu1 %v565_v18, %s4400_s13  ;;  %v2346_v57 = vsel %vm2330_vm6, %v2281_v27, %v6607_v37  ;;  %v2152_v17 = vsel %vm2135_vm3, %v4323_v34, %v10506_v13  ;;  %v4324_v23 = vld [vmem:[%s9603_s0 + $0xc8] sm:$0xff]  ;;  %v10509_v27 = vld [vmem:[#allocation125_spill] sm:$0xff]  ;;  %v4326_v34 = vld [vmem:[%s9603_s0 + $0xd8] sm:$0xff] }
 0x2ee   :  { %1809 = vrot.lane.b32.xlu0 %v10504_v12, %s4399_s1  ;;  %v2411_v15 = vsel %vm2395_vm7, %v2346_v57, %v1398_v24  ;;  %v74_v24 = vld [vmem:[%s9603_s0 + $0x1a8] sm:$0x3]  ;;  %v10514_v13 = vld [vmem:[#allocation128_spill] sm:$0xff] }
 0x2ef   :  { %v1972_v20 = vpop.permute.xlu1 %1971  ;;  %v2476_v32 = vsel %vm2460_vm8, %v2411_v15, %v1590_v8  ;;  %v582_v39 = vrot.slane %v74_v24, 1  ;;  %v10507_v8 = vld [vmem:[#allocation195_spill] sm:$0xff]  ;;  %v592_v52 = vrot.slane %v74_v24, 2 }
 0x2f0   :  { %v2605_v59 = vsel %vm2590_vm10, %v2540_v46, %v1972_v20  ;;  %v1782_v3 = vpop.permute.xlu0 %1781  ;;  %v2217_v56 = vsel %vm2200_vm4, %v2152_v17, %v10507_v8  ;;  %v2153_v46 = vsel %vm2135_vm3, %v4324_v23, %v10509_v27  ;;  %v2154_v17 = vsel %vm2135_vm3, %v4326_v34, %v10514_v13  ;;  %v10515_v8 = vld [vmem:[#allocation49_spill] sm:$0xff]  ;;  %v10518_v23 = vld [vmem:[#allocation127_spill] sm:$0xff]  ;;  %v10525_v13 = vld [vmem:[#allocation54_spill] sm:$0xff] }
 0x2f1   :  { %2001 = vrot.lane.b32.xlu1 %v567_v29, %s4400_s13  ;;  %4170 = vmatprep.mubr.msk.f32.mxu0 %vm2667_vm11, %v2605_v59  ;;  %v2541_v63 = vsel %vm2525_vm9, %v2476_v32, %v1782_v3  ;;  %v2282_v45 = vsel %vm2265_vm5, %v2217_v56, %v10508_v30  ;;  %v583_v35 = vsel %vm225_vm0, %v580_v47, %v582_v39  ;;  %v10511_v59 = vld [vmem:[#allocation13_spill] sm:$0xff]  ;;  %v10517_v30 = vld [vmem:[#allocation16_spill] sm:$0xff] }
 0x2f2   :  { %1427 = vrot.lane.b32.xlu0 %v565_v18, %s4397_s8  ;;  %v590_v18 = vrot.slane %v73_v33, 2  ;;  %v2347_v12 = vsel %vm2330_vm6, %v2282_v45, %v6617_v28  ;;  %v10516_v56 = vld [vmem:[#allocation197_spill] sm:$0xff] }
 0x2f3   :  { %v1974_v41 = vpop.permute.xlu1 %1973 }
 0x2f4   :  { %v2606_v37 = vsel %vm2590_vm10, %v2541_v63, %v1974_v41  ;;  %v1400_v7 = vpop.permute.xlu0 %1399  ;;  %v591_v31 = vsel %vm386_vm1, %v589_v62, %v590_v18  ;;  %v593_v28 = vsel %vm386_vm1, %v590_v18, %v592_v52  ;;  %v7257_v18 = vld [vmem:[%s9603_s0 + $0x1e0] sm:$0xff]  ;;  %v7276_v52 = vld [vmem:[%s9603_s0 + $0x1e8] sm:$0xff] }
 0x2f5   :  { %1619 = vrot.lane.b32.xlu1 %v72_v21, %s4398_s12  ;;  %4171 = vmatmul.mubr.msk.f32.gmra.mrb[14].mxu0 %vm2667_vm11, %v2606_v37  ;;  %v2412_v20 = vsel %vm2395_vm7, %v2347_v12, %v1400_v7  ;;  %v10510_v21 = vld [vmem:[#allocation194_spill] sm:$0xff]  ;;  %v10512_v7 = vld [vmem:[#allocation41_spill] sm:$0xff] }
 0x2f6   :  { %1429 = vrot.lane.b32.xlu0 %v567_v29, %s4397_s8 }
 0x2f7   :  { %v1592_v40 = vpop.permute.xlu1 %1591 }
 0x2f8   :  { %v1402_v38 = vpop.permute.xlu0 %1401  ;;  %v2477_v57 = vsel %vm2460_vm8, %v2412_v20, %v1592_v40  ;;  %v10513_v40 = vld [vmem:[#allocation39_spill] sm:$0xff]  ;;  %v10519_v20 = vld [vmem:[#allocation46_spill] sm:$0xff] }
 0x2f9   :  { %1811 = vrot.lane.b32.xlu1 %v581_v43, %s4399_s1 }
 0x2fa   :  { %1621 = vrot.lane.b32.xlu0 %v73_v33, %s4398_s12  ;;  %v2218_v33 = vsel %vm2200_vm4, %v2153_v46, %v10510_v21  ;;  %v10520_v21 = vld [vmem:[#allocation196_spill] sm:$0xff] }
 0x2fb   :  { %v1784_v54 = vpop.permute.xlu1 %1783  ;;  %v2283_v3 = vsel %vm2265_vm5, %v2218_v33, %v10511_v59 }
 0x2fc   :  { %v1594_v29 = vpop.permute.xlu0 %1593  ;;  %v2542_v15 = vsel %vm2525_vm9, %v2477_v57, %v1784_v54  ;;  %v2348_v55 = vsel %vm2330_vm6, %v2283_v3, %v6615_v9 }
 0x2fd   :  { %2003 = vrot.lane.b32.xlu1 %v591_v31, %s4400_s13  ;;  %v2413_v41 = vsel %vm2395_vm7, %v2348_v55, %v1402_v38  ;;  %v2219_v31 = vsel %vm2200_vm4, %v2154_v17, %v10516_v56  ;;  %v10526_v17 = vld [vmem:[#allocation199_spill] sm:$0xff]  ;;  %v7334_v56 = vld [vmem:[%s9603_s0 + $0x200] sm:$0xff] }
 0x2fe   :  { %1813 = vrot.lane.b32.xlu0 %v583_v35, %s4399_s1  ;;  %v2478_v37 = vsel %vm2460_vm8, %v2413_v41, %v1594_v29  ;;  %v2284_v45 = vsel %vm2265_vm5, %v2219_v31, %v10517_v30  ;;  %v4328_v29 = vld [vmem:[%s9603_s0 + $0xe0] sm:$0xff]  ;;  %v10523_v41 = vld [vmem:[#allocation162_spill] sm:$0xff] }
 0x2ff   :  { %v1976_v32 = vpop.permute.xlu1 %1975  ;;  %v2349_v35 = vsel %vm2330_vm6, %v2284_v45, %v6625_v25  ;;  %v2155_v27 = vsel %vm2135_vm3, %v4328_v29, %v10518_v23  ;;  %v10521_v25 = vld [vmem:[#allocation48_spill] sm:$0xff]  ;;  %v10527_v31 = vld [vmem:[#allocation18_spill] sm:$0xff] }
 0x300   :  { %v2607_v47 = vsel %vm2590_vm10, %v2542_v15, %v1976_v32  ;;  %v1786_v63 = vpop.permute.xlu0 %1785  ;;  %v2220_v33 = vsel %vm2200_vm4, %v2155_v27, %v10520_v21  ;;  %v10528_v29 = vld [vmem:[#allocation130_spill] sm:$0xff] }
 0x301   :  { %2005 = vrot.lane.b32.xlu1 %v593_v28, %s4400_s13  ;;  %4173 = vmatprep.mubr.msk.f32.mxu0 %vm2667_vm11, %v2607_v47  ;;  %v2543_v24 = vsel %vm2525_vm9, %v2478_v37, %v1786_v63  ;;  %v10522_v28 = vld [vmem:[#allocation15_spill] sm:$0xff] }
 0x302   :  { %1431 = vrot.lane.b32.xlu0 %v10512_v7, %s4397_s8  ;;  %v2285_v59 = vsel %vm2265_vm5, %v2220_v33, %v10522_v28 }
 0x303   :  { %v1978_v62 = vpop.permute.xlu1 %1977  ;;  %v2350_v32 = vsel %vm2330_vm6, %v2285_v59, %v6623_v10 }
 0x304   :  { %v2608_v43 = vsel %vm2590_vm10, %v2543_v24, %v1978_v62  ;;  %v1404_v9 = vpop.permute.xlu0 %1403 }
 0x305   :  { %1623 = vrot.lane.b32.xlu1 %v7257_v18, %s4398_s12  ;;  %4174 = vmatmul.mubr.msk.f32.gmra.mrb[16].mxu0 %vm2667_vm11, %v2608_v43  ;;  %v2414_v46 = vsel %vm2395_vm7, %v2349_v35, %v1404_v9  ;;  %v7315_v43 = vld [vmem:[%s9603_s0 + $0x1f8] sm:$0xff] }
 0x306   :  { %1433 = vrot.lane.b32.xlu0 %v10513_v40, %s4397_s8 }
 0x307   :  { %v1596_v39 = vpop.permute.xlu1 %1595 }
 0x308   :  { %v1406_v38 = vpop.permute.xlu0 %1405  ;;  %v2479_v57 = vsel %vm2460_vm8, %v2414_v46, %v1596_v39  ;;  %v4330_v39 = vld [vmem:[%s9603_s0 + $0xf0] sm:$0xff] }
 0x309   :  { %1815 = vrot.lane.b32.xlu1 %v10515_v8, %s4399_s1  ;;  %v2415_v63 = vsel %vm2395_vm7, %v2350_v32, %v1406_v38  ;;  %v10524_v38 = vld [vmem:[#allocation131_spill] sm:$0xff] }
 0x30a   :  { %1625 = vrot.lane.b32.xlu0 %v7276_v52, %s4398_s12  ;;  %v2156_v34 = vsel %vm2135_vm3, %v4330_v39, %v10524_v38  ;;  %v10529_v46 = vld [vmem:[#allocation51_spill] sm:$0xff]  ;;  %v4334_v39 = vld [vmem:[%s9603_s0 + $0x108] sm:$0xff] }
 0x30b   :  { %v1788_v54 = vpop.permute.xlu1 %1787  ;;  %v2221_v8 = vsel %vm2200_vm4, %v2156_v34, %v10526_v17  ;;  %v10535_v38 = vld [vmem:[#allocation135_spill] sm:$0xff] }
 0x30c   :  { %v1598_v12 = vpop.permute.xlu0 %1597  ;;  %v2544_v3 = vsel %vm2525_vm9, %v2479_v57, %v1788_v54  ;;  %v2286_v30 = vsel %vm2265_vm5, %v2221_v8, %v10527_v31  ;;  %v10532_v57 = vld [vmem:[#allocation17_spill] sm:$0xff]  ;;  %v2158_v34 = vsel %vm2135_vm3, %v4334_v39, %v10535_v38  ;;  %v10537_v17 = vld [vmem:[#allocation203_spill] sm:$0xff]  ;;  %v7392_v31 = vld [vmem:[%s9603_s0 + $0x218] sm:$0xff] }
 0x30d   :  { %2007 = vrot.lane.b32.xlu1 %v10519_v20, %s4400_s13  ;;  %v2480_v37 = vsel %vm2460_vm8, %v2415_v63, %v1598_v12  ;;  %v2351_v54 = vsel %vm2330_vm6, %v2286_v30, %v6633_v26  ;;  %v4332_v12 = vld [vmem:[%s9603_s0 + $0xf8] sm:$0xff]  ;;  %v10531_v26 = vld [vmem:[#allocation53_spill] sm:$0xff]  ;;  %v10534_v63 = vld [vmem:[#allocation163_spill] sm:$0xff]  ;;  %v2223_v8 = vsel %vm2200_vm4, %v2158_v34, %v10537_v17 }
 0x30e   :  { %1817 = vrot.lane.b32.xlu0 %v10521_v25, %s4399_s1  ;;  %v2157_v23 = vsel %vm2135_vm3, %v4332_v12, %v10528_v29  ;;  %v10538_v30 = vld [vmem:[#allocation20_spill] sm:$0xff]  ;;  %v4336_v29 = vld [vmem:[%s9603_s0 + $0x110] sm:$0xff]  ;;  %v4338_v38 = vld [vmem:[%s9603_s0 + $0x120] sm:$0xff] }
 0x30f   :  { %v1980_v15 = vpop.permute.xlu1 %1979  ;;  %v10546_v34 = vld [vmem:[#allocation139_spill] sm:$0xff]  ;;  %v10547_v17 = vld [vmem:[#allocation64_spill] sm:$0xff] }
 0x310   :  { %v2609_v55 = vsel %vm2590_vm10, %v2544_v3, %v1980_v15  ;;  %v1790_v47 = vpop.permute.xlu0 %1789  ;;  %v10533_v3 = vld [vmem:[#allocation295_spill] sm:$0xff] }
 0x311   :  { %2009 = vrot.lane.b32.xlu1 %v10523_v41, %s4400_s13  ;;  %4176 = vmatprep.mubr.msk.f32.mxu0 %vm2667_vm11, %v2609_v55  ;;  %v2545_v7 = vsel %vm2525_vm9, %v2480_v37, %v1790_v47 }
 0x312   :  { %1435 = vrot.lane.b32.xlu0 %v10519_v20, %s4397_s8  ;;  %v10530_v20 = vld [vmem:[#allocation198_spill] sm:$0xff] }
 0x313   :  { %v1982_v24 = vpop.permute.xlu1 %1981  ;;  %v2222_v21 = vsel %vm2200_vm4, %v2157_v23, %v10530_v20  ;;  %v10539_v23 = vld [vmem:[#allocation133_spill] sm:$0xff]  ;;  %v10540_v20 = vld [vmem:[#allocation56_spill] sm:$0xff] }
 0x314   :  { %v2610_v10 = vsel %vm2590_vm10, %v2545_v7, %v1982_v24  ;;  %v1408_v62 = vpop.permute.xlu0 %1407  ;;  %v2287_v25 = vsel %vm2265_vm5, %v2222_v21, %v10532_v57  ;;  %v10541_v21 = vld [vmem:[#allocation202_spill] sm:$0xff]  ;;  %v10543_v57 = vld [vmem:[#allocation19_spill] sm:$0xff] }
 0x315   :  { %1627 = vrot.lane.b32.xlu1 %v7315_v43, %s4398_s12  ;;  %4177 = vmatmul.mubr.msk.f32.gmra.mrb[18].mxu0 %vm2667_vm11, %v2610_v10  ;;  %v2416_v27 = vsel %vm2395_vm7, %v2351_v54, %v1408_v62  ;;  %v2352_v15 = vsel %vm2330_vm6, %v2287_v25, %v10533_v3  ;;  %v7373_v62 = vld [vmem:[%s9603_s0 + $0x210] sm:$0xff]  ;;  %v10544_v3 = vld [vmem:[#allocation296_spill] sm:$0xff] }
 0x316   :  { %1437 = vrot.lane.b32.xlu0 %v10523_v41, %s4397_s8 }
 0x317   :  { %v1600_v9 = vpop.permute.xlu1 %1599 }
 0x318   :  { %v1410_v40 = vpop.permute.xlu0 %1409  ;;  %v2481_v33 = vsel %vm2460_vm8, %v2416_v27, %v1600_v9  ;;  %v2159_v27 = vsel %vm2135_vm3, %v4336_v29, %v10539_v23 }
 0x319   :  { %1819 = vrot.lane.b32.xlu1 %v10525_v13, %s4399_s1  ;;  %v2417_v47 = vsel %vm2395_vm7, %v2352_v15, %v1410_v40  ;;  %v10536_v13 = vld [vmem:[#allocation59_spill] sm:$0xff] }
 0x31a   :  { %1629 = vrot.lane.b32.xlu0 %v7334_v56, %s4398_s12 }
 0x31b   :  { %v1792_v45 = vpop.permute.xlu1 %1791 }
 0x31c   :  { %v1602_v35 = vpop.permute.xlu0 %1601  ;;  %v2546_v28 = vsel %vm2525_vm9, %v2481_v33, %v1792_v45  ;;  %v2288_v45 = vsel %vm2265_vm5, %v2223_v8, %v10538_v30  ;;  %v2224_v33 = vsel %vm2200_vm4, %v2159_v27, %v10541_v21  ;;  %v10548_v8 = vld [vmem:[#allocation207_spill] sm:$0xff]  ;;  %v4340_v27 = vld [vmem:[%s9603_s0 + $0x128] sm:$0xff] }
 0x31d   :  { %2011 = vrot.lane.b32.xlu1 %v10529_v46, %s4400_s13  ;;  %v2482_v41 = vsel %vm2460_vm8, %v2417_v47, %v1602_v35  ;;  %v2353_v35 = vsel %vm2330_vm6, %v2288_v45, %v6641_v60  ;;  %v10542_v60 = vld [vmem:[#allocation58_spill] sm:$0xff]  ;;  %v2289_v25 = vsel %vm2265_vm5, %v2224_v33, %v10543_v57  ;;  %v7450_v45 = vld [vmem:[%s9603_s0 + $0x230] sm:$0xff]  ;;  %v10551_v33 = vld [vmem:[#allocation61_spill] sm:$0xff] }
 0x31e   :  { %1821 = vrot.lane.b32.xlu0 %v10531_v26, %s4399_s1  ;;  %v2354_v15 = vsel %vm2330_vm6, %v2289_v25, %v10544_v3  ;;  %v10554_v25 = vld [vmem:[#allocation21_spill] sm:$0xff] }
 0x31f   :  { %v1984_v59 = vpop.permute.xlu1 %1983 }
 0x320   :  { %v2611_v32 = vsel %vm2590_vm10, %v2546_v28, %v1984_v59  ;;  %v1794_v55 = vpop.permute.xlu0 %1793 }
 0x321   :  { %2013 = vrot.lane.b32.xlu1 %v10534_v63, %s4400_s13  ;;  %4179 = vmatprep.mubr.msk.f32.mxu0 %vm2667_vm11, %v2611_v32  ;;  %v2547_v37 = vsel %vm2525_vm9, %v2482_v41, %v1794_v55 }
 0x322   :  { %1439 = vrot.lane.b32.xlu0 %v10529_v46, %s4397_s8 }
 0x323   :  { %v1986_v7 = vpop.permute.xlu1 %1985 }
 0x324   :  { %v2612_v24 = vsel %vm2590_vm10, %v2547_v37, %v1986_v7  ;;  %v1412_v10 = vpop.permute.xlu0 %1411 }
 0x325   :  { %1631 = vrot.lane.b32.xlu1 %v7373_v62, %s4398_s12  ;;  %4180 = vmatmul.mubr.msk.f32.gmra.mrb[20].mxu0 %vm2667_vm11, %v2612_v24  ;;  %v2418_v46 = vsel %vm2395_vm7, %v2353_v35, %v1412_v10 }
 0x326   :  { %1441 = vrot.lane.b32.xlu0 %v10534_v63, %s4397_s8  ;;  %v10545_v63 = vld [vmem:[#allocation164_spill] sm:$0xff] }
 0x327   :  { %v1604_v9 = vpop.permute.xlu1 %1603 }
 0x328   :  { %v1414_v40 = vpop.permute.xlu0 %1413  ;;  %v2483_v26 = vsel %vm2460_vm8, %v2418_v46, %v1604_v9  ;;  %v7431_v9 = vld [vmem:[%s9603_s0 + $0x228] sm:$0xff]  ;;  %v10550_v46 = vld [vmem:[#allocation137_spill] sm:$0xff] }
 0x329   :  { %1823 = vrot.lane.b32.xlu1 %v10536_v13, %s4399_s1  ;;  %v2419_v47 = vsel %vm2395_vm7, %v2354_v15, %v1414_v40  ;;  %v2160_v13 = vsel %vm2135_vm3, %v4338_v38, %v10546_v34  ;;  %v4342_v38 = vld [vmem:[%s9603_s0 + $0x138] sm:$0xff]  ;;  %v10556_v34 = vld [vmem:[#allocation143_spill] sm:$0xff] }
 0x32a   :  { %1633 = vrot.lane.b32.xlu0 %v7392_v31, %s4398_s12  ;;  %v2225_v30 = vsel %vm2200_vm4, %v2160_v13, %v10548_v8  ;;  %v2162_v13 = vsel %vm2135_vm3, %v4342_v38, %v10556_v34  ;;  %v10558_v8 = vld [vmem:[#allocation211_spill] sm:$0xff] }
 0x32b   :  { %v1796_v54 = vpop.permute.xlu1 %1795  ;;  %v10566_v34 = vld [vmem:[#allocation147_spill] sm:$0xff] }
 0x32c   :  { %v1606_v12 = vpop.permute.xlu0 %1605  ;;  %v2548_v28 = vsel %vm2525_vm9, %v2483_v26, %v1796_v54  ;;  %v10549_v54 = vld [vmem:[#allocation22_spill] sm:$0xff] }
 0x32d   :  { %2015 = vrot.lane.b32.xlu1 %v10540_v20, %s4400_s13  ;;  %v2484_v41 = vsel %vm2460_vm8, %v2419_v47, %v1606_v12  ;;  %v2290_v35 = vsel %vm2265_vm5, %v2225_v30, %v10549_v54  ;;  %v10552_v26 = vld [vmem:[#allocation206_spill] sm:$0xff]  ;;  %v2227_v30 = vsel %vm2200_vm4, %v2162_v13, %v10558_v8  ;;  %v2164_v13 = vsel %vm2135_vm3, %v7035_v36, %v10566_v34 }
 0x32e   :  { %1825 = vrot.lane.b32.xlu0 %v10542_v60, %s4399_s1  ;;  %v2355_v29 = vsel %vm2330_vm6, %v2290_v35, %v6649_v5  ;;  %v10553_v5 = vld [vmem:[#allocation63_spill] sm:$0xff]  ;;  %v7508_v54 = vld [vmem:[%s9603_s0 + $0x248] sm:$0xff]  ;;  %v10559_v35 = vld [vmem:[#allocation24_spill] sm:$0xff] }
 0x32f   :  { %v1988_v59 = vpop.permute.xlu1 %1987 }
 0x330   :  { %v2613_v32 = vsel %vm2590_vm10, %v2548_v28, %v1988_v59  ;;  %v1798_v55 = vpop.permute.xlu0 %1797 }
 0x331   :  { %2017 = vrot.lane.b32.xlu1 %v10545_v63, %s4400_s13  ;;  %4182 = vmatprep.mubr.msk.f32.mxu0 %vm2667_vm11, %v2613_v32  ;;  %v2549_v37 = vsel %vm2525_vm9, %v2484_v41, %v1798_v55 }
 0x332   :  { %1443 = vrot.lane.b32.xlu0 %v10540_v20, %s4397_s8  ;;  %v2161_v20 = vsel %vm2135_vm3, %v4340_v27, %v10550_v46  ;;  %v4344_v46 = vld [vmem:[%s9603_s0 + $0x140] sm:$0xff] }
 0x333   :  { %v1990_v7 = vpop.permute.xlu1 %1989  ;;  %v2226_v60 = vsel %vm2200_vm4, %v2161_v20, %v10552_v26  ;;  %v10560_v20 = vld [vmem:[#allocation141_spill] sm:$0xff]  ;;  %v10561_v26 = vld [vmem:[#allocation66_spill] sm:$0xff] }
 0x334   :  { %v2614_v24 = vsel %vm2590_vm10, %v2549_v37, %v1990_v7  ;;  %v1416_v10 = vpop.permute.xlu0 %1415  ;;  %v2291_v28 = vsel %vm2265_vm5, %v2226_v60, %v10554_v25  ;;  %v10562_v60 = vld [vmem:[#allocation210_spill] sm:$0xff]  ;;  %v10564_v25 = vld [vmem:[#allocation23_spill] sm:$0xff] }
 0x335   :  { %1635 = vrot.lane.b32.xlu1 %v7431_v9, %s4398_s12  ;;  %4183 = vmatmul.mubr.msk.f32.gmra.mrb[22].mxu0 %vm2667_vm11, %v2614_v24  ;;  %v2420_v21 = vsel %vm2395_vm7, %v2355_v29, %v1416_v10  ;;  %v2356_v15 = vsel %vm2330_vm6, %v2291_v28, %v6647_v48  ;;  %v7489_v10 = vld [vmem:[%s9603_s0 + $0x240] sm:$0xff] }
 0x336   :  { %1445 = vrot.lane.b32.xlu0 %v10545_v63, %s4397_s8  ;;  %v10555_v63 = vld [vmem:[#allocation165_spill] sm:$0xff] }
 0x337   :  { %v1608_v40 = vpop.permute.xlu1 %1607 }
 0x338   :  { %v1418_v39 = vpop.permute.xlu0 %1417  ;;  %v2485_v57 = vsel %vm2460_vm8, %v2420_v21, %v1608_v40  ;;  %v2163_v21 = vsel %vm2135_vm3, %v4344_v46, %v10560_v20  ;;  %v10570_v20 = vld [vmem:[#allocation145_spill] sm:$0xff] }
 0x339   :  { %1827 = vrot.lane.b32.xlu1 %v10547_v17, %s4399_s1  ;;  %v2421_v47 = vsel %vm2395_vm7, %v2356_v15, %v1418_v39  ;;  %v10557_v17 = vld [vmem:[#allocation69_spill] sm:$0xff] }
 0x33a   :  { %1637 = vrot.lane.b32.xlu0 %v7450_v45, %s4398_s12 }
 0x33b   :  { %v1800_v12 = vpop.permute.xlu1 %1799 }
 0x33c   :  { %v1610_v23 = vpop.permute.xlu0 %1609  ;;  %v2550_v59 = vsel %vm2525_vm9, %v2485_v57, %v1800_v12  ;;  %v2292_v12 = vsel %vm2265_vm5, %v2227_v30, %v10559_v35  ;;  %v2228_v57 = vsel %vm2200_vm4, %v2163_v21, %v10562_v60  ;;  %v10568_v30 = vld [vmem:[#allocation215_spill] sm:$0xff]  ;;  %v2165_v21 = vsel %vm2135_vm3, %v7054_v16, %v10570_v20  ;;  %v10572_v60 = vld [vmem:[#allocation214_spill] sm:$0xff]  ;;  %v10575_v16 = vld [vmem:[#allocation297_spill] sm:$0xff] }
 0x33d   :  { %2019 = vrot.lane.b32.xlu1 %v10551_v33, %s4400_s13  ;;  %v2486_v41 = vsel %vm2460_vm8, %v2421_v47, %v1610_v23  ;;  %v2357_v23 = vsel %vm2330_vm6, %v2292_v12, %v6657_v44  ;;  %v10563_v44 = vld [vmem:[#allocation68_spill] sm:$0xff]  ;;  %v2293_v28 = vsel %vm2265_vm5, %v2228_v57, %v10564_v25  ;;  %v2229_v35 = vsel %vm2200_vm4, %v2164_v13, %v10568_v30  ;;  %v7568_v12 = vld [vmem:[%s9603_s0 + $0x260] sm:$0xff]  ;;  %v10577_v13 = vld [vmem:[#allocation151_spill] sm:$0xff] }
 0x33e   :  { %1829 = vrot.lane.b32.xlu0 %v10553_v5, %s4399_s1  ;;  %v2358_v15 = vsel %vm2330_vm6, %v2293_v28, %v6655_v1  ;;  %v2230_v57 = vsel %vm2200_vm4, %v2165_v21, %v10572_v60  ;;  %v10574_v25 = vld [vmem:[#allocation260_spill] sm:$0xff]  ;;  %v10578_v30 = vld [vmem:[#allocation79_spill] sm:$0xff] }
 0x33f   :  { %v1992_v3 = vpop.permute.xlu1 %1991 }
 0x340   :  { %v2615_v32 = vsel %vm2590_vm10, %v2550_v59, %v1992_v3  ;;  %v1802_v55 = vpop.permute.xlu0 %1801 }
 0x341   :  { %2021 = vrot.lane.b32.xlu1 %v10555_v63, %s4400_s13  ;;  %4185 = vmatprep.mubr.msk.f32.mxu0 %vm2667_vm11, %v2615_v32  ;;  %v2551_v37 = vsel %vm2525_vm9, %v2486_v41, %v1802_v55 }
 0x342   :  { %1447 = vrot.lane.b32.xlu0 %v10551_v33, %s4397_s8 }
 0x343   :  { %v1994_v7 = vpop.permute.xlu1 %1993 }
 0x344   :  { %v2616_v48 = vsel %vm2590_vm10, %v2551_v37, %v1994_v7  ;;  %v1420_v24 = vpop.permute.xlu0 %1419 }
 0x345   :  { %1639 = vrot.lane.b32.xlu1 %v7489_v10, %s4398_s12  ;;  %4186 = vmatmul.mubr.msk.f32.gmra.mrb[24].mxu0 %vm2667_vm11, %v2616_v48  ;;  %v2422_v33 = vsel %vm2395_vm7, %v2357_v23, %v1420_v24  ;;  %v7547_v24 = vld [vmem:[%s9603_s0 + $0x258] sm:$0xff] }
 0x346   :  { %1449 = vrot.lane.b32.xlu0 %v10555_v63, %s4397_s8  ;;  %v10565_v63 = vld [vmem:[#allocation166_spill] sm:$0xff] }
 0x347   :  { %v1612_v40 = vpop.permute.xlu1 %1611 }
 0x348   :  { %v1422_v39 = vpop.permute.xlu0 %1421  ;;  %v2487_v5 = vsel %vm2460_vm8, %v2422_v33, %v1612_v40 }
 0x349   :  { %1831 = vrot.lane.b32.xlu1 %v10557_v17, %s4399_s1  ;;  %v2423_v47 = vsel %vm2395_vm7, %v2358_v15, %v1422_v39  ;;  %v10567_v17 = vld [vmem:[#allocation74_spill] sm:$0xff] }
 0x34a   :  { %1641 = vrot.lane.b32.xlu0 %v7508_v54, %s4398_s12 }
 0x34b   :  { %v1804_v29 = vpop.permute.xlu1 %1803 }
 0x34c   :  { %v1614_v27 = vpop.permute.xlu0 %1613  ;;  %v2552_v59 = vsel %vm2525_vm9, %v2487_v5, %v1804_v29  ;;  %v10569_v29 = vld [vmem:[#allocation261_spill] sm:$0xff] }
 0x34d   :  { %2023 = vrot.lane.b32.xlu1 %v10561_v26, %s4400_s13  ;;  %v2488_v41 = vsel %vm2460_vm8, %v2423_v47, %v1614_v27  ;;  %v2294_v23 = vsel %vm2265_vm5, %v2229_v35, %v10569_v29  ;;  %v10576_v47 = vld [vmem:[#allocation167_spill] sm:$0xff] }
 0x34e   :  { %1833 = vrot.lane.b32.xlu0 %v10563_v44, %s4399_s1  ;;  %v2359_v27 = vsel %vm2330_vm6, %v2294_v23, %v6665_v6  ;;  %v10573_v44 = vld [vmem:[#allocation73_spill] sm:$0xff]  ;;  %v2295_v6 = vsel %vm2265_vm5, %v2230_v57, %v10574_v25  ;;  %v10579_v29 = vld [vmem:[#allocation219_spill] sm:$0xff]  ;;  %v10582_v57 = vld [vmem:[#allocation76_spill] sm:$0xff] }
 0x34f   :  { %v1996_v3 = vpop.permute.xlu1 %1995 }
 0x350   :  { %v2617_v32 = vsel %vm2590_vm10, %v2552_v59, %v1996_v3  ;;  %v1806_v55 = vpop.permute.xlu0 %1805  ;;  %v2360_v3 = vsel %vm2330_vm6, %v2295_v6, %v10575_v16  ;;  %v10584_v6 = vld [vmem:[#allocation78_spill] sm:$0xff] }
 0x351   :  { %2025 = vrot.lane.b32.xlu1 %v10565_v63, %s4400_s13  ;;  %4188 = vmatprep.mubr.msk.f32.mxu0 %vm2667_vm11, %v2617_v32  ;;  %v2553_v37 = vsel %vm2525_vm9, %v2488_v41, %v1806_v55 }
 0x352   :  { %1451 = vrot.lane.b32.xlu0 %v10561_v26, %s4397_s8  ;;  %v10571_v26 = vld [vmem:[#allocation71_spill] sm:$0xff] }
 0x353   :  { %v1998_v7 = vpop.permute.xlu1 %1997 }
 0x354   :  { %v2618_v1 = vsel %vm2590_vm10, %v2553_v37, %v1998_v7  ;;  %v1424_v48 = vpop.permute.xlu0 %1423 }
 0x355   :  { %1643 = vrot.lane.b32.xlu1 %v7547_v24, %s4398_s12  ;;  %4189 = vmatmul.mubr.msk.f32.gmra.mrb[26].mxu0 %vm2667_vm11, %v2618_v1  ;;  %v2424_v33 = vsel %vm2395_vm7, %v2359_v27, %v1424_v48  ;;  %v7605_v48 = vld [vmem:[%s9603_s0 + $0x270] sm:$0xff] }
 0x356   :  { %1453 = vrot.lane.b32.xlu0 %v10565_v63, %s4397_s8  ;;  %v10580_v27 = vld [vmem:[#allocation263_spill] sm:$0xff] }
 0x357   :  { %v1616_v40 = vpop.permute.xlu1 %1615 }
 0x358   :  { %v1426_v39 = vpop.permute.xlu0 %1425  ;;  %v7554_v38 = vpop.f32.mrb[0].mxu0  ;;  %v2489_v5 = vsel %vm2460_vm8, %v2424_v33, %v1616_v40  ;;  %v10581_v33 = vld [vmem:[#allocation149_spill] sm:$0xff] }
 0x359   :  { %1835 = vrot.lane.b32.xlu1 %v10567_v17, %s4399_s1  ;;  %v7561_v8 = vpop.f32.mrb[1].mxu0  ;;  %v2425_v55 = vsel %vm2395_vm7, %v2360_v3, %v1426_v39  ;;  %v2166_v17 = vsel %vm2135_vm3, %v7093_v4, %v10577_v13 }
 0x35a   :  { %1645 = vrot.lane.b32.xlu0 %v7568_v12, %s4398_s12  ;;  %v2231_v23 = vsel %vm2200_vm4, %v2166_v17, %v10579_v29  ;;  %v10588_v29 = vld [vmem:[#allocation155_spill] sm:$0xff] }
 0x35b   :  { %v1808_v36 = vpop.permute.xlu1 %1807 }
 0x35c   :  { %v1618_v46 = vpop.permute.xlu0 %1617  ;;  %v2554_v28 = vsel %vm2525_vm9, %v2489_v5, %v1808_v36  ;;  %v7626_v36 = vld [vmem:[%s9603_s0 + $0x278] sm:$0xff]  ;;  %v10583_v5 = vld [vmem:[#allocation218_spill] sm:$0xff] }
 0x35d   :  { %2027 = vrot.lane.b32.xlu1 %v10571_v26, %s4400_s13  ;;  %v2490_v63 = vsel %vm2460_vm8, %v2425_v55, %v1618_v46  ;;  %v2296_v46 = vsel %vm2265_vm5, %v2231_v23, %v10580_v27  ;;  %v10589_v27 = vld [vmem:[#allocation84_spill] sm:$0xff] }
 0x35e   :  { %1837 = vrot.lane.b32.xlu0 %v10573_v44, %s4399_s1  ;;  %v2361_v20 = vsel %vm2330_vm6, %v2296_v46, %v6673_v49 }
 0x35f   :  { %v2000_v59 = vpop.permute.xlu1 %1999 }
 0x360   :  { %v2619_v15 = vsel %vm2590_vm10, %v2554_v28, %v2000_v59  ;;  %v1810_v32 = vpop.permute.xlu0 %1809  ;;  %v10585_v28 = vld [vmem:[#allocation262_spill] sm:$0xff] }
 0x361   :  { %2029 = vrot.lane.b32.xlu1 %v10576_v47, %s4400_s13  ;;  %4191 = vmatprep.mubr.msk.f32.mxu0 %vm2667_vm11, %v2619_v15  ;;  %v2555_v41 = vsel %vm2525_vm9, %v2490_v63, %v1810_v32 }
 0x362   :  { %1455 = vrot.lane.b32.xlu0 %v10571_v26, %s4397_s8  ;;  %v2167_v26 = vsel %vm2135_vm3, %v7112_v50, %v10581_v33  ;;  %v10586_v50 = vld [vmem:[#allocation298_spill] sm:$0xff] }
 0x363   :  { %v2002_v37 = vpop.permute.xlu1 %2001  ;;  %v2232_v44 = vsel %vm2200_vm4, %v2167_v26, %v10583_v5  ;;  %v10591_v33 = vld [vmem:[#allocation266_spill] sm:$0xff] }
 0x364   :  { %v2620_v7 = vsel %vm2590_vm10, %v2555_v41, %v2002_v37  ;;  %v1428_v1 = vpop.permute.xlu0 %1427  ;;  %v2297_v49 = vsel %vm2265_vm5, %v2232_v44, %v10585_v28  ;;  %v4352_v44 = vld [vmem:[%s9603_s0 + $0x1b8] sm:$0xff] }
 0x365   :  { %1647 = vrot.lane.b32.xlu1 %v7605_v48, %s4398_s12  ;;  %4192 = vmatmul.mubr.msk.f32.gmra.mrb[28].mxu0 %vm2667_vm11, %v2620_v7  ;;  %v2426_v60 = vsel %vm2395_vm7, %v2361_v20, %v1428_v1  ;;  %v2362_v3 = vsel %vm2330_vm6, %v2297_v49, %v10586_v50  ;;  %v10593_v49 = vld [vmem:[#allocation81_spill] sm:$0xff] }
 0x366   :  { %1457 = vrot.lane.b32.xlu0 %v10576_v47, %s4397_s8  ;;  %v10587_v47 = vld [vmem:[#allocation168_spill] sm:$0xff] }
 0x367   :  { %v1620_v40 = vpop.permute.xlu1 %1619 }
 0x368   :  { %v1430_v39 = vpop.permute.xlu0 %1429  ;;  %v7612_v34 = vpop.f32.mrb[2].mxu0  ;;  %v2491_v25 = vsel %vm2460_vm8, %v2426_v60, %v1620_v40  ;;  %v7663_v40 = vld [vmem:[%s9603_s0 + $0x288] sm:$0xff] }
 0x369   :  { %1839 = vrot.lane.b32.xlu1 %v10578_v30, %s4399_s1  ;;  %v7619_v35 = vpop.f32.mrb[3].mxu0  ;;  %v2427_v55 = vsel %vm2395_vm7, %v2362_v3, %v1430_v39  ;;  %v4350_v30 = vld [vmem:[%s9603_s0 + $0x1b0] sm:$0xff]  ;;  %v10596_v3 = vld [vmem:[#allocation264_spill] sm:$0xff] }
 0x36a   :  { %1649 = vrot.lane.b32.xlu0 %v7626_v36, %s4398_s12  ;;  %v2168_v23 = vsel %vm2135_vm3, %v4350_v30, %v10588_v29 }
 0x36b   :  { %v1812_v4 = vpop.permute.xlu1 %1811 }
 0x36c   :  { %v1622_v21 = vpop.permute.xlu0 %1621  ;;  %v2556_v59 = vsel %vm2525_vm9, %v2491_v25, %v1812_v4  ;;  %v10590_v4 = vld [vmem:[#allocation223_spill] sm:$0xff]  ;;  %v10592_v25 = vld [vmem:[#allocation153_spill] sm:$0xff] }
 0x36d   :  { %2031 = vrot.lane.b32.xlu1 %v10582_v57, %s4400_s13  ;;  %v2492_v63 = vsel %vm2460_vm8, %v2427_v55, %v1622_v21  ;;  %v2233_v20 = vsel %vm2200_vm4, %v2168_v23, %v10590_v4  ;;  %v7686_v21 = vld [vmem:[%s9603_s0 + $0x290] sm:$0xff] }
 0x36e   :  { %1841 = vrot.lane.b32.xlu0 %v10584_v6, %s4399_s1  ;;  %v2298_v26 = vsel %vm2265_vm5, %v2233_v20, %v10591_v33  ;;  %v2169_v6 = vsel %vm2135_vm3, %v4352_v44, %v10592_v25  ;;  %v4354_v20 = vld [vmem:[%s9603_s0 + $0x1c8] sm:$0xff]  ;;  %v10598_v33 = vld [vmem:[#allocation159_spill] sm:$0xff] }
 0x36f   :  { %v2004_v16 = vpop.permute.xlu1 %2003  ;;  %v7748_v25 = vld [vmem:[%s9603_s0 + $0x2a8] sm:$0xff] }
 0x370   :  { %v2621_v15 = vsel %vm2590_vm10, %v2556_v59, %v2004_v16  ;;  %v1814_v32 = vpop.permute.xlu0 %1813  ;;  %v10594_v59 = vld [vmem:[#allocation222_spill] sm:$0xff] }
 0x371   :  { %2033 = vrot.lane.b32.xlu1 %v10587_v47, %s4400_s13  ;;  %4194 = vmatprep.mubr.msk.f32.mxu0 %vm2667_vm11, %v2621_v15  ;;  %v2557_v41 = vsel %vm2525_vm9, %v2492_v63, %v1814_v32  ;;  %v2234_v16 = vsel %vm2200_vm4, %v2169_v6, %v10594_v59  ;;  %v10601_v6 = vld [vmem:[#allocation268_spill] sm:$0xff] }
 0x372   :  { %1459 = vrot.lane.b32.xlu0 %v10582_v57, %s4397_s8  ;;  %v2363_v57 = vsel %vm2330_vm6, %v2298_v26, %v6681_v2  ;;  %v10595_v2 = vld [vmem:[#allocation83_spill] sm:$0xff]  ;;  %v2299_v15 = vsel %vm2265_vm5, %v2234_v16, %v10596_v3  ;;  %v2170_v26 = vsel %vm2135_vm3, %v4354_v20, %v10598_v33  ;;  %v10607_v20 = vld [vmem:[#allocation170_spill] sm:$0xff] }
 0x373   :  { %v2006_v37 = vpop.permute.xlu1 %2005 }
 0x374   :  { %v2622_v7 = vsel %vm2590_vm10, %v2557_v41, %v2006_v37  ;;  %v1432_v1 = vpop.permute.xlu0 %1431 }
 0x375   :  { %1651 = vrot.lane.b32.xlu1 %v7663_v40, %s4398_s12  ;;  %4195 = vmatmul.mubr.msk.f32.gmra.mrb[30].mxu0 %vm2667_vm11, %v2622_v7  ;;  %v2428_v28 = vsel %vm2395_vm7, %v2363_v57, %v1432_v1  ;;  %v10597_v7 = vld [vmem:[#allocation169_spill] sm:$0xff] }
 0x376   :  { %1461 = vrot.lane.b32.xlu0 %v10587_v47, %s4397_s8  ;;  %v2364_v47 = vsel %vm2330_vm6, %v2299_v15, %v6679_v19 }
 0x377   :  { %v1624_v39 = vpop.permute.xlu1 %1623 }
 0x378   :  { %v1434_v13 = vpop.permute.xlu0 %1433  ;;  %v7670_v17 = vpop.f32.mrb[4].mxu0  ;;  %v2493_v50 = vsel %vm2460_vm8, %v2428_v28, %v1624_v39 }
 0x379   :  { %1843 = vrot.lane.b32.xlu1 %v10589_v27, %s4399_s1  ;;  %v7679_v46 = vpop.f32.mrb[5].mxu0  ;;  %v2429_v37 = vsel %vm2395_vm7, %v2364_v47, %v1434_v13  ;;  %v7725_v13 = vld [vmem:[%s9603_s0 + $0x2a0] sm:$0xff] }
 0x37a   :  { %1653 = vrot.lane.b32.xlu0 %v7686_v21, %s4398_s12 }
 0x37b   :  { %v1816_v60 = vpop.permute.xlu1 %1815 }
 0x37c   :  { %v1626_v5 = vpop.permute.xlu0 %1625  ;;  %v2558_v32 = vsel %vm2525_vm9, %v2493_v50, %v1816_v60  ;;  %v10599_v60 = vld [vmem:[#allocation89_spill] sm:$0xff]  ;;  %v4356_v50 = vld [vmem:[%s9603_s0 + $0x1d0] sm:$0xff] }
 0x37d   :  { %2035 = vrot.lane.b32.xlu1 %v10593_v49, %s4400_s13  ;;  %v2494_v1 = vsel %vm2460_vm8, %v2429_v37, %v1626_v5  ;;  %v10600_v5 = vld [vmem:[#allocation225_spill] sm:$0xff] }
 0x37e   :  { %1845 = vrot.lane.b32.xlu0 %v10595_v2, %s4399_s1  ;;  %v2235_v44 = vsel %vm2200_vm4, %v2170_v26, %v10600_v5  ;;  %v10602_v2 = vld [vmem:[#allocation157_spill] sm:$0xff] }
 0x37f   :  { %v2008_v55 = vpop.permute.xlu1 %2007  ;;  %v2300_v28 = vsel %vm2265_vm5, %v2235_v44, %v10601_v6  ;;  %v2171_v3 = vsel %vm2135_vm3, %v4356_v50, %v10602_v2  ;;  %v10610_v50 = vld [vmem:[#allocation227_spill] sm:$0xff] }
 0x380   :  { %v1818_v63 = vpop.permute.xlu0 %1817  ;;  %v2623_v41 = vsel %vm2590_vm10, %v2558_v32, %v2008_v55  ;;  %v2365_v59 = vsel %vm2330_vm6, %v2300_v28, %v6689_v0  ;;  %v10603_v32 = vld [vmem:[#allocation86_spill] sm:$0xff]  ;;  %v10604_v55 = vld [vmem:[#allocation224_spill] sm:$0xff] }
 0x381   :  { %2037 = vrot.lane.b32.xlu1 %v10597_v7, %s4400_s13  ;;  %4197 = vmatprep.mubr.msk.f32.mxu1 %vm2667_vm11, %v2623_v41  ;;  %v2559_v39 = vsel %vm2525_vm9, %v2494_v1, %v1818_v63  ;;  %v2236_v47 = vsel %vm2200_vm4, %v2171_v3, %v10604_v55  ;;  %v10605_v0 = vld [vmem:[#allocation88_spill] sm:$0xff]  ;;  %v10606_v41 = vld [vmem:[#allocation267_spill] sm:$0xff]  ;;  %v10608_v28 = vld [vmem:[#allocation34_spill] sm:$0xff] }
 0x382   :  { %1463 = vrot.lane.b32.xlu0 %v10593_v49, %s4397_s8  ;;  %v2301_v37 = vsel %vm2265_vm5, %v2236_v47, %v10606_v41  ;;  %v7808_v3 = vld [vmem:[%s9603_s0 + $0x2c0] sm:$0xff] }
 0x383   :  { %v2010_v30 = vpop.permute.xlu1 %2009 }
 0x384   :  { %v2624_v19 = vsel %vm2590_vm10, %v2559_v39, %v2010_v30  ;;  %v1436_v29 = vpop.permute.xlu0 %1435  ;;  %v2366_v39 = vsel %vm2330_vm6, %v2301_v37, %v6687_v11  ;;  %v10613_v37 = vld [vmem:[#allocation91_spill] sm:$0xff] }
 0x385   :  { %1655 = vrot.lane.b32.xlu1 %v7725_v13, %s4398_s12  ;;  %4198 = vmatmul.mubr.msk.f32.vlgmr.msra.gmra.mrb[0].mxu1 %vm2667_vm11, %v2624_v19  ;;  %v2430_v15 = vsel %vm2395_vm7, %v2365_v59, %v1436_v29  ;;  %v10609_v59 = vld [vmem:[#allocation94_spill] sm:$0xff] }
 0x386   :  { %1465 = vrot.lane.b32.xlu0 %v10597_v7, %s4397_s8 }
 0x387   :  { %v1628_v23 = vpop.permute.xlu1 %1627 }
 0x388   :  { %v1438_v27 = vpop.permute.xlu0 %1437  ;;  %v7732_v4 = vpop.f32.mrb[6].mxu0  ;;  %v2495_v63 = vsel %vm2460_vm8, %v2430_v15, %v1628_v23  ;;  %v10611_v15 = vld [vmem:[#allocation269_spill] sm:$0xff] }
 0x389   :  { %1847 = vrot.lane.b32.xlu1 %v10599_v60, %s4399_s1  ;;  %v7741_v57 = vpop.f32.mrb[7].mxu0  ;;  %v2431_v29 = vsel %vm2395_vm7, %v2366_v39, %v1438_v27  ;;  %v7787_v27 = vld [vmem:[%s9603_s0 + $0x2b8] sm:$0xff] }
 0x38a   :  { %1657 = vrot.lane.b32.xlu0 %v7748_v25, %s4398_s12 }
 0x38b   :  { %v1820_v49 = vpop.permute.xlu1 %1819 }
 0x38c   :  { %v1630_v16 = vpop.permute.xlu0 %1629  ;;  %v2560_v7 = vsel %vm2525_vm9, %v2495_v63, %v1820_v49  ;;  %v2172_v49 = vsel %vm2135_vm3, %v7257_v18, %v10608_v28  ;;  %v10612_v63 = vld [vmem:[#allocation33_spill] sm:$0xff] }
 0x38d   :  { %2039 = vrot.lane.b32.xlu1 %v10603_v32, %s4400_s13  ;;  %v2496_v23 = vsel %vm2460_vm8, %v2431_v29, %v1630_v16  ;;  %v2237_v2 = vsel %vm2200_vm4, %v2172_v49, %v10610_v50 }
 0x38e   :  { %1849 = vrot.lane.b32.xlu0 %v10605_v0, %s4399_s1  ;;  %v2173_v0 = vsel %vm2135_vm3, %v7276_v52, %v10612_v63  ;;  %v10617_v52 = vld [vmem:[#allocation299_spill] sm:$0xff] }
 0x38f   :  { %v2012_v1 = vpop.permute.xlu1 %2011 }
 0x390   :  { %v2625_v30 = vsel %vm2590_vm10, %v2560_v7, %v2012_v1  ;;  %v1822_v19 = vpop.permute.xlu0 %1821  ;;  %v10614_v7 = vld [vmem:[#allocation226_spill] sm:$0xff] }
 0x391   :  { %2041 = vrot.lane.b32.xlu1 %v10607_v20, %s4400_s13  ;;  %4200 = vmatprep.mubr.msk.f32.mxu1 %vm2667_vm11, %v2625_v30  ;;  %v2561_v33 = vsel %vm2525_vm9, %v2496_v23, %v1822_v19  ;;  %v2238_v1 = vsel %vm2200_vm4, %v2173_v0, %v10614_v7  ;;  %v10615_v30 = vld [vmem:[#allocation93_spill] sm:$0xff]  ;;  %v10616_v19 = vld [vmem:[#allocation36_spill] sm:$0xff]  ;;  %v10622_v7 = vld [vmem:[#allocation271_spill] sm:$0xff] }
 0x392   :  { %1467 = vrot.lane.b32.xlu0 %v10603_v32, %s4397_s8  ;;  %v2302_v32 = vsel %vm2265_vm5, %v2237_v2, %v10611_v15  ;;  %v10621_v0 = vld [vmem:[#allocation229_spill] sm:$0xff] }
 0x393   :  { %v2014_v26 = vpop.permute.xlu1 %2013  ;;  %v2367_v55 = vsel %vm2330_vm6, %v2302_v32, %v6697_v53  ;;  %v2303_v53 = vsel %vm2265_vm5, %v2238_v1, %v10616_v19  ;;  %v10623_v19 = vld [vmem:[#allocation37_spill] sm:$0xff] }
 0x394   :  { %v2626_v11 = vsel %vm2590_vm10, %v2561_v33, %v2014_v26  ;;  %v1440_v60 = vpop.permute.xlu0 %1439  ;;  %v2368_v23 = vsel %vm2330_vm6, %v2303_v53, %v10617_v52  ;;  %v2175_v53 = vsel %vm2135_vm3, %v7334_v56, %v10623_v19  ;;  %v10625_v52 = vld [vmem:[#allocation228_spill] sm:$0xff]  ;;  %v10631_v19 = vld [vmem:[#allocation105_spill] sm:$0xff] }
 0x395   :  { %1659 = vrot.lane.b32.xlu1 %v7787_v27, %s4398_s12  ;;  %4201 = vmatmul.mubr.msk.f32.gmra.mrb[2].mxu1 %vm2667_vm11, %v2626_v11  ;;  %v2432_v41 = vsel %vm2395_vm7, %v2367_v55, %v1440_v60  ;;  %v10618_v60 = vld [vmem:[#allocation171_spill] sm:$0xff]  ;;  %v10628_v56 = vld [vmem:[#allocation300_spill] sm:$0xff] }
 0x396   :  { %1469 = vrot.lane.b32.xlu0 %v10607_v20, %s4397_s8 }
 0x397   :  { %v1632_v5 = vpop.permute.xlu1 %1631 }
 0x398   :  { %v1442_v44 = vpop.permute.xlu0 %1441  ;;  %v7794_v6 = vpop.f32.mrb[8].mxu0  ;;  %v2497_v39 = vsel %vm2460_vm8, %v2432_v41, %v1632_v5 }
 0x399   :  { %1851 = vrot.lane.b32.xlu1 %v10609_v59, %s4399_s1  ;;  %v7801_v16 = vpop.f32.mrb[9].mxu0  ;;  %v2433_v11 = vsel %vm2395_vm7, %v2368_v23, %v1442_v44  ;;  %v7845_v44 = vld [vmem:[%s9603_s0 + $0x2d0] sm:$0xff]  ;;  %v2240_v23 = vsel %vm2200_vm4, %v2175_v53, %v10625_v52 }
 0x39a   :  { %1661 = vrot.lane.b32.xlu0 %v7808_v3, %s4398_s12  ;;  %v7924_v52 = vld [vmem:[%s9603_s0 + $0x2f0] sm:$0xff] }
 0x39b   :  { %v1824_v18 = vpop.permute.xlu1 %1823 }
 0x39c   :  { %v1634_v47 = vpop.permute.xlu0 %1633  ;;  %v2562_v29 = vsel %vm2525_vm9, %v2497_v39, %v1824_v18  ;;  %v10619_v18 = vld [vmem:[#allocation38_spill] sm:$0xff] }
 0x39d   :  { %2043 = vrot.lane.b32.xlu1 %v10613_v37, %s4400_s13  ;;  %v2498_v5 = vsel %vm2460_vm8, %v2433_v11, %v1634_v47  ;;  %v2174_v55 = vsel %vm2135_vm3, %v7315_v43, %v10619_v18  ;;  %v10620_v47 = vld [vmem:[#allocation99_spill] sm:$0xff]  ;;  %v10627_v11 = vld [vmem:[#allocation270_spill] sm:$0xff]  ;;  %v10629_v18 = vld [vmem:[#allocation172_spill] sm:$0xff] }
 0x39e   :  { %1853 = vrot.lane.b32.xlu0 %v10615_v30, %s4399_s1  ;;  %v2239_v41 = vsel %vm2200_vm4, %v2174_v55, %v10621_v0 }
 0x39f   :  { %v2016_v20 = vpop.permute.xlu1 %2015  ;;  %v2304_v1 = vsel %vm2265_vm5, %v2239_v41, %v10622_v7 }
 0x3a0   :  { %v2627_v33 = vsel %vm2590_vm10, %v2562_v29, %v2016_v20  ;;  %v1826_v26 = vpop.permute.xlu0 %1825  ;;  %v2369_v39 = vsel %vm2330_vm6, %v2304_v1, %v6705_v61  ;;  %v10624_v20 = vld [vmem:[#allocation96_spill] sm:$0xff]  ;;  %v2305_v61 = vsel %vm2265_vm5, %v2240_v23, %v10627_v11 }
 0x3a1   :  { %2045 = vrot.lane.b32.xlu1 %v10618_v60, %s4400_s13  ;;  %4203 = vmatprep.mubr.msk.f32.mxu1 %vm2667_vm11, %v2627_v33  ;;  %v2563_v28 = vsel %vm2525_vm9, %v2498_v5, %v1826_v26  ;;  %v10626_v26 = vld [vmem:[#allocation98_spill] sm:$0xff]  ;;  %v10633_v23 = vld [vmem:[#allocation44_spill] sm:$0xff] }
 0x3a2   :  { %1471 = vrot.lane.b32.xlu0 %v10613_v37, %s4397_s8  ;;  %v7866_v37 = vld [vmem:[%s9603_s0 + $0x2d8] sm:$0xff] }
 0x3a3   :  { %v2018_v49 = vpop.permute.xlu1 %2017 }
 0x3a4   :  { %v2628_v59 = vsel %vm2590_vm10, %v2563_v28, %v2018_v49  ;;  %v1444_v50 = vpop.permute.xlu0 %1443  ;;  %v2370_v28 = vsel %vm2330_vm6, %v2305_v61, %v10628_v56  ;;  %v10634_v61 = vld [vmem:[#allocation40_spill] sm:$0xff]  ;;  %v10635_v56 = vld [vmem:[#allocation101_spill] sm:$0xff] }
 0x3a5   :  { %1663 = vrot.lane.b32.xlu1 %v7845_v44, %s4398_s12  ;;  %4204 = vmatmul.mubr.msk.f32.gmra.mrb[4].mxu1 %vm2667_vm11, %v2628_v59  ;;  %v2434_v29 = vsel %vm2395_vm7, %v2369_v39, %v1444_v50  ;;  %v10630_v39 = vld [vmem:[#allocation42_spill] sm:$0xff] }
 0x3a6   :  { %1473 = vrot.lane.b32.xlu0 %v10618_v60, %s4397_s8 }
 0x3a7   :  { %v1636_v2 = vpop.permute.xlu1 %1635 }
 0x3a8   :  { %v1446_v15 = vpop.permute.xlu0 %1445  ;;  %v7852_v32 = vpop.f32.mrb[10].mxu0  ;;  %v2499_v33 = vsel %vm2460_vm8, %v2434_v29, %v1636_v2  ;;  %v10632_v29 = vld [vmem:[#allocation231_spill] sm:$0xff] }
 0x3a9   :  { %1855 = vrot.lane.b32.xlu1 %v10620_v47, %s4399_s1  ;;  %v7859_v63 = vpop.f32.mrb[11].mxu0  ;;  %v2435_v50 = vsel %vm2395_vm7, %v2370_v28, %v1446_v15  ;;  %v7903_v15 = vld [vmem:[%s9603_s0 + $0x2e8] sm:$0xff] }
 0x3aa   :  { %1665 = vrot.lane.b32.xlu0 %v7866_v37, %s4398_s12  ;;  %v10636_v28 = vld [vmem:[#allocation230_spill] sm:$0xff] }
 0x3ab   :  { %v1828_v43 = vpop.permute.xlu1 %1827 }
 0x3ac   :  { %v1638_v30 = vpop.permute.xlu0 %1637  ;;  %v2564_v60 = vsel %vm2525_vm9, %v2499_v33, %v1828_v43 }
 0x3ad   :  { %2047 = vrot.lane.b32.xlu1 %v10624_v20, %s4400_s13  ;;  %v2500_v2 = vsel %vm2460_vm8, %v2435_v50, %v1638_v30  ;;  %v2176_v30 = vsel %vm2135_vm3, %v7373_v62, %v10630_v39  ;;  %v10637_v50 = vld [vmem:[#allocation103_spill] sm:$0xff]  ;;  %v10639_v39 = vld [vmem:[#allocation173_spill] sm:$0xff] }
 0x3ae   :  { %1857 = vrot.lane.b32.xlu0 %v10626_v26, %s4399_s1 }
 0x3af   :  { %v2020_v5 = vpop.permute.xlu1 %2019 }
 0x3b0   :  { %v2629_v49 = vsel %vm2590_vm10, %v2564_v60, %v2020_v5  ;;  %v1830_v59 = vpop.permute.xlu0 %1829  ;;  %v2177_v60 = vsel %vm2135_vm3, %v7392_v31, %v10634_v61 }
 0x3b1   :  { %2049 = vrot.lane.b32.xlu1 %v10629_v18, %s4400_s13  ;;  %4206 = vmatprep.mubr.msk.f32.mxu1 %vm2667_vm11, %v2629_v49  ;;  %v2565_v55 = vsel %vm2525_vm9, %v2500_v2, %v1830_v59  ;;  %v2242_v49 = vsel %vm2200_vm4, %v2177_v60, %v10636_v28  ;;  %v10642_v60 = vld [vmem:[#allocation233_spill] sm:$0xff] }
 0x3b2   :  { %1475 = vrot.lane.b32.xlu0 %v10624_v20, %s4397_s8  ;;  %v2241_v20 = vsel %vm2200_vm4, %v2176_v30, %v10632_v29  ;;  %v10643_v28 = vld [vmem:[#allocation273_spill] sm:$0xff] }
 0x3b3   :  { %v2022_v47 = vpop.permute.xlu1 %2021  ;;  %v2306_v33 = vsel %vm2265_vm5, %v2241_v20, %v10633_v23 }
 0x3b4   :  { %v2630_v0 = vsel %vm2590_vm10, %v2565_v55, %v2022_v47  ;;  %v1448_v41 = vpop.permute.xlu0 %1447  ;;  %v2371_v26 = vsel %vm2330_vm6, %v2306_v33, %v6713_v14 }
 0x3b5   :  { %1667 = vrot.lane.b32.xlu1 %v7903_v15, %s4398_s12  ;;  %4207 = vmatmul.mubr.msk.f32.gmra.mrb[6].mxu1 %vm2667_vm11, %v2630_v0  ;;  %v2436_v5 = vsel %vm2395_vm7, %v2371_v26, %v1448_v41 }
 0x3b6   :  { %1477 = vrot.lane.b32.xlu0 %v10629_v18, %s4397_s8  ;;  %v10638_v18 = vld [vmem:[#allocation43_spill] sm:$0xff] }
 0x3b7   :  { %v1640_v7 = vpop.permute.xlu1 %1639  ;;  %v2307_v14 = vsel %vm2265_vm5, %v2242_v49, %v10638_v18  ;;  %v10644_v18 = vld [vmem:[#allocation45_spill] sm:$0xff] }
 0x3b8   :  { %v1450_v1 = vpop.permute.xlu0 %1449  ;;  %v7910_v43 = vpop.f32.mrb[12].mxu0  ;;  %v2501_v59 = vsel %vm2460_vm8, %v2436_v5, %v1640_v7  ;;  %v2372_v31 = vsel %vm2330_vm6, %v2307_v14, %v6711_v42  ;;  %v2179_v14 = vsel %vm2135_vm3, %v7450_v45, %v10644_v18 }
 0x3b9   :  { %1859 = vrot.lane.b32.xlu1 %v10631_v19, %s4399_s1  ;;  %v7917_v53 = vpop.f32.mrb[13].mxu0  ;;  %v2437_v41 = vsel %vm2395_vm7, %v2372_v31, %v1450_v1  ;;  %v7961_v1 = vld [vmem:[%s9603_s0 + $0x300] sm:$0xff]  ;;  %v10646_v31 = vld [vmem:[#allocation232_spill] sm:$0xff] }
 0x3ba   :  { %1669 = vrot.lane.b32.xlu0 %v7924_v52, %s4398_s12 }
 0x3bb   :  { %v1832_v62 = vpop.permute.xlu1 %1831 }
 0x3bc   :  { %v1642_v11 = vpop.permute.xlu0 %1641  ;;  %v2566_v2 = vsel %vm2525_vm9, %v2501_v59, %v1832_v62  ;;  %v10640_v62 = vld [vmem:[#allocation47_spill] sm:$0xff] }
 0x3bd   :  { %2051 = vrot.lane.b32.xlu1 %v10635_v56, %s4400_s13  ;;  %v2502_v7 = vsel %vm2460_vm8, %v2437_v41, %v1642_v11  ;;  %v2178_v26 = vsel %vm2135_vm3, %v7431_v9, %v10640_v62  ;;  %v10641_v11 = vld [vmem:[#allocation109_spill] sm:$0xff]  ;;  %v10647_v41 = vld [vmem:[#allocation107_spill] sm:$0xff]  ;;  %v10649_v62 = vld [vmem:[#allocation174_spill] sm:$0xff] }
 0x3be   :  { %1861 = vrot.lane.b32.xlu0 %v10637_v50, %s4399_s1  ;;  %v2243_v5 = vsel %vm2200_vm4, %v2178_v26, %v10642_v60 }
 0x3bf   :  { %v2024_v55 = vpop.permute.xlu1 %2023  ;;  %v2308_v49 = vsel %vm2265_vm5, %v2243_v5, %v10643_v28 }
 0x3c0   :  { %v2631_v47 = vsel %vm2590_vm10, %v2566_v2, %v2024_v55  ;;  %v1834_v0 = vpop.permute.xlu0 %1833  ;;  %v2373_v59 = vsel %vm2330_vm6, %v2308_v49, %v6721_v51  ;;  %v10645_v55 = vld [vmem:[#allocation176_spill] sm:$0xff] }
 0x3c1   :  { %2053 = vrot.lane.b32.xlu1 %v10639_v39, %s4400_s13  ;;  %4209 = vmatprep.mubr.msk.f32.mxu1 %vm2667_vm11, %v2631_v47  ;;  %v2567_v30 = vsel %vm2525_vm9, %v2502_v7, %v1834_v0  ;;  %v2244_v47 = vsel %vm2200_vm4, %v2179_v14, %v10646_v31  ;;  %v10652_v14 = vld [vmem:[#allocation235_spill] sm:$0xff] }
 0x3c2   :  { %1479 = vrot.lane.b32.xlu0 %v10635_v56, %s4397_s8  ;;  %v7982_v56 = vld [vmem:[%s9603_s0 + $0x308] sm:$0xff]  ;;  %v10653_v31 = vld [vmem:[#allocation275_spill] sm:$0xff] }
 0x3c3   :  { %v2026_v19 = vpop.permute.xlu1 %2025 }
 0x3c4   :  { %v2632_v42 = vsel %vm2590_vm10, %v2567_v30, %v2026_v19  ;;  %v1452_v29 = vpop.permute.xlu0 %1451 }
 0x3c5   :  { %1671 = vrot.lane.b32.xlu1 %v7961_v1, %s4398_s12  ;;  %4210 = vmatmul.mubr.msk.f32.gmra.mrb[8].mxu1 %vm2667_vm11, %v2632_v42  ;;  %v2438_v2 = vsel %vm2395_vm7, %v2373_v59, %v1452_v29 }
 0x3c6   :  { %1481 = vrot.lane.b32.xlu0 %v10639_v39, %s4397_s8  ;;  %v10648_v39 = vld [vmem:[#allocation272_spill] sm:$0xff] }
 0x3c7   :  { %v1644_v20 = vpop.permute.xlu1 %1643  ;;  %v2309_v51 = vsel %vm2265_vm5, %v2244_v47, %v10648_v39  ;;  %v10654_v39 = vld [vmem:[#allocation50_spill] sm:$0xff] }
 0x3c8   :  { %v1454_v23 = vpop.permute.xlu0 %1453  ;;  %v7968_v33 = vpop.f32.mrb[14].mxu0  ;;  %v2503_v0 = vsel %vm2460_vm8, %v2438_v2, %v1644_v20  ;;  %v2374_v45 = vsel %vm2330_vm6, %v2309_v51, %v6719_v22  ;;  %v2181_v51 = vsel %vm2135_vm3, %v7508_v54, %v10654_v39  ;;  %v10659_v54 = vld [vmem:[#allocation301_spill] sm:$0xff] }
 0x3c9   :  { %1863 = vrot.lane.b32.xlu1 %v10641_v11, %s4399_s1  ;;  %v7975_v61 = vpop.f32.mrb[15].mxu0  ;;  %v2439_v29 = vsel %vm2395_vm7, %v2374_v45, %v1454_v23  ;;  %v8019_v23 = vld [vmem:[%s9603_s0 + $0x318] sm:$0xff]  ;;  %v10656_v45 = vld [vmem:[#allocation234_spill] sm:$0xff] }
 0x3ca   :  { %1673 = vrot.lane.b32.xlu0 %v7982_v56, %s4398_s12 }
 0x3cb   :  { %v1836_v9 = vpop.permute.xlu1 %1835 }
 0x3cc   :  { %v1646_v50 = vpop.permute.xlu0 %1645  ;;  %v2568_v7 = vsel %vm2525_vm9, %v2503_v0, %v1836_v9  ;;  %v10650_v9 = vld [vmem:[#allocation52_spill] sm:$0xff] }
 0x3cd   :  { %2055 = vrot.lane.b32.xlu1 %v10645_v55, %s4400_s13  ;;  %v2504_v20 = vsel %vm2460_vm8, %v2439_v29, %v1646_v50  ;;  %v2180_v59 = vsel %vm2135_vm3, %v7489_v10, %v10650_v9  ;;  %v10651_v50 = vld [vmem:[#allocation113_spill] sm:$0xff]  ;;  %v10657_v29 = vld [vmem:[#allocation111_spill] sm:$0xff] }
 0x3ce   :  { %1865 = vrot.lane.b32.xlu0 %v10647_v41, %s4399_s1  ;;  %v2245_v2 = vsel %vm2200_vm4, %v2180_v59, %v10652_v14  ;;  %v10660_v59 = vld [vmem:[#allocation178_spill] sm:$0xff] }
 0x3cf   :  { %v2028_v30 = vpop.permute.xlu1 %2027  ;;  %v2310_v47 = vsel %vm2265_vm5, %v2245_v2, %v10653_v31 }
 0x3d0   :  { %v2633_v19 = vsel %vm2590_vm10, %v2568_v7, %v2028_v30  ;;  %v1838_v42 = vpop.permute.xlu0 %1837  ;;  %v2375_v0 = vsel %vm2330_vm6, %v2310_v47, %v6729_v58  ;;  %v10655_v30 = vld [vmem:[#allocation180_spill] sm:$0xff]  ;;  %v4367_v47 = vld [vmem:[%s9603_s0 + $0x330] sm:$0xff] }
 0x3d1   :  { %2057 = vrot.lane.b32.xlu1 %v10649_v62, %s4400_s13  ;;  %4212 = vmatprep.mubr.msk.f32.mxu1 %vm2667_vm11, %v2633_v19  ;;  %v2569_v26 = vsel %vm2525_vm9, %v2504_v20, %v1838_v42  ;;  %v2246_v19 = vsel %vm2200_vm4, %v2181_v51, %v10656_v45  ;;  %v10661_v45 = vld [vmem:[#allocation57_spill] sm:$0xff] }
 0x3d2   :  { %1483 = vrot.lane.b32.xlu0 %v10645_v55, %s4397_s8  ;;  %v8040_v55 = vld [vmem:[%s9603_s0 + $0x320] sm:$0xff] }
 0x3d3   :  { %v2030_v11 = vpop.permute.xlu1 %2029 }
 0x3d4   :  { %v2634_v22 = vsel %vm2590_vm10, %v2569_v26, %v2030_v11  ;;  %v1456_v60 = vpop.permute.xlu0 %1455 }
 0x3d5   :  { %1675 = vrot.lane.b32.xlu1 %v8019_v23, %s4398_s12  ;;  %4213 = vmatmul.mubr.msk.f32.gmra.mrb[10].mxu1 %vm2667_vm11, %v2634_v22  ;;  %v2440_v7 = vsel %vm2395_vm7, %v2375_v0, %v1456_v60 }
 0x3d6   :  { %1485 = vrot.lane.b32.xlu0 %v10649_v62, %s4397_s8  ;;  %v10658_v62 = vld [vmem:[#allocation274_spill] sm:$0xff] }
 0x3d7   :  { %v1648_v5 = vpop.permute.xlu1 %1647  ;;  %v2311_v58 = vsel %vm2265_vm5, %v2246_v19, %v10658_v62  ;;  %v2182_v19 = vsel %vm2135_vm3, %v7547_v24, %v10661_v45  ;;  %v10663_v62 = vld [vmem:[#allocation237_spill] sm:$0xff]  ;;  %v10670_v45 = vld [vmem:[#allocation276_spill] sm:$0xff] }
 0x3d8   :  { %v1458_v28 = vpop.permute.xlu0 %1457  ;;  %v8026_v49 = vpop.f32.mrb[16].mxu0  ;;  %v2505_v42 = vsel %vm2460_vm8, %v2440_v7, %v1648_v5  ;;  %v2376_v11 = vsel %vm2330_vm6, %v2311_v58, %v10659_v54  ;;  %v2247_v58 = vsel %vm2200_vm4, %v2182_v19, %v10663_v62 }
 0x3d9   :  { %1867 = vrot.lane.b32.xlu1 %v10651_v50, %s4399_s1  ;;  %v8033_v18 = vpop.f32.mrb[17].mxu0  ;;  %v2441_v9 = vsel %vm2395_vm7, %v2376_v11, %v1458_v28  ;;  %v125_v28 = vld [vmem:[%s9603_s0 + $0x340] sm:$0x3] }
 0x3da   :  { %1677 = vrot.lane.b32.xlu0 %v8040_v55, %s4398_s12  ;;  %v561_v51 = vrot.slane %v125_v28, 1 }
 0x3db   :  { %v1840_v10 = vpop.permute.xlu1 %1839 }
 0x3dc   :  { %v1650_v41 = vpop.permute.xlu0 %1649  ;;  %v2570_v20 = vsel %vm2525_vm9, %v2505_v42, %v1840_v10  ;;  %v4368_v10 = vld [vmem:[%s9603_s0 + $0x338] sm:$0xff]  ;;  %v10662_v42 = vld [vmem:[#allocation294_spill] sm:$0xff] }
 0x3dd   :  { %2059 = vrot.lane.b32.xlu1 %v10655_v30, %s4400_s13  ;;  %v2506_v5 = vsel %vm2460_vm8, %v2441_v9, %v1650_v41  ;;  %v569_v0 = vrot.slane %v4368_v10, 2  ;;  %v568_v41 = vrot.slane %v4367_v47, 2  ;;  %v10667_v9 = vld [vmem:[#allocation303_spill] sm:$0xff] }
 0x3de   :  { %1869 = vrot.lane.b32.xlu0 %v10657_v29, %s4399_s1 }
 0x3df   :  { %v2032_v26 = vpop.permute.xlu1 %2031 }
 0x3e0   :  { %v2635_v22 = vsel %vm2590_vm10, %v2570_v20, %v2032_v26  ;;  %v1842_v60 = vpop.permute.xlu0 %1841  ;;  %v570_v20 = vsel %vm386_vm1, %v568_v41, %v569_v0  ;;  %v10664_v26 = vld [vmem:[#allocation277_spill] sm:$0xff] }
 0x3e1   :  { %2061 = vrot.lane.b32.xlu1 %v10660_v59, %s4400_s13  ;;  %4215 = vmatprep.mubr.msk.f32.mxu1 %vm2667_vm11, %v2635_v22  ;;  %v2571_v50 = vsel %vm2525_vm9, %v2506_v5, %v1842_v60  ;;  %v2312_v54 = vsel %vm2265_vm5, %v2247_v58, %v10664_v26  ;;  %v10665_v22 = vld [vmem:[#allocation255_spill] sm:$0xff]  ;;  %v10671_v58 = vld [vmem:[#allocation302_spill] sm:$0xff] }
 0x3e2   :  { %1487 = vrot.lane.b32.xlu0 %v10655_v30, %s4397_s8  ;;  %v10666_v60 = vrot.slane %v10665_v22, 1 }
 0x3e3   :  { %v2034_v14 = vpop.permute.xlu1 %2033 }
 0x3e4   :  { %v2636_v2 = vsel %vm2590_vm10, %v2571_v50, %v2034_v14  ;;  %v1460_v31 = vpop.permute.xlu0 %1459  ;;  %v562_v24 = vsel %vm225_vm0, %v10666_v60, %v561_v51  ;;  %v10668_v50 = vld [vmem:[#allocation55_spill] sm:$0xff]  ;;  %v571_v51 = vrot.slane %v125_v28, 2 }
 0x3e5   :  { %1679 = vrot.lane.b32.xlu1 %v4367_v47, %s4398_s12  ;;  %4216 = vmatmul.mubr.msk.f32.gmra.mrb[12].mxu1 %vm2667_vm11, %v2636_v2  ;;  %v2183_v14 = vsel %vm2135_vm3, %v7568_v12, %v10668_v50  ;;  %v10669_v47 = vld [vmem:[#allocation236_spill] sm:$0xff]  ;;  %v127_v60 = vld [vmem:[%s9603_s0 + $0x350] sm:$0xff] }
 0x3e6   :  { %1489 = vrot.lane.b32.xlu0 %v10660_v59, %s4397_s8  ;;  %v2377_v59 = vsel %vm2330_vm6, %v2312_v54, %v10667_v9 }
 0x3e7   :  { %v1652_v39 = vpop.permute.xlu1 %1651  ;;  %v2442_v2 = vsel %vm2395_vm7, %v2377_v59, %v1460_v31 }
 0x3e8   :  { %v1462_v7 = vpop.permute.xlu0 %1461  ;;  %v8087_v30 = vpop.f32.mrb[18].mxu0  ;;  %v2507_v41 = vsel %vm2460_vm8, %v2442_v2, %v1652_v39  ;;  %v572_v39 = vsel %vm386_vm1, %v569_v0, %v571_v51  ;;  %v585_v0 = vrot.slane %v127_v60, 1  ;;  %v10673_v51 = vld [vmem:[#allocation239_spill] sm:$0xff] }
 0x3e9   :  { %1871 = vrot.lane.b32.xlu1 %v10662_v42, %s4399_s1  ;;  %v8094_v29 = vpop.f32.mrb[19].mxu0 }
 0x3ea   :  { %1681 = vrot.lane.b32.xlu0 %v4368_v10, %s4398_s12  ;;  %v2248_v10 = vsel %vm2200_vm4, %v2183_v14, %v10669_v47  ;;  %v10672_v47 = vld [vmem:[#allocation62_spill] sm:$0xff] }
 0x3eb   :  { %v1844_v11 = vpop.permute.xlu1 %1843  ;;  %v2313_v19 = vsel %vm2265_vm5, %v2248_v10, %v10670_v45  ;;  %v2184_v10 = vsel %vm2135_vm3, %v7605_v48, %v10672_v47 }
 0x3ec   :  { %v1654_v5 = vpop.permute.xlu0 %1653  ;;  %v2572_v42 = vsel %vm2525_vm9, %v2507_v41, %v1844_v11  ;;  %v2378_v12 = vsel %vm2330_vm6, %v2313_v19, %v10671_v58  ;;  %v2249_v45 = vsel %vm2200_vm4, %v2184_v10, %v10673_v51  ;;  %v595_v19 = vrot.slane %v127_v60, 2  ;;  %v10674_v58 = vld [vmem:[#allocation279_spill] sm:$0xff] }
 0x3ed   :  { %2063 = vrot.lane.b32.xlu1 %v570_v20, %s4400_s13  ;;  %v2443_v54 = vsel %vm2395_vm7, %v2378_v12, %v1462_v7  ;;  %v128_v7 = vld [vmem:[%s9603_s0 + $0x358] sm:$0x3]  ;;  %v2314_v12 = vsel %vm2265_vm5, %v2249_v45, %v10674_v58 }
 0x3ee   :  { %1873 = vrot.lane.b32.xlu0 %v562_v24, %s4399_s1  ;;  %v2508_v28 = vsel %vm2460_vm8, %v2443_v54, %v1654_v5  ;;  %v587_v59 = vrot.slane %v128_v7, 1  ;;  %v10675_v54 = vld [vmem:[#allocation305_spill] sm:$0xff] }
 0x3ef   :  { %v2036_v62 = vpop.permute.xlu1 %2035 }
 0x3f0   :  { %v2637_v31 = vsel %vm2590_vm10, %v2572_v42, %v2036_v62  ;;  %v1846_v26 = vpop.permute.xlu0 %1845  ;;  %v588_v42 = vsel %vm225_vm0, %v585_v0, %v587_v59  ;;  %v597_v62 = vrot.slane %v128_v7, 2  ;;  %v10677_v7 = vld [vmem:[#allocation238_spill] sm:$0xff] }
 0x3f1   :  { %1491 = vrot.lane.b32.xlu1 %v570_v20, %s4397_s8  ;;  %4218 = vmatprep.mubr.msk.f32.mxu1 %vm2667_vm11, %v2637_v31  ;;  %v2573_v11 = vsel %vm2525_vm9, %v2508_v28, %v1846_v26  ;;  %v2379_v28 = vsel %vm2330_vm6, %v2314_v12, %v10675_v54  ;;  %v10678_v59 = vld [vmem:[#allocation278_spill] sm:$0xff] }
 0x3f2   :  { %1301 = vrot.lane.b32.xlu0 %v562_v24, %s4396_s23  ;;  %v126_v24 = vld [vmem:[%s9603_s0 + $0x348] sm:$0xff] }
 0x3f3   :  { %v2038_v22 = vpop.permute.xlu1 %2037  ;;  %v584_v50 = vrot.slane %v126_v24, 1  ;;  %v594_v31 = vrot.slane %v126_v24, 2 }
 0x3f4   :  { %v2638_v20 = vsel %vm2590_vm10, %v2573_v11, %v2038_v22  ;;  %v1464_v9 = vpop.permute.xlu0 %1463  ;;  %v10676_v11 = vld [vmem:[#allocation60_spill] sm:$0xff] }
 0x3f5   :  { %1493 = vrot.lane.b32.xlu1 %v572_v39, %s4397_s8  ;;  %4219 = vmatmul.mubr.msk.f32.gmra.mrb[14].mxu1 %vm2667_vm11, %v2638_v20  ;;  %v586_v48 = vsel %vm225_vm0, %v584_v50, %v585_v0  ;;  %v2185_v22 = vsel %vm2135_vm3, %v7626_v36, %v10676_v11  ;;  %v598_v0 = vsel %vm386_vm1, %v595_v19, %v597_v62 }
 0x3f6   :  { %2065 = vrot.lane.b32.xlu0 %v572_v39, %s4400_s13  ;;  %v2250_v20 = vsel %vm2200_vm4, %v2185_v22, %v10677_v7  ;;  %v596_v36 = vsel %vm386_vm1, %v594_v31, %v595_v19 }
 0x3f7   :  { %v1656_v5 = vpop.permute.xlu1 %1655  ;;  %v2315_v50 = vsel %vm2265_vm5, %v2250_v20, %v10678_v59 }
 0x3f8   :  { %v1466_v14 = vpop.permute.xlu0 %1465  ;;  %v8142_v2 = vpop.f32.mrb[20].mxu0 }
 0x3f9   :  { %1685 = vrot.lane.b32.xlu1 %v127_v60, %s4398_s12  ;;  %v8148_v41 = vpop.f32.mrb[21].mxu0  ;;  %v2444_v60 = vsel %vm2395_vm7, %v2379_v28, %v1464_v9  ;;  %v10679_v9 = vld [vmem:[#allocation304_spill] sm:$0xff] }
 0x3fa   :  { %1683 = vrot.lane.b32.xlu0 %v126_v24, %s4398_s12  ;;  %v2509_v24 = vsel %vm2460_vm8, %v2444_v60, %v1656_v5  ;;  %v2380_v51 = vsel %vm2330_vm6, %v2315_v50, %v10679_v9  ;;  %v10682_v60 = vld [vmem:[#allocation281_spill] sm:$0xff] }
 0x3fb   :  { %v1848_v26 = vpop.permute.xlu1 %1847  ;;  %v2445_v5 = vsel %vm2395_vm7, %v2380_v51, %v1466_v14  ;;  %v10680_v14 = vld [vmem:[#allocation67_spill] sm:$0xff]  ;;  %v10684_v50 = vld [vmem:[#allocation65_spill] sm:$0xff]  ;;  %v10686_v51 = vld [vmem:[#allocation280_spill] sm:$0xff] }
 0x3fc   :  { %v1658_v39 = vpop.permute.xlu0 %1657  ;;  %v2574_v47 = vsel %vm2525_vm9, %v2509_v24, %v1848_v26  ;;  %v2186_v28 = vsel %vm2135_vm3, %v7663_v40, %v10680_v14  ;;  %v10683_v24 = vld [vmem:[#allocation307_spill] sm:$0xff]  ;;  %v10685_v40 = vld [vmem:[#allocation240_spill] sm:$0xff] }
 0x3fd   :  { %1877 = vrot.lane.b32.xlu1 %v588_v42, %s4399_s1  ;;  %v2510_v62 = vsel %vm2460_vm8, %v2445_v5, %v1658_v39  ;;  %v10681_v39 = vld [vmem:[#allocation241_spill] sm:$0xff] }
 0x3fe   :  { %1875 = vrot.lane.b32.xlu0 %v586_v48, %s4399_s1  ;;  %v2251_v22 = vsel %vm2200_vm4, %v2186_v28, %v10681_v39 }
 0x3ff   :  { %v2040_v10 = vpop.permute.xlu1 %2039  ;;  %v2316_v7 = vsel %vm2265_vm5, %v2251_v22, %v10682_v60 }
 0x400   :  { %v2639_v45 = vsel %vm2590_vm10, %v2574_v47, %v2040_v10  ;;  %v1850_v42 = vpop.permute.xlu0 %1849  ;;  %v2187_v47 = vsel %vm2135_vm3, %v7686_v21, %v10684_v50  ;;  %v10690_v50 = vld [vmem:[#allocation283_spill] sm:$0xff] }
 0x401   :  { %2069 = vrot.lane.b32.xlu1 %v598_v0, %s4400_s13  ;;  %4221 = vmatprep.mubr.msk.f32.mxu1 %vm2667_vm11, %v2639_v45  ;;  %v2575_v58 = vsel %vm2525_vm9, %v2510_v62, %v1850_v42  ;;  %v2381_v0 = vsel %vm2330_vm6, %v2316_v7, %v10683_v24  ;;  %v10687_v62 = vld [vmem:[#allocation306_spill] sm:$0xff] }
 0x402   :  { %2067 = vrot.lane.b32.xlu0 %v596_v36, %s4400_s13  ;;  %v2252_v36 = vsel %vm2200_vm4, %v2187_v47, %v10685_v40  ;;  %v10691_v40 = vld [vmem:[#allocation309_spill] sm:$0xff] }
 0x403   :  { %v2042_v12 = vpop.permute.xlu1 %2041  ;;  %v2317_v45 = vsel %vm2265_vm5, %v2252_v36, %v10686_v51  ;;  %v10692_v51 = vld [vmem:[#allocation70_spill] sm:$0xff] }
 0x404   :  { %v2640_v19 = vsel %vm2590_vm10, %v2575_v58, %v2042_v12  ;;  %v1468_v31 = vpop.permute.xlu0 %1467  ;;  %v2382_v58 = vsel %vm2330_vm6, %v2317_v45, %v10687_v62  ;;  %v2189_v45 = vsel %vm2135_vm3, %v7748_v25, %v10692_v51  ;;  %v10698_v51 = vld [vmem:[#allocation285_spill] sm:$0xff] }
 0x405   :  { %4222 = vmatmul.mubr.msk.f32.gmra.mrb[16].mxu1 %vm2667_vm11, %v2640_v19  ;;  %v2446_v10 = vsel %vm2395_vm7, %v2381_v0, %v1468_v31  ;;  %v10689_v0 = vld [vmem:[#allocation243_spill] sm:$0xff] }
 0x407   :  { %v1660_v26 = vpop.permute.xlu1 %1659 }
 0x408   :  { %v1470_v48 = vpop.permute.xlu0 %1469  ;;  %v8184_v54 = vpop.f32.mrb[22].mxu0  ;;  %v2511_v9 = vsel %vm2460_vm8, %v2446_v10, %v1660_v26 }
 0x409   :  { %v8189_v11 = vpop.f32.mrb[23].mxu0  ;;  %v2447_v21 = vsel %vm2395_vm7, %v2382_v58, %v1470_v48  ;;  %v10694_v58 = vld [vmem:[#allocation282_spill] sm:$0xff] }
 0x40b   :  { %v1852_v20 = vpop.permute.xlu1 %1851 }
 0x40c   :  { %v1662_v59 = vpop.permute.xlu0 %1661  ;;  %v2576_v42 = vsel %vm2525_vm9, %v2511_v9, %v1852_v20  ;;  %v10688_v20 = vld [vmem:[#allocation72_spill] sm:$0xff] }
 0x40d   :  { %v2512_v31 = vsel %vm2460_vm8, %v2447_v21, %v1662_v59  ;;  %v2188_v48 = vsel %vm2135_vm3, %v7725_v13, %v10688_v20  ;;  %v10693_v13 = vld [vmem:[#allocation242_spill] sm:$0xff] }
 0x40e   :  { %v2253_v59 = vsel %vm2200_vm4, %v2188_v48, %v10689_v0 }
 0x40f   :  { %v2044_v5 = vpop.permute.xlu1 %2043  ;;  %v2318_v47 = vsel %vm2265_vm5, %v2253_v59, %v10690_v50 }
 0x410   :  { %v2641_v12 = vsel %vm2590_vm10, %v2576_v42, %v2044_v5  ;;  %v1854_v19 = vpop.permute.xlu0 %1853  ;;  %v2383_v36 = vsel %vm2330_vm6, %v2318_v47, %v10691_v40  ;;  %v2254_v5 = vsel %vm2200_vm4, %v2189_v45, %v10693_v13  ;;  %v10699_v13 = vld [vmem:[#allocation310_spill] sm:$0xff] }
 0x411   :  { %4224 = vmatprep.mubr.msk.f32.mxu1 %vm2667_vm11, %v2641_v12  ;;  %v2577_v26 = vsel %vm2525_vm9, %v2512_v31, %v1854_v19  ;;  %v2319_v12 = vsel %vm2265_vm5, %v2254_v5, %v10694_v58  ;;  %v10695_v31 = vld [vmem:[#allocation308_spill] sm:$0xff]  ;;  %v10700_v58 = vld [vmem:[#allocation75_spill] sm:$0xff] }
 0x413   :  { %v2046_v14 = vpop.permute.xlu1 %2045 }
 0x414   :  { %v2642_v28 = vsel %vm2590_vm10, %v2577_v26, %v2046_v14  ;;  %v1472_v39 = vpop.permute.xlu0 %1471  ;;  %v2384_v26 = vsel %vm2330_vm6, %v2319_v12, %v10695_v31  ;;  %v2191_v12 = vsel %vm2135_vm3, %v7808_v3, %v10700_v58  ;;  %v10706_v58 = vld [vmem:[#allocation287_spill] sm:$0xff] }
 0x415   :  { %4225 = vmatmul.mubr.msk.f32.gmra.mrb[18].mxu1 %vm2667_vm11, %v2642_v28  ;;  %v2448_v42 = vsel %vm2395_vm7, %v2383_v36, %v1472_v39  ;;  %v10697_v36 = vld [vmem:[#allocation245_spill] sm:$0xff] }
 0x417   :  { %v1664_v22 = vpop.permute.xlu1 %1663 }
 0x418   :  { %v1474_v60 = vpop.permute.xlu0 %1473  ;;  %v8216_v7 = vpop.f32.mrb[24].mxu0  ;;  %v2513_v62 = vsel %vm2460_vm8, %v2448_v42, %v1664_v22 }
 0x419   :  { %v8221_v24 = vpop.f32.mrb[25].mxu0  ;;  %v2449_v25 = vsel %vm2395_vm7, %v2384_v26, %v1474_v60  ;;  %v10702_v26 = vld [vmem:[#allocation284_spill] sm:$0xff] }
 0x41b   :  { %v1856_v10 = vpop.permute.xlu1 %1855 }
 0x41c   :  { %v1666_v9 = vpop.permute.xlu0 %1665  ;;  %v2578_v19 = vsel %vm2525_vm9, %v2513_v62, %v1856_v10  ;;  %v10696_v10 = vld [vmem:[#allocation77_spill] sm:$0xff] }
 0x41d   :  { %v2514_v39 = vsel %vm2460_vm8, %v2449_v25, %v1666_v9  ;;  %v2190_v60 = vsel %vm2135_vm3, %v7787_v27, %v10696_v10  ;;  %v10701_v27 = vld [vmem:[#allocation244_spill] sm:$0xff] }
 0x41e   :  { %v2255_v9 = vsel %vm2200_vm4, %v2190_v60, %v10697_v36 }
 0x41f   :  { %v2048_v21 = vpop.permute.xlu1 %2047  ;;  %v2320_v45 = vsel %vm2265_vm5, %v2255_v9, %v10698_v51 }
 0x420   :  { %v2643_v14 = vsel %vm2590_vm10, %v2578_v19, %v2048_v21  ;;  %v1858_v28 = vpop.permute.xlu0 %1857  ;;  %v2385_v5 = vsel %vm2330_vm6, %v2320_v45, %v10699_v13  ;;  %v2256_v21 = vsel %vm2200_vm4, %v2191_v12, %v10701_v27  ;;  %v10707_v27 = vld [vmem:[#allocation311_spill] sm:$0xff] }
 0x421   :  { %4227 = vmatprep.mubr.msk.f32.mxu1 %vm2667_vm11, %v2643_v14  ;;  %v2579_v22 = vsel %vm2525_vm9, %v2514_v39, %v1858_v28  ;;  %v2321_v14 = vsel %vm2265_vm5, %v2256_v21, %v10702_v26  ;;  %v10703_v39 = vld [vmem:[#allocation129_spill] sm:$0xff]  ;;  %v10708_v26 = vld [vmem:[#allocation80_spill] sm:$0xff] }
 0x423   :  { %v2050_v20 = vpop.permute.xlu1 %2049 }
 0x424   :  { %v2644_v48 = vsel %vm2590_vm10, %v2579_v22, %v2050_v20  ;;  %v1476_v0 = vpop.permute.xlu0 %1475  ;;  %v2386_v22 = vsel %vm2330_vm6, %v2321_v14, %v10703_v39  ;;  %v2193_v14 = vsel %vm2135_vm3, %v7866_v37, %v10708_v26  ;;  %v10714_v26 = vld [vmem:[#allocation289_spill] sm:$0xff] }
 0x425   :  { %4228 = vmatmul.mubr.msk.f32.gmra.mrb[20].mxu1 %vm2667_vm11, %v2644_v48  ;;  %v2450_v19 = vsel %vm2395_vm7, %v2385_v5, %v1476_v0  ;;  %v10705_v5 = vld [vmem:[#allocation247_spill] sm:$0xff] }
 0x427   :  { %v1668_v59 = vpop.permute.xlu1 %1667 }
 0x428   :  { %v1478_v50 = vpop.permute.xlu0 %1477  ;;  %v8248_v47 = vpop.f32.mrb[26].mxu0  ;;  %v2515_v31 = vsel %vm2460_vm8, %v2450_v19, %v1668_v59 }
 0x429   :  { %v8253_v40 = vpop.f32.mrb[27].mxu0  ;;  %v2451_v3 = vsel %vm2395_vm7, %v2386_v22, %v1478_v50  ;;  %v10710_v22 = vld [vmem:[#allocation286_spill] sm:$0xff] }
 0x42b   :  { %v1860_v42 = vpop.permute.xlu1 %1859 }
 0x42c   :  { %v1670_v62 = vpop.permute.xlu0 %1669  ;;  %v2580_v28 = vsel %vm2525_vm9, %v2515_v31, %v1860_v42  ;;  %v10704_v42 = vld [vmem:[#allocation82_spill] sm:$0xff] }
 0x42d   :  { %v2516_v0 = vsel %vm2460_vm8, %v2451_v3, %v1670_v62  ;;  %v2192_v50 = vsel %vm2135_vm3, %v7845_v44, %v10704_v42  ;;  %v10709_v44 = vld [vmem:[#allocation246_spill] sm:$0xff] }
 0x42e   :  { %v2257_v62 = vsel %vm2200_vm4, %v2192_v50, %v10705_v5 }
 0x42f   :  { %v2052_v25 = vpop.permute.xlu1 %2051  ;;  %v2322_v12 = vsel %vm2265_vm5, %v2257_v62, %v10706_v58 }
 0x430   :  { %v2645_v20 = vsel %vm2590_vm10, %v2580_v28, %v2052_v25  ;;  %v1862_v48 = vpop.permute.xlu0 %1861  ;;  %v2387_v21 = vsel %vm2330_vm6, %v2322_v12, %v10707_v27  ;;  %v2258_v25 = vsel %vm2200_vm4, %v2193_v14, %v10709_v44  ;;  %v10715_v44 = vld [vmem:[#allocation312_spill] sm:$0xff] }
 0x431   :  { %4230 = vmatprep.mubr.msk.f32.mxu1 %vm2667_vm11, %v2645_v20  ;;  %v2581_v59 = vsel %vm2525_vm9, %v2516_v0, %v1862_v48  ;;  %v2323_v20 = vsel %vm2265_vm5, %v2258_v25, %v10710_v22  ;;  %v10711_v0 = vld [vmem:[#allocation201_spill] sm:$0xff] }
 0x432   :  { %v10716_v22 = vld [vmem:[#allocation85_spill] sm:$0xff] }
 0x433   :  { %v2054_v10 = vpop.permute.xlu1 %2053 }
 0x434   :  { %v2646_v60 = vsel %vm2590_vm10, %v2581_v59, %v2054_v10  ;;  %v1480_v36 = vpop.permute.xlu0 %1479  ;;  %v2388_v59 = vsel %vm2330_vm6, %v2323_v20, %v10711_v0  ;;  %v2195_v20 = vsel %vm2135_vm3, %v7924_v52, %v10716_v22  ;;  %v10722_v22 = vld [vmem:[#allocation291_spill] sm:$0xff] }
 0x435   :  { %4231 = vmatmul.mubr.msk.f32.gmra.mrb[22].mxu1 %vm2667_vm11, %v2646_v60  ;;  %v2452_v28 = vsel %vm2395_vm7, %v2387_v21, %v1480_v36  ;;  %v10713_v21 = vld [vmem:[#allocation249_spill] sm:$0xff] }
 0x437   :  { %v1672_v9 = vpop.permute.xlu1 %1671 }
 0x438   :  { %v1482_v51 = vpop.permute.xlu0 %1481  ;;  %v8280_v45 = vpop.f32.mrb[28].mxu0  ;;  %v2517_v39 = vsel %vm2460_vm8, %v2452_v28, %v1672_v9 }
 0x439   :  { %v8285_v13 = vpop.f32.mrb[29].mxu0  ;;  %v2453_v37 = vsel %vm2395_vm7, %v2388_v59, %v1482_v51  ;;  %v10718_v59 = vld [vmem:[#allocation288_spill] sm:$0xff] }
 0x43b   :  { %v1864_v19 = vpop.permute.xlu1 %1863 }
 0x43c   :  { %v1674_v31 = vpop.permute.xlu0 %1673  ;;  %v2582_v48 = vsel %vm2525_vm9, %v2517_v39, %v1864_v19  ;;  %v10712_v19 = vld [vmem:[#allocation87_spill] sm:$0xff] }
 0x43d   :  { %v2518_v36 = vsel %vm2460_vm8, %v2453_v37, %v1674_v31  ;;  %v2194_v51 = vsel %vm2135_vm3, %v7903_v15, %v10712_v19  ;;  %v10717_v15 = vld [vmem:[#allocation248_spill] sm:$0xff] }
 0x43e   :  { %v2259_v31 = vsel %vm2200_vm4, %v2194_v51, %v10713_v21 }
 0x43f   :  { %v2056_v3 = vpop.permute.xlu1 %2055  ;;  %v2324_v14 = vsel %vm2265_vm5, %v2259_v31, %v10714_v26 }
 0x440   :  { %v2647_v10 = vsel %vm2590_vm10, %v2582_v48, %v2056_v3  ;;  %v1866_v60 = vpop.permute.xlu0 %1865  ;;  %v2389_v25 = vsel %vm2330_vm6, %v2324_v14, %v10715_v44  ;;  %v2260_v3 = vsel %vm2200_vm4, %v2195_v20, %v10717_v15  ;;  %v10723_v15 = vld [vmem:[#allocation313_spill] sm:$0xff] }
 0x441   :  { %4233 = vmatprep.mubr.msk.f32.mxu1 %vm2667_vm11, %v2647_v10  ;;  %v2583_v9 = vsel %vm2525_vm9, %v2518_v36, %v1866_v60  ;;  %v2325_v10 = vsel %vm2265_vm5, %v2260_v3, %v10718_v59  ;;  %v10719_v36 = vld [vmem:[#allocation200_spill] sm:$0xff] }
 0x443   :  { %v2058_v42 = vpop.permute.xlu1 %2057 }
 0x444   :  { %v2648_v50 = vsel %vm2590_vm10, %v2583_v9, %v2058_v42  ;;  %v1484_v5 = vpop.permute.xlu0 %1483  ;;  %v2390_v9 = vsel %vm2330_vm6, %v2325_v10, %v10719_v36 }
 0x445   :  { %4234 = vmatmul.mubr.msk.f32.gmra.mrb[24].mxu1 %vm2667_vm11, %v2648_v50  ;;  %v2454_v48 = vsel %vm2395_vm7, %v2389_v25, %v1484_v5  ;;  %v10721_v25 = vld [vmem:[#allocation251_spill] sm:$0xff] }
 0x447   :  { %v1676_v62 = vpop.permute.xlu1 %1675 }
 0x448   :  { %v1486_v58 = vpop.permute.xlu0 %1485  ;;  %v8312_v12 = vpop.f32.mrb[30].mxu0  ;;  %v2519_v0 = vsel %vm2460_vm8, %v2454_v48, %v1676_v62 }
 0x449   :  { %v8317_v27 = vpop.f32.mrb[31].mxu0  ;;  %v2455_v52 = vsel %vm2395_vm7, %v2390_v9, %v1486_v58  ;;  %v10724_v9 = vld [vmem:[#allocation90_spill] sm:$0xff] }
 0x44b   :  { %v1868_v28 = vpop.permute.xlu1 %1867 }
 0x44c   :  { %v1678_v39 = vpop.permute.xlu0 %1677  ;;  %v2584_v60 = vsel %vm2525_vm9, %v2519_v0, %v1868_v28  ;;  %v10720_v28 = vld [vmem:[#allocation92_spill] sm:$0xff] }
 0x44d   :  { %v2520_v5 = vsel %vm2460_vm8, %v2455_v52, %v1678_v39  ;;  %v2196_v58 = vsel %vm2135_vm3, %v7961_v1, %v10720_v28 }
 0x44e   :  { %v2261_v39 = vsel %vm2200_vm4, %v2196_v58, %v10721_v25 }
 0x44f   :  { %v2060_v37 = vpop.permute.xlu1 %2059  ;;  %v2326_v20 = vsel %vm2265_vm5, %v2261_v39, %v10722_v22 }
 0x450   :  { %v2649_v42 = vsel %vm2590_vm10, %v2584_v60, %v2060_v37  ;;  %v1870_v50 = vpop.permute.xlu0 %1869  ;;  %v2391_v3 = vsel %vm2330_vm6, %v2326_v20, %v10723_v15 }
 0x451   :  { %4236 = vmatprep.mubr.msk.f32.mxu1 %vm2667_vm11, %v2649_v42  ;;  %v2585_v62 = vsel %vm2525_vm9, %v2520_v5, %v1870_v50  ;;  %v2197_v42 = vsel %vm2135_vm3, %v7982_v56, %v10724_v9  ;;  %v10725_v50 = vld [vmem:[#allocation250_spill] sm:$0xff]  ;;  %v10732_v9 = vld [vmem:[#allocation292_spill] sm:$0xff] }
 0x452   :  { %v2262_v52 = vsel %vm2200_vm4, %v2197_v42, %v10725_v50 }
 0x453   :  { %v2062_v19 = vpop.permute.xlu1 %2061 }
 0x454   :  { %v2650_v51 = vsel %vm2590_vm10, %v2585_v62, %v2062_v19  ;;  %v1488_v21 = vpop.permute.xlu0 %1487  ;;  %v10726_v62 = vld [vmem:[#allocation290_spill] sm:$0xff] }
 0x455   :  { %4237 = vmatmul.mubr.msk.f32.gmra.mrb[26].mxu1 %vm2667_vm11, %v2650_v51  ;;  %v2456_v59 = vsel %vm2395_vm7, %v2391_v3, %v1488_v21  ;;  %v2327_v19 = vsel %vm2265_vm5, %v2262_v52, %v10726_v62  ;;  %v10727_v21 = vld [vmem:[#allocation134_spill] sm:$0xff]  ;;  %v10733_v52 = vld [vmem:[#allocation293_spill] sm:$0xff] }
 0x457   :  { %v1680_v31 = vpop.permute.xlu1 %1679 }
 0x458   :  { %v1490_v26 = vpop.permute.xlu0 %1489  ;;  %v8344_v14 = vpop.f32.mrb[0].mxu1  ;;  %v2521_v10 = vsel %vm2460_vm8, %v2456_v59, %v1680_v31  ;;  %v2392_v31 = vsel %vm2330_vm6, %v2327_v19, %v10727_v21  ;;  %v10728_v59 = vld [vmem:[#allocation95_spill] sm:$0xff]  ;;  %v10734_v21 = vld [vmem:[#allocation132_spill] sm:$0xff] }
 0x459   :  { %v8349_v44 = vpop.f32.mrb[1].mxu1  ;;  %v2457_v28 = vsel %vm2395_vm7, %v2392_v31, %v1490_v26  ;;  %v2199_v26 = vsel %vm2135_vm3, %v8040_v55, %v10728_v59 }
 0x45b   :  { %v1872_v48 = vpop.permute.xlu1 %1871 }
 0x45c   :  { %v1682_v0 = vpop.permute.xlu0 %1681  ;;  %v2586_v60 = vsel %vm2525_vm9, %v2521_v10, %v1872_v48  ;;  %v10729_v10 = vld [vmem:[#allocation97_spill] sm:$0xff] }
 0x45d   :  { %v2522_v58 = vsel %vm2460_vm8, %v2457_v28, %v1682_v0  ;;  %v2198_v0 = vsel %vm2135_vm3, %v8019_v23, %v10729_v10 }
 0x45f   :  { %v2064_v1 = vpop.permute.xlu1 %2063 }
 0x460   :  { %v2651_v37 = vsel %vm2590_vm10, %v2586_v60, %v2064_v1  ;;  %v1874_v36 = vpop.permute.xlu0 %1873  ;;  %v10730_v60 = vld [vmem:[#allocation252_spill] sm:$0xff] }
 0x461   :  { %4239 = vmatprep.mubr.msk.f32.mxu1 %vm2667_vm11, %v2651_v37  ;;  %v2587_v39 = vsel %vm2525_vm9, %v2522_v58, %v1874_v36  ;;  %v2264_v1 = vsel %vm2200_vm4, %v2199_v26, %v10730_v60  ;;  %v10731_v37 = vld [vmem:[#allocation253_spill] sm:$0xff] }
 0x462   :  { %v2263_v36 = vsel %vm2200_vm4, %v2198_v0, %v10731_v37  ;;  %v2329_v42 = vsel %vm2265_vm5, %v2264_v1, %v10732_v9 }
 0x463   :  { %v1492_v5 = vpop.permute.xlu1 %1491  ;;  %v2328_v62 = vsel %vm2265_vm5, %v2263_v36, %v10733_v52 }
 0x464   :  { %v1302_v51 = vpop.permute.xlu0 %1301  ;;  %v2393_v31 = vsel %vm2330_vm6, %v2328_v62, %v10734_v21 }
 0x465   :  { %v2394_v19 = vsel %vm2330_vm6, %v2329_v42, %v1302_v51  ;;  %v2458_v28 = vsel %vm2395_vm7, %v2393_v31, %v1492_v5 }
 0x467   :  { %v1494_v25 = vpop.permute.xlu1 %1493 }
 0x468   :  { %v2066_v22 = vpop.permute.xlu0 %2065  ;;  %v8374_v56 = vpop.f32.mrb[2].mxu1  ;;  %v2459_v23 = vsel %vm2395_vm7, %v2394_v19, %v1494_v25 }
 0x469   :  { %v2652_v20 = vsel %vm2590_vm10, %v2587_v39, %v2066_v22  ;;  %v8377_v48 = vpop.f32.mrb[3].mxu1 }
 0x46a   :  { %4240 = vmatmul.mubr.msk.f32.gmra.mrb[28].mxu1 %vm2667_vm11, %v2652_v20 }
 0x46b   :  { %v1686_v15 = vpop.permute.xlu1 %1685 }
 0x46c   :  { %v1684_v3 = vpop.permute.xlu0 %1683  ;;  %v2524_v58 = vsel %vm2460_vm8, %v2459_v23, %v1686_v15  ;;  %v8414_v15 = vld [vmem:[%s9605_s2] ss:$0 sm:$0xff] }
 0x46d   :  { %v2523_v39 = vsel %vm2460_vm8, %v2458_v28, %v1684_v3  ;;  %v8422_v60 = vadd.f32 %v7554_v38, %v8414_v15  ;;  %v8426_v1 = vadd.f32 %v8414_v15, %v7561_v8  ;;  %v8430_v37 = vadd.f32 %v8414_v15, %v7619_v35 }
 0x46e   :  { %v8440_v38 = vadd.f32 %v7612_v34, %v8414_v15  ;;  %v8444_v8 = vadd.f32 %v8414_v15, %v7679_v46  ;;  %v8454_v21 = vadd.f32 %v7670_v17, %v8414_v15  ;;  %v8458_v34 = vadd.f32 %v8414_v15, %v7741_v57 }
 0x46f   :  { %v1878_v50 = vpop.permute.xlu1 %1877  ;;  %v3250_v36 = vsel %vm2200_vm4, %v8422_v60, 0.0  ;;  %v3249_v9 = vsel %vm2200_vm4, %v8426_v1, 0.0  ;;  %v3252_v42 = vsel %vm2200_vm4, %v8430_v37, 0.0  ;;  %v8472_v17 = vadd.f32 %v8414_v15, %v7801_v16 }
 0x470   :  { %v1876_v55 = vpop.permute.xlu0 %1875  ;;  %v2589_v22 = vsel %vm2525_vm9, %v2524_v58, %v1878_v50  ;;  %v3251_v50 = vadd.f32 %v3250_v36, %v3249_v9  ;;  %v3254_v52 = vsel %vm2200_vm4, %v8440_v38, 0.0  ;;  %v3256_v62 = vsel %vm2200_vm4, %v8444_v8, 0.0 }
 0x471   :  { %v2588_v59 = vsel %vm2525_vm9, %v2523_v39, %v1876_v55  ;;  %v3258_v23 = vsel %vm2200_vm4, %v8454_v21, 0.0  ;;  %v3260_v28 = vsel %vm2200_vm4, %v8458_v34, 0.0  ;;  %v8468_v39 = vadd.f32 %v7732_v4, %v8414_v15 }
 0x472   :  { %v3253_v35 = vadd.f32 %v3252_v42, %v3251_v50  ;;  %v8484_v4 = vadd.f32 %v8414_v15, %v7859_v63  ;;  %v8500_v63 = vadd.f32 %v8414_v15, %v7917_v53 }
 0x473   :  { %v2070_v20 = vpop.permute.xlu1 %2069 }
 0x474   :  { %v2654_v26 = vsel %vm2590_vm10, %v2589_v22, %v2070_v20  ;;  %v2068_v51 = vpop.permute.xlu0 %2067  ;;  %v3255_v19 = vadd.f32 %v3254_v52, %v3253_v35  ;;  %v3262_v22 = vsel %vm2200_vm4, %v8468_v39, 0.0  ;;  %v3264_v20 = vsel %vm2200_vm4, %v8472_v17, 0.0 }
 0x475   :  { %v2653_v10 = vsel %vm2590_vm10, %v2588_v59, %v2068_v51  ;;  %v3268_v36 = vsel %vm2200_vm4, %v8484_v4, 0.0  ;;  %v3272_v52 = vsel %vm2200_vm4, %v8500_v63, 0.0 }
 0x476   :  { %4242 = vmatprep.mubr.msk.f32.mxu1 %vm2667_vm11, %v2653_v10  ;;  %v3257_v31 = vadd.f32 %v3256_v62, %v3255_v19  ;;  %v8508_v19 = vadd.f32 %v7910_v43, %v8414_v15  ;;  %v8524_v43 = vadd.f32 %v8414_v15, %v8033_v18  ;;  %v8540_v18 = vadd.f32 %v8414_v15, %v8094_v29 }
 0x477   :  { %4243 = vmatmul.mubr.msk.f32.gmra.mrb[30].mxu1 %vm2667_vm11, %v2654_v26  ;;  %v8480_v26 = vadd.f32 %v7794_v6, %v8414_v15  ;;  %v8496_v6 = vadd.f32 %v7852_v32, %v8414_v15  ;;  %v8512_v32 = vadd.f32 %v8414_v15, %v7975_v61 }
 0x478   :  { %v8407_v25 = vpop.f32.mrb[4].mxu1  ;;  %v3259_v58 = vadd.f32 %v3258_v23, %v3257_v31  ;;  %v3274_v53 = vsel %vm2200_vm4, %v8508_v19, 0.0 }
 0x479   :  { %v8409_v5 = vpop.f32.mrb[5].mxu1  ;;  %v3266_v16 = vsel %vm2200_vm4, %v8480_v26, 0.0  ;;  %v3270_v35 = vsel %vm2200_vm4, %v8496_v6, 0.0  ;;  %v3276_v23 = vsel %vm2200_vm4, %v8512_v32, 0.0 }
 0x47a   :  { %v3261_v57 = vadd.f32 %v3260_v28, %v3259_v58  ;;  %v8520_v58 = vadd.f32 %v7968_v33, %v8414_v15  ;;  %v8536_v33 = vadd.f32 %v8026_v49, %v8414_v15  ;;  %v8552_v49 = vadd.f32 %v8414_v15, %v8148_v41 }
 0x47c   :  { %v3263_v59 = vadd.f32 %v3262_v22, %v3261_v57 }
 0x47e   :  { %v3265_v51 = vadd.f32 %v3264_v20, %v3263_v59  ;;  %v3278_v20 = vsel %vm2200_vm4, %v8520_v58, 0.0  ;;  %v3280_v59 = vsel %vm2200_vm4, %v8524_v43, 0.0 }
 0x480   :  { %v3267_v42 = vadd.f32 %v3266_v16, %v3265_v51 }
 0x482   :  { %v3269_v50 = vadd.f32 %v3268_v36, %v3267_v42  ;;  %v3282_v36 = vsel %vm2200_vm4, %v8536_v33, 0.0  ;;  %v3284_v42 = vsel %vm2200_vm4, %v8540_v18, 0.0 }
 0x484   :  { %v3271_v62 = vadd.f32 %v3270_v35, %v3269_v50  ;;  %v8548_v35 = vadd.f32 %v8087_v30, %v8414_v15  ;;  %v8566_v30 = vadd.f32 %v8414_v15, %v8189_v11 }
 0x486   :  { %v3273_v31 = vadd.f32 %v3272_v52, %v3271_v62  ;;  %v3286_v29 = vsel %vm2200_vm4, %v8548_v35, 0.0  ;;  %v3288_v62 = vsel %vm2200_vm4, %v8552_v49, 0.0 }
 0x488   :  { %v8416_v3 = vpop.f32.mrb[6].mxu1  ;;  %v3275_v28 = vadd.f32 %v3274_v53, %v3273_v31 }
 0x489   :  { %v8418_v0 = vpop.f32.mrb[7].mxu1 }
 0x48a   :  { %v3277_v57 = vadd.f32 %v3276_v23, %v3275_v28  ;;  %v8562_v23 = vadd.f32 %v8142_v2, %v8414_v15  ;;  %v8580_v2 = vadd.f32 %v8414_v15, %v8221_v24 }
 0x48c   :  { %v3279_v51 = vadd.f32 %v3278_v20, %v3277_v57  ;;  %v3290_v57 = vsel %vm2200_vm4, %v8562_v23, 0.0  ;;  %v3292_v20 = vsel %vm2200_vm4, %v8566_v30, 0.0 }
 0x48e   :  { %v3281_v16 = vadd.f32 %v3280_v59, %v3279_v51  ;;  %v8576_v51 = vadd.f32 %v8184_v54, %v8414_v15  ;;  %v8592_v54 = vadd.f32 %v8414_v15, %v8253_v40  ;;  %v8608_v40 = vadd.f32 %v8414_v15, %v8285_v13 }
 0x490   :  { %v3283_v50 = vadd.f32 %v3282_v36, %v3281_v16  ;;  %v3294_v16 = vsel %vm2200_vm4, %v8576_v51, 0.0  ;;  %v3296_v36 = vsel %vm2200_vm4, %v8580_v2, 0.0 }
 0x492   :  { %v3285_v52 = vadd.f32 %v3284_v42, %v3283_v50  ;;  %v8588_v50 = vadd.f32 %v8216_v7, %v8414_v15  ;;  %v8604_v7 = vadd.f32 %v8248_v47, %v8414_v15  ;;  %v8620_v47 = vadd.f32 %v8414_v15, %v8317_v27 }
 0x494   :  { %v3287_v31 = vadd.f32 %v3286_v29, %v3285_v52  ;;  %v3298_v24 = vsel %vm2200_vm4, %v8588_v50, 0.0 }
 0x496   :  { %v3289_v28 = vadd.f32 %v3288_v62, %v3287_v31  ;;  %v3300_v62 = vsel %vm2200_vm4, %v8592_v54, 0.0 }
 0x498   :  { %v8450_v55 = vpop.f32.mrb[8].mxu1  ;;  %v3291_v59 = vadd.f32 %v3290_v57, %v3289_v28 }
 0x499   :  { %v8460_v46 = vpop.f32.mrb[9].mxu1 }
 0x49a   :  { %v3293_v11 = vadd.f32 %v3292_v20, %v3291_v59  ;;  %v3302_v20 = vsel %vm2200_vm4, %v8604_v7, 0.0  ;;  %v3304_v59 = vsel %vm2200_vm4, %v8608_v40, 0.0 }
 0x49c   :  { %v3295_v42 = vadd.f32 %v3294_v16, %v3293_v11  ;;  %v8616_v16 = vadd.f32 %v8280_v45, %v8414_v15  ;;  %v8632_v45 = vadd.f32 %v8414_v15, %v8349_v44 }
 0x49e   :  { %v3297_v52 = vadd.f32 %v3296_v36, %v3295_v42  ;;  %v3306_v13 = vsel %vm2200_vm4, %v8616_v16, 0.0  ;;  %v3308_v42 = vsel %vm2200_vm4, %v8620_v47, 0.0 }
 0x4a0   :  { %v3299_v28 = vadd.f32 %v3298_v24, %v3297_v52  ;;  %v8628_v24 = vadd.f32 %v8312_v12, %v8414_v15  ;;  %v8646_v12 = vadd.f32 %v8414_v15, %v8377_v48 }
 0x4a2   :  { %v3301_v57 = vadd.f32 %v3300_v62, %v3299_v28 }
 0x4a4   :  { %v3303_v11 = vadd.f32 %v3302_v20, %v3301_v57  ;;  %v3310_v57 = vsel %vm2200_vm4, %v8628_v24, 0.0  ;;  %v3312_v20 = vsel %vm2200_vm4, %v8632_v45, 0.0 }
 0x4a6   :  { %v3305_v36 = vadd.f32 %v3304_v59, %v3303_v11  ;;  %v8642_v11 = vadd.f32 %v8344_v14, %v8414_v15  ;;  %v8658_v14 = vadd.f32 %v8414_v15, %v8409_v5 }
 0x4a8   :  { %v8486_v10 = vpop.f32.mrb[10].mxu1  ;;  %v3307_v52 = vadd.f32 %v3306_v13, %v3305_v36  ;;  %v3314_v36 = vsel %vm2200_vm4, %v8642_v11, 0.0  ;;  %v3316_v13 = vsel %vm2200_vm4, %v8646_v12, 0.0 }
 0x4a9   :  { %v8492_v9 = vpop.f32.mrb[11].mxu1 }
 0x4aa   :  { %v3309_v62 = vadd.f32 %v3308_v42, %v3307_v52  ;;  %v8654_v52 = vadd.f32 %v8374_v56, %v8414_v15  ;;  %v8670_v56 = vadd.f32 %v8414_v15, %v8418_v0 }
 0x4ac   :  { %v3311_v59 = vadd.f32 %v3310_v57, %v3309_v62  ;;  %10735 = vst [vmem:[#allocation205_spill] sm:$0xff] %v8654_v52  ;;  %v3318_v48 = vsel %vm2200_vm4, %v8654_v52, 0.0  ;;  %v3320_v57 = vsel %vm2200_vm4, %v8658_v14, 0.0  ;;  %10736 = vst [vmem:[#allocation106_spill] sm:$0xff] %v8670_v56 }
 0x4ae   :  { %v3313_v44 = vadd.f32 %v3312_v20, %v3311_v59 }
 0x4b0   :  { %v3315_v42 = vadd.f32 %v3314_v36, %v3313_v44  ;;  %v8666_v44 = vadd.f32 %v8407_v25, %v8414_v15  ;;  %v8682_v25 = vadd.f32 %v8414_v15, %v8460_v46 }
 0x4b2   :  { %v3317_v62 = vadd.f32 %v3316_v13, %v3315_v42  ;;  %v3322_v13 = vsel %vm2200_vm4, %v8666_v44, 0.0  ;;  %v3324_v42 = vsel %vm2200_vm4, %v8670_v56, 0.0  ;;  %v8690_v56 = vadd.f32 %v8450_v55, %v8414_v15 }
 0x4b4   :  { %v3319_v20 = vadd.f32 %v3318_v48, %v3317_v62  ;;  %v8678_v62 = vadd.f32 %v8416_v3, %v8414_v15  ;;  %v8694_v3 = vadd.f32 %v8414_v15, %v8492_v9  ;;  %v3330_v46 = vsel %vm2200_vm4, %v8690_v56, 0.0 }
 0x4b6   :  { %v3321_v5 = vadd.f32 %v3320_v57, %v3319_v20  ;;  %10737 = vst [vmem:[#allocation102_spill] sm:$0xff] %v8678_v62  ;;  %v3326_v0 = vsel %vm2200_vm4, %v8678_v62, 0.0  ;;  %v3328_v57 = vsel %vm2200_vm4, %v8682_v25, 0.0  ;;  %10738 = vst [vmem:[#allocation204_spill] sm:$0xff] %v8694_v3 }
 0x4b8   :  { %v8526_v22 = vpop.f32.mrb[12].mxu1  ;;  %v3323_v52 = vadd.f32 %v3322_v13, %v3321_v5 }
 0x4b9   :  { %v8528_v61 = vpop.f32.mrb[13].mxu1 }
 0x4ba   :  { %v3325_v48 = vadd.f32 %v3324_v42, %v3323_v52  ;;  %v3332_v52 = vsel %vm2200_vm4, %v8694_v3, 0.0  ;;  %v8706_v55 = vadd.f32 %v8414_v15, %v8528_v61  ;;  %v8714_v3 = vadd.f32 %v8526_v22, %v8414_v15 }
 0x4bc   :  { %v3327_v20 = vadd.f32 %v3326_v0, %v3325_v48  ;;  %v8702_v48 = vadd.f32 %v8486_v10, %v8414_v15  ;;  %10739 = vst [vmem:[#allocation110_spill] sm:$0xff] %v8714_v3  ;;  %v3338_v61 = vsel %vm2200_vm4, %v8714_v3, 0.0 }
 0x4be   :  { %v3329_v5 = vadd.f32 %v3328_v57, %v3327_v20  ;;  %v3334_v0 = vsel %vm2200_vm4, %v8702_v48, 0.0  ;;  %v3336_v57 = vsel %vm2200_vm4, %v8706_v55, 0.0 }
 0x4c0   :  { %v3331_v62 = vadd.f32 %v3330_v46, %v3329_v5 }
 0x4c2   :  { %v3333_v9 = vadd.f32 %v3332_v52, %v3331_v62 }
 0x4c4   :  { %v3335_v20 = vadd.f32 %v3334_v0, %v3333_v9 }
 0x4c6   :  { %v3337_v5 = vadd.f32 %v3336_v57, %v3335_v20 }
 0x4c8   :  { %v8558_v53 = vpop.f32.mrb[14].mxu1  ;;  %v3339_v46 = vadd.f32 %v3338_v61, %v3337_v5 }
 0x4c9   :  { %v8568_v41 = vpop.f32.mrb[15].mxu1  ;;  %v8726_v52 = vadd.f32 %v8558_v53, %v8414_v15 }
 0x4ca   :  { %v8718_v10 = vadd.f32 %v8414_v15, %v8568_v41 }
 0x4cb   :  { %10740 = vst [vmem:[#allocation138_spill] sm:$0xff] %v8726_v52  ;;  %v3342_v57 = vsel %vm2200_vm4, %v8726_v52, 0.0 }
 0x4cc   :  { %v3340_v62 = vsel %vm2200_vm4, %v8718_v10, 0.0 }
 0x4cd   :  { %v3341_v9 = vadd.f32 %v3340_v62, %v3339_v46 }
 0x4cf   :  { %v3343_v3 = vadd.f32 %v3342_v57, %v3341_v9 }
 0x4d8   :  { %v8594_v29 = vpop.f32.mrb[16].mxu1 }
 0x4d9   :  { %v8600_v31 = vpop.f32.mrb[17].mxu1  ;;  %v8738_v5 = vadd.f32 %v8594_v29, %v8414_v15 }
 0x4da   :  { %v8730_v22 = vadd.f32 %v8414_v15, %v8600_v31 }
 0x4db   :  { %10741 = vst [vmem:[#allocation100_spill] sm:$0xff] %v8738_v5  ;;  %v3346_v31 = vsel %vm2200_vm4, %v8738_v5, 0.0 }
 0x4dc   :  { %v3344_v20 = vsel %vm2200_vm4, %v8730_v22, 0.0 }
 0x4dd   :  { %v3345_v61 = vadd.f32 %v3344_v20, %v3343_v3 }
 0x4df   :  { %v3347_v46 = vadd.f32 %v3346_v31, %v3345_v61 }
 0x4e8   :  { %v8634_v28 = vpop.f32.mrb[18].mxu1 }
 0x4e9   :  { %v3180_v27 = vpop.f32.mrb[19].mxu1  ;;  %v8749_v52 = vadd.f32 %v8634_v28, %v8414_v15 }
 0x4ea   :  { %v8741_v53 = vadd.f32 %v8414_v15, %v3180_v27 }
 0x4eb   :  { %10743 = vst [vmem:[#allocation209_spill] sm:$0xff] %v8749_v52  ;;  %v3350_v27 = vsel %vm2200_vm4, %v8749_v52, 0.0 }
 0x4ec   :  { %10742 = vst [vmem:[#allocation136_spill] sm:$0xff] %v8741_v53  ;;  %v3348_v62 = vsel %vm2200_vm4, %v8741_v53, 0.0 }
 0x4ed   :  { %v3349_v29 = vadd.f32 %v3348_v62, %v3347_v46 }
 0x4ef   :  { %v3351_v57 = vadd.f32 %v3350_v27, %v3349_v29 }
 0x4f8   :  { %v4229_v59 = vpop.f32.mrb[20].mxu1 }
 0x4f9   :  { %v3190_v36 = vpop.f32.mrb[21].mxu1  ;;  %v8759_v5 = vadd.f32 %v4229_v59, %v8414_v15 }
 0x4fa   :  { %v8752_v9 = vadd.f32 %v8414_v15, %v3190_v36 }
 0x4fb   :  { %10745 = vst [vmem:[#allocation185_spill] sm:$0xff] %v8759_v5  ;;  %v3354_v36 = vsel %vm2200_vm4, %v8759_v5, 0.0 }
 0x4fc   :  { %10744 = vst [vmem:[#allocation104_spill] sm:$0xff] %v8752_v9  ;;  %v3352_v3 = vsel %vm2200_vm4, %v8752_v9, 0.0 }
 0x4fd   :  { %v3353_v31 = vadd.f32 %v3352_v3, %v3351_v57 }
 0x4ff   :  { %v3355_v46 = vadd.f32 %v3354_v36, %v3353_v31 }
 0x508   :  { %v4232_v13 = vpop.f32.mrb[22].mxu1 }
 0x509   :  { %v3200_v42 = vpop.f32.mrb[23].mxu1  ;;  %v8769_v52 = vadd.f32 %v4232_v13, %v8414_v15 }
 0x50a   :  { %v8762_v61 = vadd.f32 %v8414_v15, %v3200_v42 }
 0x50b   :  { %10747 = vst [vmem:[#allocation208_spill] sm:$0xff] %v8769_v52  ;;  %v3358_v42 = vsel %vm2200_vm4, %v8769_v52, 0.0 }
 0x50c   :  { %10746 = vst [vmem:[#allocation177_spill] sm:$0xff] %v8762_v61  ;;  %v3356_v62 = vsel %vm2200_vm4, %v8762_v61, 0.0 }
 0x50d   :  { %v3357_v59 = vadd.f32 %v3356_v62, %v3355_v46 }
 0x50f   :  { %v3359_v3 = vadd.f32 %v3358_v42, %v3357_v59 }
 0x518   :  { %v4235_v0 = vpop.f32.mrb[24].mxu1 }
 0x519   :  { %v3210_v41 = vpop.f32.mrb[25].mxu1  ;;  %v8779_v57 = vadd.f32 %v4235_v0, %v8414_v15 }
 0x51a   :  { %v8772_v29 = vadd.f32 %v8414_v15, %v3210_v41 }
 0x51b   :  { %10749 = vst [vmem:[#allocation184_spill] sm:$0xff] %v8779_v57  ;;  %v3362_v13 = vsel %vm2200_vm4, %v8779_v57, 0.0 }
 0x51c   :  { %10748 = vst [vmem:[#allocation108_spill] sm:$0xff] %v8772_v29  ;;  %v3360_v27 = vsel %vm2200_vm4, %v8772_v29, 0.0 }
 0x51d   :  { %v3361_v31 = vadd.f32 %v3360_v27, %v3359_v3 }
 0x51f   :  { %v3363_v36 = vadd.f32 %v3362_v13, %v3361_v31 }
 0x528   :  { %v4238_v20 = vpop.f32.mrb[26].mxu1 }
 0x529   :  { %v3220_v28 = vpop.f32.mrb[27].mxu1  ;;  %v8789_v62 = vadd.f32 %v4238_v20, %v8414_v15 }
 0x52a   :  { %v8782_v61 = vadd.f32 %v8414_v15, %v3220_v28 }
 0x52b   :  { %10751 = vst [vmem:[#allocation175_spill] sm:$0xff] %v8789_v62  ;;  %v3366_v0 = vsel %vm2200_vm4, %v8789_v62, 0.0 }
 0x52c   :  { %10750 = vst [vmem:[#allocation142_spill] sm:$0xff] %v8782_v61  ;;  %v3364_v41 = vsel %vm2200_vm4, %v8782_v61, 0.0 }
 0x52d   :  { %v3365_v46 = vadd.f32 %v3364_v41, %v3363_v36 }
 0x52f   :  { %v3367_v27 = vadd.f32 %v3366_v0, %v3365_v46 }
 0x53d   :  { %v4241_v29 = vpop.f32.mrb[28].mxu1 }
 0x53e   :  { %v3230_v59 = vpop.f32.mrb[29].mxu1  ;;  %v3236_v28 = vadd.f32 %v4241_v29, %v8414_v15 }
 0x53f   :  { %v3231_v42 = vadd.f32 %v8414_v15, %v3230_v59 }
 0x540   :  { %v3370_v61 = vsel %vm2200_vm4, %v3236_v28, 0.0 }
 0x541   :  { %v3368_v3 = vsel %vm2200_vm4, %v3231_v42, 0.0 }
 0x542   :  { %v3369_v57 = vadd.f32 %v3368_v3, %v3367_v27 }
 0x544   :  { %v3371_v31 = vadd.f32 %v3370_v61, %v3369_v57 }
 0x54a   :  { %v4244_v13 = vpop.f32.mrb[30].mxu1 }
 0x54b   :  { %v3240_v20 = vpop.f32.mrb[31].mxu1  ;;  %v3246_v41 = vadd.f32 %v4244_v13, %v8414_v15 }
 0x54c   :  { %v3241_v36 = vadd.f32 %v8414_v15, %v3240_v20 }
 0x54d   :  { %v3374_v29 = vsel %vm2200_vm4, %v3246_v41, 0.0 }
 0x54e   :  { %v3372_v52 = vsel %vm2200_vm4, %v3241_v36, 0.0 }
 0x54f   :  { %v3373_v62 = vadd.f32 %v3372_v52, %v3371_v31 }
 0x551   :  { %v3375_v5 = vadd.f32 %v3374_v29, %v3373_v62 }
 0x553   :  { %v3376_v59 = vrot.slane %v3375_v5, 4 }
 0x555   :  { %v3377_v46 = vadd.f32 %v3376_v59, %v3375_v5 }
 0x557   :  { %v3378_v0 = vrot.slane %v3377_v46, 2 }
 0x559   :  { %v3379_v9 = vadd.f32 %v3378_v0, %v3377_v46 }
 0x55b   :  { %v3380_v27 = vrot.slane %v3379_v9, 1 }
 0x55d   :  { %v3381_v3 = vadd.f32 %v3380_v27, %v3379_v9 }
 0x55f   :  { %v8801_v53 = vmul.f32 0.001953125, %v3381_v3 }
 0x561   :  { %v8804_v61 = vsub.f32 %v3231_v42, %v8801_v53  ;;  %v8807_v57 = vsub.f32 %v3236_v28, %v8801_v53  ;;  %v8810_v15 = vsub.f32 %v3241_v36, %v8801_v53  ;;  %v8813_v52 = vsub.f32 %v3246_v41, %v8801_v53 }
 0x562   :  { %v8817_v5 = vsub.f32 %v8426_v1, %v8801_v53  ;;  %v8821_v9 = vsub.f32 %v8422_v60, %v8801_v53  ;;  %v8825_v62 = vsub.f32 %v8430_v37, %v8801_v53  ;;  %v8829_v28 = vsub.f32 %v8440_v38, %v8801_v53 }
 0x563   :  { %10752 = vst [vmem:[#allocation254_spill] sm:$0xff] %v8804_v61  ;;  %10753 = vst [vmem:[#allocation140_spill] sm:$0xff] %v8807_v57  ;;  %v8837_v1 = vsub.f32 %v8444_v8, %v8801_v53  ;;  %v8843_v37 = vsub.f32 %v8454_v21, %v8801_v53  ;;  %v8851_v36 = vsub.f32 %v8458_v34, %v8801_v53 }
 0x564   :  { %10754 = vst [vmem:[#allocation213_spill] sm:$0xff] %v8813_v52  ;;  %v3447_v42 = vmul.f32 %v8817_v5, %v8817_v5  ;;  %v3448_v31 = vmul.f32 %v8821_v9, %v8821_v9  ;;  %v3449_v60 = vmul.f32 %v8825_v62, %v8825_v62  ;;  %v3450_v38 = vmul.f32 %v8829_v28, %v8829_v28 }
 0x565   :  { %v3451_v8 = vmul.f32 %v8837_v1, %v8837_v1  ;;  %v8858_v21 = vsub.f32 %v8468_v39, %v8801_v53  ;;  %v3452_v46 = vmul.f32 %v8843_v37, %v8843_v37  ;;  %v8865_v34 = vsub.f32 %v8472_v17, %v8801_v53 }
 0x566   :  { %v3511_v13 = vsel %vm2200_vm4, %v3447_v42, 0.0  ;;  %v3512_v20 = vsel %vm2200_vm4, %v3448_v31, 0.0  ;;  %v3514_v29 = vsel %vm2200_vm4, %v3449_v60, 0.0  ;;  %v3516_v0 = vsel %vm2200_vm4, %v3450_v38, 0.0 }
 0x567   :  { %v3513_v41 = vadd.f32 %v3512_v20, %v3511_v13  ;;  %v3453_v3 = vmul.f32 %v8851_v36, %v8851_v36  ;;  %v3518_v42 = vsel %vm2200_vm4, %v3451_v8, 0.0  ;;  %v8872_v39 = vsub.f32 %v8480_v26, %v8801_v53 }
 0x568   :  { %v3454_v60 = vmul.f32 %v8858_v21, %v8858_v21  ;;  %v3520_v38 = vsel %vm2200_vm4, %v3452_v46, 0.0  ;;  %v8879_v17 = vsub.f32 %v8484_v4, %v8801_v53  ;;  %v3455_v20 = vmul.f32 %v8865_v34, %v8865_v34 }
 0x569   :  { %v3515_v59 = vadd.f32 %v3514_v29, %v3513_v41  ;;  %10755 = vst [vmem:[#allocation114_spill] sm:$0xff] %v8872_v39  ;;  %v3522_v41 = vsel %vm2200_vm4, %v3453_v3, 0.0  ;;  %v8886_v26 = vsub.f32 %v8496_v6, %v8801_v53  ;;  %v3456_v29 = vmul.f32 %v8872_v39, %v8872_v39 }
 0x56a   :  { %10756 = vst [vmem:[#allocation26_spill] sm:$0xff] %v8879_v17  ;;  %v8893_v4 = vsub.f32 %v8500_v63, %v8801_v53  ;;  %v8900_v6 = vsub.f32 %v8508_v19, %v8801_v53  ;;  %v8907_v63 = vsub.f32 %v8512_v32, %v8801_v53  ;;  %v8914_v19 = vsub.f32 %v8520_v58, %v8801_v53 }
 0x56b   :  { %v3517_v27 = vadd.f32 %v3516_v0, %v3515_v59  ;;  %10757 = vst [vmem:[#allocation181_spill] sm:$0xff] %v8886_v26  ;;  %v3524_v59 = vsel %vm2200_vm4, %v3454_v60, 0.0  ;;  %v3457_v0 = vmul.f32 %v8879_v17, %v8879_v17  ;;  %v8921_v32 = vsub.f32 %v8524_v43, %v8801_v53 }
 0x56c   :  { %10758 = vst [vmem:[#allocation212_spill] sm:$0xff] %v8893_v4  ;;  %10759 = vst [vmem:[#allocation257_spill] sm:$0xff] %v8900_v6  ;;  %v8928_v58 = vsub.f32 %v8536_v33, %v8801_v53  ;;  %v8935_v43 = vsub.f32 %v8540_v18, %v8801_v53  ;;  %v8942_v33 = vsub.f32 %v8548_v35, %v8801_v53 }
 0x56d   :  { %v3519_v31 = vadd.f32 %v3518_v42, %v3517_v27  ;;  %v3526_v27 = vsel %vm2200_vm4, %v3455_v20, 0.0  ;;  %v3458_v42 = vmul.f32 %v8886_v26, %v8886_v26  ;;  %10760 = vst [vmem:[#allocation112_spill] sm:$0xff] %v8907_v63  ;;  %10761 = vst [vmem:[#allocation146_spill] sm:$0xff] %v8914_v19  ;;  %v8949_v18 = vsub.f32 %v8552_v49, %v8801_v53 }
 0x56e   :  { %v8956_v35 = vsub.f32 %v8562_v23, %v8801_v53  ;;  %v8963_v49 = vsub.f32 %v8566_v30, %v8801_v53  ;;  %v8970_v23 = vsub.f32 %v8576_v51, %v8801_v53  ;;  %v8977_v30 = vsub.f32 %v8580_v2, %v8801_v53 }
 0x56f   :  { %v3521_v13 = vadd.f32 %v3520_v38, %v3519_v31  ;;  %v3528_v31 = vsel %vm2200_vm4, %v3456_v29, 0.0  ;;  %v3459_v38 = vmul.f32 %v8893_v4, %v8893_v4  ;;  %v8984_v51 = vsub.f32 %v8588_v50, %v8801_v53 }
 0x570   :  { %v8991_v2 = vsub.f32 %v8592_v54, %v8801_v53  ;;  %v8998_v50 = vsub.f32 %v8604_v7, %v8801_v53  ;;  %v9005_v54 = vsub.f32 %v8608_v40, %v8801_v53  ;;  %v9012_v7 = vsub.f32 %v8616_v16, %v8801_v53 }
 0x571   :  { %v3523_v8 = vadd.f32 %v3522_v41, %v3521_v13  ;;  %v3530_v13 = vsel %vm2200_vm4, %v3457_v0, 0.0  ;;  %v3460_v41 = vmul.f32 %v8900_v6, %v8900_v6  ;;  %10762 = vst [vmem:[#allocation179_spill] sm:$0xff] %v8984_v51  ;;  %v9019_v40 = vsub.f32 %v8620_v47, %v8801_v53 }
 0x572   :  { %10763 = vst [vmem:[#allocation25_spill] sm:$0xff] %v8991_v2  ;;  %10764 = vst [vmem:[#allocation256_spill] sm:$0xff] %v8998_v50  ;;  %v9026_v16 = vsub.f32 %v8628_v24, %v8801_v53  ;;  %v9033_v47 = vsub.f32 %v8632_v45, %v8801_v53  ;;  %v9040_v24 = vsub.f32 %v8642_v11, %v8801_v53 }
 0x573   :  { %v3525_v46 = vadd.f32 %v3524_v59, %v3523_v8  ;;  %v3532_v8 = vsel %vm2200_vm4, %v3458_v42, 0.0  ;;  %v3461_v59 = vmul.f32 %v8907_v63, %v8907_v63  ;;  %10765 = vst [vmem:[#allocation144_spill] sm:$0xff] %v9005_v54  ;;  %10766 = vst [vmem:[#allocation217_spill] sm:$0xff] %v9012_v7  ;;  %v9047_v45 = vsub.f32 %v8646_v12, %v8801_v53 }
 0x574   :  { %10767 = vst [vmem:[#allocation116_spill] sm:$0xff] %v9019_v40  ;;  %10768 = vst [vmem:[#allocation28_spill] sm:$0xff] %v9026_v16  ;;  %v9061_v12 = vsub.f32 %v8658_v14, %v8801_v53 }
 0x575   :  { %v3527_v3 = vadd.f32 %v3526_v27, %v3525_v46  ;;  %v3534_v46 = vsel %vm2200_vm4, %v3459_v38, 0.0  ;;  %v3462_v27 = vmul.f32 %v8914_v19, %v8914_v19 }
 0x577   :  { %v3529_v60 = vadd.f32 %v3528_v31, %v3527_v3  ;;  %v3536_v3 = vsel %vm2200_vm4, %v3460_v41, 0.0  ;;  %v3463_v31 = vmul.f32 %v8921_v32, %v8921_v32 }
 0x579   :  { %v3531_v20 = vadd.f32 %v3530_v13, %v3529_v60  ;;  %v3538_v60 = vsel %vm2200_vm4, %v3461_v59, 0.0  ;;  %v3464_v13 = vmul.f32 %v8928_v58, %v8928_v58 }
 0x57b   :  { %v3533_v29 = vadd.f32 %v3532_v8, %v3531_v20  ;;  %v3540_v20 = vsel %vm2200_vm4, %v3462_v27, 0.0  ;;  %v3465_v8 = vmul.f32 %v8935_v43, %v8935_v43 }
 0x57d   :  { %v3535_v0 = vadd.f32 %v3534_v46, %v3533_v29  ;;  %v3542_v29 = vsel %vm2200_vm4, %v3463_v31, 0.0  ;;  %v3466_v46 = vmul.f32 %v8942_v33, %v8942_v33 }
 0x57f   :  { %v3537_v42 = vadd.f32 %v3536_v3, %v3535_v0  ;;  %v3544_v0 = vsel %vm2200_vm4, %v3464_v13, 0.0  ;;  %v3467_v3 = vmul.f32 %v8949_v18, %v8949_v18 }
 0x581   :  { %v3539_v38 = vadd.f32 %v3538_v60, %v3537_v42  ;;  %v3546_v42 = vsel %vm2200_vm4, %v3465_v8, 0.0  ;;  %v3468_v60 = vmul.f32 %v8956_v35, %v8956_v35 }
 0x583   :  { %v3541_v41 = vadd.f32 %v3540_v20, %v3539_v38  ;;  %v3548_v38 = vsel %vm2200_vm4, %v3466_v46, 0.0  ;;  %v3469_v20 = vmul.f32 %v8963_v49, %v8963_v49 }
 0x585   :  { %v3543_v59 = vadd.f32 %v3542_v29, %v3541_v41  ;;  %v3550_v41 = vsel %vm2200_vm4, %v3467_v3, 0.0  ;;  %v3470_v29 = vmul.f32 %v8970_v23, %v8970_v23 }
 0x587   :  { %v3545_v27 = vadd.f32 %v3544_v0, %v3543_v59  ;;  %v3552_v59 = vsel %vm2200_vm4, %v3468_v60, 0.0  ;;  %v3471_v0 = vmul.f32 %v8977_v30, %v8977_v30 }
 0x589   :  { %v3547_v31 = vadd.f32 %v3546_v42, %v3545_v27  ;;  %v3554_v27 = vsel %vm2200_vm4, %v3469_v20, 0.0  ;;  %v3472_v42 = vmul.f32 %v8984_v51, %v8984_v51 }
 0x58b   :  { %v3549_v13 = vadd.f32 %v3548_v38, %v3547_v31  ;;  %v3556_v31 = vsel %vm2200_vm4, %v3470_v29, 0.0  ;;  %v3473_v38 = vmul.f32 %v8991_v2, %v8991_v2 }
 0x58d   :  { %v3551_v8 = vadd.f32 %v3550_v41, %v3549_v13  ;;  %v3558_v13 = vsel %vm2200_vm4, %v3471_v0, 0.0  ;;  %v3474_v41 = vmul.f32 %v8998_v50, %v8998_v50 }
 0x58f   :  { %v3553_v46 = vadd.f32 %v3552_v59, %v3551_v8  ;;  %v3560_v8 = vsel %vm2200_vm4, %v3472_v42, 0.0  ;;  %v3475_v59 = vmul.f32 %v9005_v54, %v9005_v54 }
 0x591   :  { %v3555_v3 = vadd.f32 %v3554_v27, %v3553_v46  ;;  %v3562_v46 = vsel %vm2200_vm4, %v3473_v38, 0.0  ;;  %v3476_v27 = vmul.f32 %v9012_v7, %v9012_v7 }
 0x593   :  { %v3557_v60 = vadd.f32 %v3556_v31, %v3555_v3  ;;  %v3564_v3 = vsel %vm2200_vm4, %v3474_v41, 0.0  ;;  %v3477_v31 = vmul.f32 %v9019_v40, %v9019_v40 }
 0x595   :  { %v3559_v20 = vadd.f32 %v3558_v13, %v3557_v60  ;;  %v3566_v60 = vsel %vm2200_vm4, %v3475_v59, 0.0  ;;  %v3478_v13 = vmul.f32 %v9026_v16, %v9026_v16 }
 0x597   :  { %v3561_v29 = vadd.f32 %v3560_v8, %v3559_v20  ;;  %v3568_v20 = vsel %vm2200_vm4, %v3476_v27, 0.0  ;;  %v3479_v8 = vmul.f32 %v9033_v47, %v9033_v47  ;;  %v3572_v27 = vsel %vm2200_vm4, %v3478_v13, 0.0 }
 0x599   :  { %v3563_v0 = vadd.f32 %v3562_v46, %v3561_v29  ;;  %v3570_v29 = vsel %vm2200_vm4, %v3477_v31, 0.0  ;;  %v10769_v46 = vld [vmem:[#allocation205_spill] sm:$0xff]  ;;  %v3574_v31 = vsel %vm2200_vm4, %v3479_v8, 0.0 }
 0x59a   :  { %v9054_v11 = vsub.f32 %v10769_v46, %v8801_v53 }
 0x59b   :  { %v3565_v42 = vadd.f32 %v3564_v3, %v3563_v0  ;;  %v3480_v0 = vmul.f32 %v9040_v24, %v9040_v24 }
 0x59d   :  { %v3567_v38 = vadd.f32 %v3566_v60, %v3565_v42  ;;  %v3481_v42 = vmul.f32 %v9047_v45, %v9047_v45  ;;  %v3576_v13 = vsel %vm2200_vm4, %v3480_v0, 0.0 }
 0x59f   :  { %v3569_v41 = vadd.f32 %v3568_v20, %v3567_v38  ;;  %v9068_v38 = vsub.f32 %v8666_v44, %v8801_v53  ;;  %v3482_v20 = vmul.f32 %v9054_v11, %v9054_v11  ;;  %v3578_v8 = vsel %vm2200_vm4, %v3481_v42, 0.0 }
 0x5a1   :  { %v3571_v59 = vadd.f32 %v3570_v29, %v3569_v41  ;;  %v10770_v29 = vld [vmem:[#allocation106_spill] sm:$0xff]  ;;  %v3580_v0 = vsel %vm2200_vm4, %v3482_v20, 0.0 }
 0x5a2   :  { %v9075_v14 = vsub.f32 %v10770_v29, %v8801_v53  ;;  %v9096_v29 = vsub.f32 %v8690_v56, %v8801_v53  ;;  %v9110_v56 = vsub.f32 %v8702_v48, %v8801_v53 }
 0x5a3   :  { %v3573_v3 = vadd.f32 %v3572_v27, %v3571_v59  ;;  %v3483_v59 = vmul.f32 %v9061_v12, %v9061_v12  ;;  %v10771_v27 = vld [vmem:[#allocation102_spill] sm:$0xff] }
 0x5a4   :  { %v9082_v44 = vsub.f32 %v10771_v27, %v8801_v53  ;;  %v10772_v27 = vld [vmem:[#allocation204_spill] sm:$0xff]  ;;  %v3490_v16 = vmul.f32 %v9110_v56, %v9110_v56 }
 0x5a5   :  { %v3575_v60 = vadd.f32 %v3574_v31, %v3573_v3  ;;  %v3484_v3 = vmul.f32 %v9068_v38, %v9068_v38  ;;  %v3582_v42 = vsel %vm2200_vm4, %v3483_v59, 0.0 }
 0x5a7   :  { %v3577_v41 = vadd.f32 %v3576_v13, %v3575_v60  ;;  %v9089_v60 = vsub.f32 %v8682_v25, %v8801_v53  ;;  %v3485_v13 = vmul.f32 %v9075_v14, %v9075_v14  ;;  %v3584_v20 = vsel %vm2200_vm4, %v3484_v3, 0.0 }
 0x5a8   :  { %v9103_v25 = vsub.f32 %v10772_v27, %v8801_v53 }
 0x5a9   :  { %v3579_v46 = vadd.f32 %v3578_v8, %v3577_v41  ;;  %v3486_v8 = vmul.f32 %v9082_v44, %v9082_v44  ;;  %v3586_v59 = vsel %vm2200_vm4, %v3485_v13, 0.0 }
 0x5aa   :  { %v3489_v27 = vmul.f32 %v9103_v25, %v9103_v25 }
 0x5ab   :  { %v3581_v31 = vadd.f32 %v3580_v0, %v3579_v46  ;;  %v3487_v0 = vmul.f32 %v9089_v60, %v9089_v60  ;;  %v3588_v3 = vsel %vm2200_vm4, %v3486_v8, 0.0 }
 0x5ad   :  { %v3583_v41 = vadd.f32 %v3582_v42, %v3581_v31  ;;  %v3488_v42 = vmul.f32 %v9096_v29, %v9096_v29  ;;  %v3590_v13 = vsel %vm2200_vm4, %v3487_v0, 0.0  ;;  %v3594_v0 = vsel %vm2200_vm4, %v3489_v27, 0.0 }
 0x5af   :  { %v3585_v46 = vadd.f32 %v3584_v20, %v3583_v41  ;;  %v9117_v20 = vsub.f32 %v8706_v55, %v8801_v53  ;;  %v3592_v8 = vsel %vm2200_vm4, %v3488_v42, 0.0  ;;  %v9131_v55 = vsub.f32 %v8718_v10, %v8801_v53 }
 0x5b0   :  { %v3596_v42 = vsel %vm2200_vm4, %v3490_v16, 0.0  ;;  %v9145_v10 = vsub.f32 %v8730_v22, %v8801_v53 }
 0x5b1   :  { %v3587_v31 = vadd.f32 %v3586_v59, %v3585_v46  ;;  %v10773_v59 = vld [vmem:[#allocation110_spill] sm:$0xff] }
 0x5b2   :  { %v9124_v48 = vsub.f32 %v10773_v59, %v8801_v53  ;;  %v3495_v63 = vmul.f32 %v9145_v10, %v9145_v10 }
 0x5b3   :  { %v3589_v41 = vadd.f32 %v3588_v3, %v3587_v31  ;;  %v3491_v3 = vmul.f32 %v9117_v20, %v9117_v20 }
 0x5b4   :  { %v3492_v19 = vmul.f32 %v9124_v48, %v9124_v48 }
 0x5b5   :  { %v3591_v46 = vadd.f32 %v3590_v13, %v3589_v41  ;;  %v10774_v13 = vld [vmem:[#allocation138_spill] sm:$0xff]  ;;  %v3598_v27 = vsel %vm2200_vm4, %v3491_v3, 0.0 }
 0x5b6   :  { %v9138_v59 = vsub.f32 %v10774_v13, %v8801_v53  ;;  %v3600_v16 = vsel %vm2200_vm4, %v3492_v19, 0.0 }
 0x5b7   :  { %v3593_v31 = vadd.f32 %v3592_v8, %v3591_v46  ;;  %v3493_v8 = vmul.f32 %v9131_v55, %v9131_v55 }
 0x5b8   :  { %v3494_v40 = vmul.f32 %v9138_v59, %v9138_v59 }
 0x5b9   :  { %v3595_v41 = vadd.f32 %v3594_v0, %v3593_v31  ;;  %v10775_v0 = vld [vmem:[#allocation100_spill] sm:$0xff]  ;;  %v3602_v3 = vsel %vm2200_vm4, %v3493_v8, 0.0  ;;  %v3606_v8 = vsel %vm2200_vm4, %v3495_v63, 0.0 }
 0x5ba   :  { %v9152_v13 = vsub.f32 %v10775_v0, %v8801_v53  ;;  %v3604_v19 = vsel %vm2200_vm4, %v3494_v40, 0.0 }
 0x5bb   :  { %v3597_v46 = vadd.f32 %v3596_v42, %v3595_v41  ;;  %v10776_v42 = vld [vmem:[#allocation136_spill] sm:$0xff] }
 0x5bc   :  { %v9159_v22 = vsub.f32 %v10776_v42, %v8801_v53  ;;  %v3496_v7 = vmul.f32 %v9152_v13, %v9152_v13 }
 0x5bd   :  { %v3599_v31 = vadd.f32 %v3598_v27, %v3597_v46  ;;  %v10777_v27 = vld [vmem:[#allocation209_spill] sm:$0xff] }
 0x5be   :  { %v9166_v0 = vsub.f32 %v10777_v27, %v8801_v53  ;;  %v3497_v6 = vmul.f32 %v9159_v22, %v9159_v22  ;;  %v3608_v40 = vsel %vm2200_vm4, %v3496_v7, 0.0 }
 0x5bf   :  { %v3601_v41 = vadd.f32 %v3600_v16, %v3599_v31  ;;  %v10778_v16 = vld [vmem:[#allocation104_spill] sm:$0xff] }
 0x5c0   :  { %v9173_v42 = vsub.f32 %v10778_v16, %v8801_v53  ;;  %v3498_v54 = vmul.f32 %v9166_v0, %v9166_v0  ;;  %v3610_v63 = vsel %vm2200_vm4, %v3497_v6, 0.0 }
 0x5c1   :  { %v3603_v46 = vadd.f32 %v3602_v3, %v3601_v41  ;;  %v10779_v3 = vld [vmem:[#allocation185_spill] sm:$0xff] }
 0x5c2   :  { %v9180_v27 = vsub.f32 %v10779_v3, %v8801_v53  ;;  %v3499_v4 = vmul.f32 %v9173_v42, %v9173_v42  ;;  %v3612_v7 = vsel %vm2200_vm4, %v3498_v54, 0.0 }
 0x5c3   :  { %v3605_v31 = vadd.f32 %v3604_v19, %v3603_v46  ;;  %v10780_v19 = vld [vmem:[#allocation177_spill] sm:$0xff] }
 0x5c4   :  { %v9187_v16 = vsub.f32 %v10780_v19, %v8801_v53  ;;  %v3500_v50 = vmul.f32 %v9180_v27, %v9180_v27  ;;  %v3614_v6 = vsel %vm2200_vm4, %v3499_v4, 0.0 }
 0x5c5   :  { %v3607_v41 = vadd.f32 %v3606_v8, %v3605_v31  ;;  %v10781_v8 = vld [vmem:[#allocation208_spill] sm:$0xff] }
 0x5c6   :  { %v9194_v3 = vsub.f32 %v10781_v8, %v8801_v53  ;;  %v3501_v26 = vmul.f32 %v9187_v16, %v9187_v16  ;;  %v3616_v54 = vsel %vm2200_vm4, %v3500_v50, 0.0 }
 0x5c7   :  { %v3609_v46 = vadd.f32 %v3608_v40, %v3607_v41  ;;  %v10782_v40 = vld [vmem:[#allocation108_spill] sm:$0xff] }
 0x5c8   :  { %v9201_v19 = vsub.f32 %v10782_v40, %v8801_v53  ;;  %v3502_v2 = vmul.f32 %v9194_v3, %v9194_v3  ;;  %v3618_v4 = vsel %vm2200_vm4, %v3501_v26, 0.0 }
 0x5c9   :  { %v3611_v31 = vadd.f32 %v3610_v63, %v3609_v46  ;;  %v10784_v63 = vld [vmem:[#allocation184_spill] sm:$0xff] }
 0x5ca   :  { %10783 = vst [vmem:[#allocation183_spill] sm:$0xff] %v9201_v19  ;;  %v9208_v8 = vsub.f32 %v10784_v63, %v8801_v53  ;;  %v3503_v17 = vmul.f32 %v9201_v19, %v9201_v19  ;;  %v3620_v50 = vsel %vm2200_vm4, %v3502_v2, 0.0  ;;  %v3508_v2 = vmul.f32 %v8807_v57, %v8807_v57 }
 0x5cb   :  { %v3613_v41 = vadd.f32 %v3612_v7, %v3611_v31  ;;  %v10786_v7 = vld [vmem:[#allocation142_spill] sm:$0xff] }
 0x5cc   :  { %10785 = vst [vmem:[#allocation216_spill] sm:$0xff] %v9208_v8  ;;  %v9215_v40 = vsub.f32 %v10786_v7, %v8801_v53  ;;  %v3504_v51 = vmul.f32 %v9208_v8, %v9208_v8  ;;  %v3622_v7 = vsel %vm2200_vm4, %v3503_v17, 0.0  ;;  %v3509_v17 = vmul.f32 %v8810_v15, %v8810_v15 }
 0x5cd   :  { %v3615_v46 = vadd.f32 %v3614_v6, %v3613_v41  ;;  %v10788_v6 = vld [vmem:[#allocation175_spill] sm:$0xff] }
 0x5ce   :  { %10787 = vst [vmem:[#allocation259_spill] sm:$0xff] %v9215_v40  ;;  %v9222_v63 = vsub.f32 %v10788_v6, %v8801_v53  ;;  %v3507_v53 = vmul.f32 %v8804_v61, %v8804_v61 }
 0x5cf   :  { %v3617_v31 = vadd.f32 %v3616_v54, %v3615_v46  ;;  %v3505_v54 = vmul.f32 %v9215_v40, %v9215_v40 }
 0x5d0   :  { %10789 = vst [vmem:[#allocation115_spill] sm:$0xff] %v9222_v63  ;;  %v3506_v26 = vmul.f32 %v9222_v63, %v9222_v63 }
 0x5d1   :  { %v3619_v41 = vadd.f32 %v3618_v4, %v3617_v31  ;;  %v3624_v31 = vsel %vm2200_vm4, %v3504_v51, 0.0  ;;  %v3626_v6 = vsel %vm2200_vm4, %v3505_v54, 0.0  ;;  %v3632_v51 = vsel %vm2200_vm4, %v3508_v2, 0.0  ;;  %v3645_v2 = vld [vmem:[%s9606_s3] sm:$0x1]  ;;  %s4401_s3 = smov [#allocation2]  }
 0x5d2   :  { %v3634_v54 = vsel %vm2200_vm4, %v3509_v17, 0.0 }
 0x5d3   :  { %v3621_v46 = vadd.f32 %v3620_v50, %v3619_v41  ;;  %v3628_v41 = vsel %vm2200_vm4, %v3506_v26, 0.0 }
 0x5d5   :  { %v3623_v39 = vadd.f32 %v3622_v7, %v3621_v46  ;;  %v3630_v46 = vsel %vm2200_vm4, %v3507_v53, 0.0 }
 0x5d7   :  { %v3625_v4 = vadd.f32 %v3624_v31, %v3623_v39  ;;  %v3510_v39 = vmul.f32 %v8813_v52, %v8813_v52 }
 0x5d9   :  { %v3627_v8 = vadd.f32 %v3626_v6, %v3625_v4  ;;  %v3636_v6 = vsel %vm2200_vm4, %v3510_v39, 0.0 }
 0x5db   :  { %v3629_v50 = vadd.f32 %v3628_v41, %v3627_v8 }
 0x5dd   :  { %v3631_v7 = vadd.f32 %v3630_v46, %v3629_v50  ;;  %v3650_v46 = vlaneseq }
 0x5df   :  { %v3633_v31 = vadd.f32 %v3632_v51, %v3631_v7  ;;  %v3651_v52 = vshrl.u32 %v3650_v46, 7 }
 0x5e1   :  { %v3635_v4 = vadd.f32 %v3634_v54, %v3633_v31  ;;  %v3652_v7 = vsub.s32 0, %v3651_v52 }
 0x5e3   :  { %v3637_v57 = vadd.f32 %v3636_v6, %v3635_v4 }
 0x5e5   :  { %v3638_v26 = vrot.slane %v3637_v57, 4 }
 0x5e7   :  { %v3639_v8 = vadd.f32 %v3638_v26, %v3637_v57 }
 0x5e9   :  { %v3640_v41 = vrot.slane %v3639_v8, 2 }
 0x5eb   :  { %v3641_v61 = vadd.f32 %v3640_v41, %v3639_v8 }
 0x5ed   :  { %v3642_v63 = vrot.slane %v3641_v61, 1 }
 0x5ef   :  { %v3643_v40 = vadd.f32 %v3642_v63, %v3641_v61 }
 0x5f1   :  { %v3644_v53 = vmul.f32 0.001953125, %v3643_v40  ;;  %v9259_v40 = vld [vmem:[%s9607_s4] ss:$0 sm:$0xff]  ;;  %s3992_s4 = sshll.u32 %s4401_s3, 4  ;;  %s3993_s4 = int_to_ptr.vmem [resolvable:$true] %s3992_s4 }
 0x5f2   :  { %s4369_s30 = scalar_lea.vmem %s3993_s4, 512  ;;  %p4374_p1 = scmp.lt.s32.totalorder %s3993_s4, %s3993_s4 }
 0x5f3   :  { %v3646_v50 = vadd.f32 1e-05, %v3644_v53  ;;  %p4370_p0 = scmp.ne.s32.totalorder %s3993_s4, %s4369_s30  ;;  %p4375_p2 = scmp.lt.s32.totalorder %s4369_s30, %s4369_s30 }
 0x5f5   :  { %4269 = vrsqrt.f32 %v3646_v50  ;;  %p4376_p3 = por %p4375_p2, %p4374_p1 }
 0x5f7   :  { %p4377_p4 = pnand %p4376_p3, %p4370_p0 }
 0x5ff   :  { %v4270_v19 = vpop.eup %4269 }
 0x600   :  { %v3648_v17 = vmul.f32 %v4270_v19, %v3645_v2 }
 0x602   :  { %v9250_v39 = vrot.slane %v3648_v17, %v3652_v7 }
 0x604   :  { %v3655_v57 = vmul.f32 %v9250_v39, %v8817_v5  ;;  %v3671_v61 = vmul.f32 %v9250_v39, %v8921_v32  ;;  %v3656_v63 = vmul.f32 %v9250_v39, %v8821_v9  ;;  %v3672_v19 = vmul.f32 %v9250_v39, %v8928_v58 }
 0x605   :  { %v9269_v5 = vmul.f32 %v9250_v39, %v8810_v15  ;;  %v3657_v32 = vmul.f32 %v9250_v39, %v8825_v62  ;;  %v3658_v31 = vmul.f32 %v9250_v39, %v8829_v28  ;;  %v3673_v9 = vmul.f32 %v9250_v39, %v8935_v43 }
 0x606   :  { %v3742_v52 = vadd.f32 %v9259_v40, %v3671_v61  ;;  %v3726_v51 = vadd.f32 %v9259_v40, %v3655_v57  ;;  %v3743_v58 = vadd.f32 %v9259_v40, %v3672_v19  ;;  %v3727_v6 = vadd.f32 %v9259_v40, %v3656_v63 }
 0x607   :  { %v3659_v26 = vmul.f32 %v9250_v39, %v8837_v1  ;;  %v9283_v15 = vmul.f32 %v9250_v39, %v8843_v37  ;;  %v9287_v62 = vmul.f32 %v9250_v39, %v8851_v36  ;;  %v9291_v28 = vmul.f32 %v9250_v39, %v8858_v21 }
 0x608   :  { %v3806_v54 = vmax.f32 %v3742_v52, 0.0  ;;  %v3790_v4 = vmax.f32 %v3726_v51, 0.0  ;;  %v9295_v43 = vmul.f32 %v9250_v39, %v8865_v34  ;;  %v3674_v8 = vmul.f32 %v9250_v39, %v8942_v33  ;;  %v10790_v52 = vld [vmem:[#allocation183_spill] sm:$0xff] }
 0x609   :  { %v3675_v1 = vmul.f32 %v9250_v39, %v8949_v18  ;;  %v3676_v37 = vmul.f32 %v9250_v39, %v8956_v35  ;;  %v3677_v36 = vmul.f32 %v9250_v39, %v8963_v49  ;;  %v9307_v21 = vmul.f32 %v9250_v39, %v8970_v23 }
 0x60a   :  { %3886 = vxpose.xlu1.b32.start [1/16] (narrow) %v3806_v54, 8  ;;  %3854 = vxpose.xlu0.b32.start [1/16] (narrow) %v3790_v4, 8  ;;  %v9311_v34 = vmul.f32 %v9250_v39, %v8977_v30  ;;  %v3807_v33 = vmax.f32 %v3743_v58, 0.0  ;;  %v3791_v41 = vmax.f32 %v3727_v6, 0.0  ;;  %v3744_v18 = vadd.f32 %v9259_v40, %v3673_v9 }
 0x60b   :  { %v3728_v53 = vadd.f32 %v9259_v40, %v3657_v32  ;;  %v3687_v35 = vmul.f32 %v9250_v39, %v9033_v47  ;;  %v3688_v49 = vmul.f32 %v9250_v39, %v9040_v24  ;;  %v3689_v23 = vmul.f32 %v9250_v39, %v9047_v45 }
 0x60c   :  { %v3690_v50 = vmul.f32 %v9250_v39, %v9054_v11  ;;  %v3691_v30 = vmul.f32 %v9250_v39, %v9061_v12  ;;  %v3692_v46 = vmul.f32 %v9250_v39, %v9068_v38  ;;  %v3693_v2 = vmul.f32 %v9250_v39, %v9075_v14 }
 0x60d   :  { %v3694_v47 = vmul.f32 %v9250_v39, %v9082_v44  ;;  %v9333_v24 = vmul.f32 %v9250_v39, %v9089_v60  ;;  %v9337_v45 = vmul.f32 %v9250_v39, %v9096_v29  ;;  %v9341_v11 = vmul.f32 %v9250_v39, %v9103_v25 }
 0x60e   :  { %3887 = vxpose.xlu1.b32.cont [2/16] (narrow) %v3807_v33, 8  ;;  %3855 = vxpose.xlu0.b32.cont [2/16] (narrow) %v3791_v41, 8  ;;  %v3808_v12 = vmax.f32 %v3744_v18, 0.0  ;;  %v3792_v38 = vmax.f32 %v3728_v53, 0.0  ;;  %v3745_v14 = vadd.f32 %v9259_v40, %v3674_v8  ;;  %v3729_v17 = vadd.f32 %v9259_v40, %v3658_v31  ;;  %v10793_v33 = vld [vmem:[#allocation115_spill] sm:$0xff] }
 0x60f   :  { %v9347_v44 = vmul.f32 %v9250_v39, %v9110_v56  ;;  %v9351_v60 = vmul.f32 %v9250_v39, %v9117_v20  ;;  %v9355_v29 = vmul.f32 %v9250_v39, %v9124_v48  ;;  %v9359_v25 = vmul.f32 %v9250_v39, %v9131_v55 }
 0x610   :  { %v9363_v7 = vmul.f32 %v9250_v39, %v9138_v59  ;;  %v3703_v56 = vmul.f32 %v9250_v39, %v9145_v10  ;;  %v3704_v57 = vmul.f32 %v9250_v39, %v9152_v13  ;;  %v3705_v20 = vmul.f32 %v9250_v39, %v9159_v22 }
 0x611   :  { %v3706_v48 = vmul.f32 %v9250_v39, %v9166_v0  ;;  %v3707_v55 = vmul.f32 %v9250_v39, %v9173_v42  ;;  %v3708_v59 = vmul.f32 %v9250_v39, %v9180_v27  ;;  %v3809_v61 = vmax.f32 %v3745_v14, 0.0 }
 0x612   :  { %3888 = vxpose.xlu1.b32.cont [3/16] (narrow) %v3808_v12, 8  ;;  %3856 = vxpose.xlu0.b32.cont [3/16] (narrow) %v3792_v38, 8  ;;  %v3793_v63 = vmax.f32 %v3729_v17, 0.0  ;;  %v3746_v10 = vadd.f32 %v9259_v40, %v3675_v1  ;;  %v3730_v13 = vadd.f32 %v9259_v40, %v3659_v26  ;;  %v3709_v19 = vmul.f32 %v9250_v39, %v9187_v16  ;;  %v10791_v26 = vld [vmem:[#allocation216_spill] sm:$0xff]  ;;  %v10792_v1 = vld [vmem:[#allocation259_spill] sm:$0xff]  ;;  %v10794_v17 = vld [vmem:[#allocation254_spill] sm:$0xff] }
 0x613   :  { %v3710_v22 = vmul.f32 %v9250_v39, %v9194_v3  ;;  %v3711_v0 = vmul.f32 %v9250_v39, %v10790_v52  ;;  %v3747_v42 = vadd.f32 %v9259_v40, %v3676_v37  ;;  %v9387_v27 = vadd.f32 %v9259_v40, %v3703_v56  ;;  %v10795_v56 = vld [vmem:[#allocation140_spill] sm:$0xff]  ;;  %v10798_v52 = vld [vmem:[#allocation179_spill] sm:$0xff] }
 0x614   :  { %v9390_v51 = vadd.f32 %v9259_v40, %v3687_v35  ;;  %v9393_v32 = vadd.f32 %v9259_v40, %v3704_v57  ;;  %v9396_v16 = vadd.f32 %v9259_v40, %v3688_v49  ;;  %v9399_v3 = vadd.f32 %v9259_v40, %v3705_v20  ;;  %v10796_v20 = vld [vmem:[#allocation213_spill] sm:$0xff] }
 0x615   :  { %v9402_v31 = vadd.f32 %v9259_v40, %v3689_v23  ;;  %v9405_v9 = vadd.f32 %v9259_v40, %v3706_v48  ;;  %v3810_v54 = vmax.f32 %v3746_v10, 0.0  ;;  %v3794_v4 = vmax.f32 %v3730_v13, 0.0 }
 0x616   :  { %3889 = vxpose.xlu1.b32.cont [4/16] (narrow) %v3809_v61, 8  ;;  %3857 = vxpose.xlu0.b32.cont [4/16] (narrow) %v3793_v63, 8  ;;  %v3731_v58 = vadd.f32 %v9259_v40, %v9283_v15  ;;  %v9410_v6 = vadd.f32 %v9259_v40, %v3690_v50  ;;  %v3712_v8 = vmul.f32 %v9250_v39, %v10791_v26  ;;  %v3811_v12 = vmax.f32 %v3747_v42, 0.0 }
 0x617   :  { %v3713_v37 = vmul.f32 %v9250_v39, %v10792_v1  ;;  %v3714_v41 = vmul.f32 %v9250_v39, %v10793_v33  ;;  %v3748_v18 = vadd.f32 %v9259_v40, %v3677_v36  ;;  %v9420_v53 = vadd.f32 %v9259_v40, %v3707_v55 }
 0x618   :  { %v9423_v15 = vadd.f32 %v9259_v40, %v3691_v30  ;;  %v9426_v35 = vadd.f32 %v9259_v40, %v3708_v59  ;;  %v9429_v49 = vadd.f32 %v9259_v40, %v3692_v46  ;;  %v9432_v23 = vadd.f32 %v9259_v40, %v3709_v19 }
 0x619   :  { %v9435_v50 = vadd.f32 %v9259_v40, %v3693_v2  ;;  %v9438_v36 = vadd.f32 %v9259_v40, %v3710_v22  ;;  %v3795_v38 = vmax.f32 %v3731_v58, 0.0  ;;  %v3732_v30 = vadd.f32 %v9259_v40, %v9287_v62 }
 0x61a   :  { %3890 = vxpose.xlu1.b32.cont [5/16] (narrow) %v3810_v54, 8  ;;  %3858 = vxpose.xlu0.b32.cont [5/16] (narrow) %v3794_v4, 8  ;;  %v9443_v14 = vadd.f32 %v9259_v40, %v3694_v47  ;;  %v3715_v46 = vmul.f32 %v9250_v39, %v10794_v17  ;;  %v3716_v57 = vmul.f32 %v9250_v39, %v10795_v56  ;;  %v3812_v10 = vmax.f32 %v3748_v18, 0.0 }
 0x61b   :  { %v3718_v2 = vmul.f32 %v9250_v39, %v10796_v20  ;;  %v3749_v48 = vadd.f32 %v9259_v40, %v9307_v21  ;;  %v9454_v55 = vadd.f32 %v9259_v40, %v3711_v0  ;;  %v9458_v62 = vadd.f32 %v9259_v40, %v9333_v24  ;;  %v10803_v20 = vld [vmem:[#allocation212_spill] sm:$0xff] }
 0x61c   :  { %v9461_v47 = vadd.f32 %v9259_v40, %v3712_v8  ;;  %v9465_v59 = vadd.f32 %v9259_v40, %v9337_v45  ;;  %v9468_v61 = vadd.f32 %v9259_v40, %v3713_v37  ;;  %v9472_v21 = vadd.f32 %v9259_v40, %v9341_v11  ;;  %v10797_v45 = vld [vmem:[#allocation114_spill] sm:$0xff]  ;;  %v10800_v37 = vld [vmem:[#allocation25_spill] sm:$0xff] }
 0x61d   :  { %v9475_v63 = vadd.f32 %v9259_v40, %v3714_v41  ;;  %v3796_v24 = vmax.f32 %v3732_v30, 0.0  ;;  %v3733_v13 = vadd.f32 %v9259_v40, %v9291_v28  ;;  %v9481_v19 = vadd.f32 %v9259_v40, %v9347_v44 }
 0x61e   :  { %3891 = vxpose.xlu1.b32.cont [6/16] (narrow) %v3811_v12, 8  ;;  %3859 = vxpose.xlu0.b32.cont [6/16] (narrow) %v3795_v38, 8  ;;  %v3664_v22 = vmul.f32 %v9250_v39, %v10797_v45  ;;  %v3680_v0 = vmul.f32 %v9250_v39, %v10798_v52  ;;  %v3813_v11 = vmax.f32 %v3749_v48, 0.0  ;;  %v9488_v42 = vadd.f32 %v9259_v40, %v3715_v46  ;;  %v10802_v38 = vld [vmem:[#allocation256_spill] sm:$0xff]  ;;  %v10805_v52 = vld [vmem:[#allocation257_spill] sm:$0xff] }
 0x61f   :  { %v9492_v54 = vadd.f32 %v9259_v40, %v9351_v60  ;;  %v9495_v28 = vadd.f32 %v9259_v40, %v3716_v57  ;;  %v9499_v44 = vadd.f32 %v9259_v40, %v9355_v29  ;;  %v9503_v4 = vadd.f32 %v9259_v40, %v9269_v5  ;;  %v10799_v5 = vld [vmem:[#allocation26_spill] sm:$0xff]  ;;  %v10804_v48 = vld [vmem:[#allocation144_spill] sm:$0xff] }
 0x620   :  { %v9507_v58 = vadd.f32 %v9259_v40, %v9359_v25  ;;  %v9510_v26 = vadd.f32 %v9259_v40, %v3718_v2  ;;  %v3797_v60 = vmax.f32 %v3733_v13, 0.0  ;;  %v3750_v8 = vadd.f32 %v9259_v40, %v9311_v34 }
 0x621   :  { %v3734_v1 = vadd.f32 %v9259_v40, %v9295_v43  ;;  %v9518_v29 = vadd.f32 %v9259_v40, %v9363_v7  ;;  %v3665_v25 = vmul.f32 %v9250_v39, %v10799_v5  ;;  %v3681_v33 = vmul.f32 %v9250_v39, %v10800_v37  ;;  %v10801_v43 = vld [vmem:[#allocation181_spill] sm:$0xff]  ;;  %v10807_v37 = vld [vmem:[#allocation112_spill] sm:$0xff] }
 0x622   :  { %3892 = vxpose.xlu1.b32.cont [7/16] (narrow) %v3812_v10, 8  ;;  %3860 = vxpose.xlu0.b32.cont [7/16] (narrow) %v3796_v24, 8  ;;  %v3814_v41 = vmax.f32 %v3750_v8, 0.0  ;;  %v3751_v12 = vadd.f32 %v9259_v40, %v3680_v0  ;;  %v3735_v34 = vadd.f32 %v9259_v40, %v3664_v22  ;;  %v3666_v7 = vmul.f32 %v9250_v39, %v10801_v43 }
 0x623   :  { %v3798_v18 = vmax.f32 %v3734_v1, 0.0  ;;  %v3682_v30 = vmul.f32 %v9250_v39, %v10802_v38  ;;  %v3752_v56 = vadd.f32 %v9259_v40, %v3681_v33  ;;  %v3736_v57 = vadd.f32 %v9259_v40, %v3665_v25  ;;  %v10809_v38 = vld [vmem:[#allocation146_spill] sm:$0xff] }
 0x624   :  { %v3815_v17 = vmax.f32 %v3751_v12, 0.0  ;;  %v3799_v46 = vmax.f32 %v3735_v34, 0.0  ;;  %v3667_v2 = vmul.f32 %v9250_v39, %v10803_v20  ;;  %v3683_v10 = vmul.f32 %v9250_v39, %v10804_v48 }
 0x625   :  { %v3816_v24 = vmax.f32 %v3752_v56, 0.0  ;;  %v3800_v13 = vmax.f32 %v3736_v57, 0.0  ;;  %v3753_v45 = vadd.f32 %v9259_v40, %v3682_v30  ;;  %v3737_v22 = vadd.f32 %v9259_v40, %v3666_v7 }
 0x626   :  { %3893 = vxpose.xlu1.b32.cont [8/16] (narrow) %v3813_v11, 8  ;;  %3861 = vxpose.xlu0.b32.cont [8/16] (narrow) %v3797_v60, 8  ;;  %v3668_v0 = vmul.f32 %v9250_v39, %v10805_v52  ;;  %v10806_v11 = vld [vmem:[#allocation217_spill] sm:$0xff]  ;;  %v3754_v5 = vadd.f32 %v9259_v40, %v3683_v10  ;;  %v3738_v25 = vadd.f32 %v9259_v40, %v3667_v2  ;;  %v3822_v52 = vmax.f32 %v9390_v51, 0.0 }
 0x627   :  { %v3684_v60 = vmul.f32 %v9250_v39, %v10806_v11  ;;  %v3817_v8 = vmax.f32 %v3753_v45, 0.0  ;;  %v3801_v1 = vmax.f32 %v3737_v22, 0.0  ;;  %v3669_v33 = vmul.f32 %v9250_v39, %v10807_v37 }
 0x628   :  { %v3818_v12 = vmax.f32 %v3754_v5, 0.0  ;;  %v3802_v34 = vmax.f32 %v3738_v25, 0.0  ;;  %v3739_v7 = vadd.f32 %v9259_v40, %v3668_v0  ;;  %v3670_v30 = vmul.f32 %v9250_v39, %v10809_v38 }
 0x629   :  { %v3755_v43 = vadd.f32 %v9259_v40, %v3684_v60  ;;  %v3740_v2 = vadd.f32 %v9259_v40, %v3669_v33  ;;  %v3839_v0 = vmax.f32 %v9393_v32, 0.0  ;;  %v3823_v11 = vmax.f32 %v9396_v16, 0.0 }
 0x62a   :  { %3894 = vxpose.xlu1.b32.cont [9/16] (narrow) %v3814_v41, 8  ;;  %3862 = vxpose.xlu0.b32.cont [9/16] (narrow) %v3798_v18, 8  ;;  %v10808_v41 = vld [vmem:[#allocation116_spill] sm:$0xff]  ;;  %v3803_v57 = vmax.f32 %v3739_v7, 0.0  ;;  %v3824_v60 = vmax.f32 %v9402_v31, 0.0  ;;  %v3842_v51 = vmax.f32 %v9420_v53, 0.0 }
 0x62b   :  { %v3685_v18 = vmul.f32 %v9250_v39, %v10808_v41  ;;  %v3819_v56 = vmax.f32 %v3755_v43, 0.0  ;;  %v3804_v10 = vmax.f32 %v3740_v2, 0.0  ;;  %v3826_v32 = vmax.f32 %v9423_v15, 0.0 }
 0x62c   :  { %v3843_v16 = vmax.f32 %v9426_v35, 0.0  ;;  %v3844_v31 = vmax.f32 %v9432_v23, 0.0  ;;  %v3829_v53 = vmax.f32 %v9443_v14, 0.0  ;;  %v3846_v15 = vmax.f32 %v9454_v55, 0.0 }
 0x62d   :  { %v3756_v20 = vadd.f32 %v9259_v40, %v3685_v18  ;;  %v3830_v35 = vmax.f32 %v9458_v62, 0.0  ;;  %v3831_v23 = vmax.f32 %v9465_v59, 0.0  ;;  %v3849_v14 = vmax.f32 %v9475_v63, 0.0 }
 0x62e   :  { %3895 = vxpose.xlu1.b32.cont [10/16] (narrow) %v3815_v17, 8  ;;  %3863 = vxpose.xlu0.b32.cont [10/16] (narrow) %v3799_v46, 8  ;;  %v10810_v17 = vld [vmem:[#allocation28_spill] sm:$0xff]  ;;  %v3833_v55 = vmax.f32 %v9481_v19, 0.0  ;;  %v3850_v62 = vmax.f32 %v9488_v42, 0.0  ;;  %v3851_v59 = vmax.f32 %v9495_v28, 0.0 }
 0x62f   :  { %v3686_v46 = vmul.f32 %v9250_v39, %v10810_v17  ;;  %v3820_v48 = vmax.f32 %v3756_v20, 0.0  ;;  %v3838_v39 = vmax.f32 %v9387_v27, 0.0  ;;  %v3825_v27 = vmax.f32 %v9410_v6, 0.0 }
 0x630   :  { %v3845_v6 = vmax.f32 %v9438_v36, 0.0  ;;  %v3832_v36 = vmax.f32 %v9472_v21, 0.0  ;;  %v3852_v21 = vmax.f32 %v9503_v4, 0.0  ;;  %v3836_v63 = vmax.f32 %v9507_v58, 0.0 }
 0x631   :  { %v3853_v19 = vmax.f32 %v9510_v26, 0.0  ;;  %v3837_v42 = vmax.f32 %v9518_v29, 0.0 }
 0x632   :  { %3896 = vxpose.xlu1.b32.cont [11/16] (narrow) %v3816_v24, 8  ;;  %3864 = vxpose.xlu0.b32.cont [11/16] (narrow) %v3800_v13, 8  ;;  %v3757_v24 = vadd.f32 %v9259_v40, %v3686_v46  ;;  %v3741_v13 = vadd.f32 %v9259_v40, %v3670_v30  ;;  %v3840_v40 = vmax.f32 %v9399_v3, 0.0  ;;  %v3827_v3 = vmax.f32 %v9429_v49, 0.0 }
 0x633   :  { %v3847_v49 = vmax.f32 %v9461_v47, 0.0  ;;  %v3834_v47 = vmax.f32 %v9492_v54, 0.0 }
 0x634   :  { %v3821_v45 = vmax.f32 %v3757_v24, 0.0  ;;  %v3805_v22 = vmax.f32 %v3741_v13, 0.0 }
 0x636   :  { %3897 = vxpose.xlu1.b32.cont [12/16] (narrow) %v3817_v8, 8  ;;  %3865 = vxpose.xlu0.b32.cont [12/16] (narrow) %v3801_v1, 8  ;;  %v3841_v8 = vmax.f32 %v9405_v9, 0.0  ;;  %v3828_v9 = vmax.f32 %v9435_v50, 0.0  ;;  %v3848_v50 = vmax.f32 %v9468_v61, 0.0  ;;  %v3835_v61 = vmax.f32 %v9499_v44, 0.0 }
 0x63a   :  { %3898 = vxpose.xlu1.b32.cont [13/16] (narrow) %v3818_v12, 8  ;;  %3866 = vxpose.xlu0.b32.cont [13/16] (narrow) %v3802_v34, 8 }
 0x63e   :  { %3899 = vxpose.xlu1.b32.cont [14/16] (narrow) %v3819_v56, 8  ;;  %3867 = vxpose.xlu0.b32.cont [14/16] (narrow) %v3803_v57, 8 }
 0x642   :  { %3900 = vxpose.xlu1.b32.cont [15/16] (narrow) %v3820_v48, 8  ;;  %3868 = vxpose.xlu0.b32.cont [15/16] (narrow) %v3804_v10, 8 }
 0x646   :  { %3901 = vxpose.xlu1.b32.end [16/16] (narrow) %v3821_v45, 8  ;;  %3869 = vxpose.xlu0.b32.end [16/16] (narrow) %v3805_v22, 8 }
 0x64a   :  { %3950 = vxpose.xlu1.b32.start [1/16] (narrow) %v3838_v39, 8  ;;  %3918 = vxpose.xlu0.b32.start [1/16] (narrow) %v3822_v52, 8 }
 0x64e   :  { %3951 = vxpose.xlu1.b32.cont [2/16] (narrow) %v3839_v0, 8  ;;  %3919 = vxpose.xlu0.b32.cont [2/16] (narrow) %v3823_v11, 8 }
 0x652   :  { %3952 = vxpose.xlu1.b32.cont [3/16] (narrow) %v3840_v40, 8  ;;  %3920 = vxpose.xlu0.b32.cont [3/16] (narrow) %v3824_v60, 8 }
 0x656   :  { %3953 = vxpose.xlu1.b32.cont [4/16] (narrow) %v3841_v8, 8  ;;  %3921 = vxpose.xlu0.b32.cont [4/16] (narrow) %v3825_v27, 8 }
 0x65a   :  { %3954 = vxpose.xlu1.b32.cont [5/16] (narrow) %v3842_v51, 8  ;;  %3922 = vxpose.xlu0.b32.cont [5/16] (narrow) %v3826_v32, 8 }
 0x65e   :  { %3955 = vxpose.xlu1.b32.cont [6/16] (narrow) %v3843_v16, 8  ;;  %3923 = vxpose.xlu0.b32.cont [6/16] (narrow) %v3827_v3, 8 }
 0x662   :  { %3956 = vxpose.xlu1.b32.cont [7/16] (narrow) %v3844_v31, 8  ;;  %3924 = vxpose.xlu0.b32.cont [7/16] (narrow) %v3828_v9, 8 }
 0x666   :  { %3957 = vxpose.xlu1.b32.cont [8/16] (narrow) %v3845_v6, 8  ;;  %3925 = vxpose.xlu0.b32.cont [8/16] (narrow) %v3829_v53, 8 }
 0x66a   :  { %3958 = vxpose.xlu1.b32.cont [9/16] (narrow) %v3846_v15, 8  ;;  %3926 = vxpose.xlu0.b32.cont [9/16] (narrow) %v3830_v35, 8 }
 0x66e   :  { %3959 = vxpose.xlu1.b32.cont [10/16] (narrow) %v3847_v49, 8  ;;  %3927 = vxpose.xlu0.b32.cont [10/16] (narrow) %v3831_v23, 8 }
 0x672   :  { %3960 = vxpose.xlu1.b32.cont [11/16] (narrow) %v3848_v50, 8  ;;  %3928 = vxpose.xlu0.b32.cont [11/16] (narrow) %v3832_v36, 8 }
 0x676   :  { %3961 = vxpose.xlu1.b32.cont [12/16] (narrow) %v3849_v14, 8  ;;  %3929 = vxpose.xlu0.b32.cont [12/16] (narrow) %v3833_v55, 8 }
 0x67a   :  { %3962 = vxpose.xlu1.b32.cont [13/16] (narrow) %v3850_v62, 8  ;;  %3930 = vxpose.xlu0.b32.cont [13/16] (narrow) %v3834_v47, 8 }
 0x67e   :  { %3963 = vxpose.xlu1.b32.cont [14/16] (narrow) %v3851_v59, 8  ;;  %3931 = vxpose.xlu0.b32.cont [14/16] (narrow) %v3835_v61, 8 }
 0x682   :  { %3964 = vxpose.xlu1.b32.cont [15/16] (narrow) %v3852_v21, 8  ;;  %3932 = vxpose.xlu0.b32.cont [15/16] (narrow) %v3836_v63, 8 }
 0x686   :  { %3965 = vxpose.xlu1.b32.end [16/16] (narrow) %v3853_v19, 8  ;;  %3933 = vxpose.xlu0.b32.end [16/16] (narrow) %v3837_v42, 8 }
 0x68a   :  { %v3902_v54 = vpop.trf.xlu1  ;;  %v3870_v1 = vpop.trf.xlu0 }
 0x68b   :  { %3983 = vst [vmem:[#allocation2 + $0x8] sm:$0xff] %v3902_v54  ;;  %3982 = vst [vmem:[#allocation2] sm:$0xff] %v3870_v1 }
 0x6ca   :  { %v3966_v28 = vpop.trf.xlu1  ;;  %v3934_v44 = vpop.trf.xlu0 }
 0x6cb   :  { %3986 = vst [vmem:[#allocation2 + $0x18] sm:$0xff] %v3966_v28  ;;  %3985 = vst [vmem:[#allocation2 + $0x10] sm:$0xff] %v3934_v44 }
 0x6cc   :  { %4380 = shalt.err (!%p4377_p4)
}
 0x6cd   :  { %s4381_s9 = scalar_lea.hbm %s9608_s5, 512 }
 0x6ce   :  { %p4382_p5 = scmp.ne.s32.totalorder %s9608_s5, %s4381_s9  ;;  %p4385_p6 = scmp.lt.u32.totalorder %s4381_s9, %s9608_s5 }
 0x6d0   :  { %p4387_p7 = pnand %p4385_p6, %p4382_p5 }
 0x6d2   :  { %4390 = shalt.err (!%p4387_p7)
}
 0x6d3   :  { %s4402_s17 = smov 256  }
 0x6d4   :  { %3998 = dma.vmem_to_hbm [thread:$0]  %s3993_s4, 512, %s9608_s5, [#allocation3], %s4402_s17, %s4402_s17, %s4396_s23  }
 0x6d5   :  { %4391 = dma.done.wait [#allocation3], 512  }
 0x6d6   :  { %4392 = vsyncadd [#allocation3], 4294966784 }
 0x6d7   :  { %4002 = vsyncpa [#allocation3], 1 }

</bundles_post_ra>
